<compile_context>
chip_gen: v7x
topology: tpu7x:2x2x1
jax: 0.10.0
libtpu: 0.0.40
codegen_flags: <defaults>
</compile_context>

<pallas_src>
import math
import functools

import jax
import jax.numpy as jnp
from jax import lax
from jax.experimental import pallas as pl
from jax.experimental.pallas import tpu as pltpu


# -----------------------------------------------------------------------------
# Path 1: small vocab — table resident in VMEM, lookup via one-hot on the MXU.
# -----------------------------------------------------------------------------
def _onehot_pe_kernel(ids_ref, emb_ref, pe_ref, out_ref):
    # ids_ref : (ts, 1)  int32, VMEM
    # emb_ref : (V, D)   table dtype, VMEM (constant block index -> loaded once)
    # pe_ref  : (ts, D)  float32, VMEM
    # out_ref : (ts, D)  table dtype
    ts = ids_ref.shape[0]
    v = emb_ref.shape[0]
    ids = ids_ref[...]                                           # (ts, 1)
    onehot = (lax.broadcasted_iota(jnp.int32, (ts, v), 1) == ids).astype(emb_ref.dtype)
    rows = jnp.dot(onehot, emb_ref[...],
                   preferred_element_type=jnp.float32,
                   precision=jax.lax.Precision.HIGHEST)          # (ts, D) f32
    out_ref[...] = (rows + pe_ref[...]).astype(out_ref.dtype)


# -----------------------------------------------------------------------------
# Path 2: large vocab — HBM row gather, double-buffered across grid steps,
# one bulk semaphore wait per tile, unrolled DMA-issue loop.
# -----------------------------------------------------------------------------
def _gather_pe_kernel(ids_ref, emb_hbm, pe_ref, out_ref, gbuf, sems):
    # ids_ref : (B*s_pad,) int32, SMEM (scalar-prefetched, 1D to avoid sublane pad)
    # emb_hbm : (V, D) table dtype, HBM (never copied wholesale into VMEM)
    # pe_ref  : (ts, D) float32, VMEM tile (batch-innermost grid -> reused)
    # out_ref : (ts, D) table dtype (batch dim squeezed)
    # gbuf    : (2, ts, D) table dtype — double-buffered gather landing buffer
    # sems    : (2,) DMA semaphores, one per buffer
    j = pl.program_id(0)
    b = pl.program_id(1)
    n_j = pl.num_programs(0)
    n_b = pl.num_programs(1)
    ts = gbuf.shape[1]
    s_pad = n_j * ts

    linear = j * n_b + b          # sequential step index (j outer, b inner)
    total = n_j * n_b
    slot = linear % 2

    def issue_rows(lin, dst_slot):
        jj = lin // n_b
        bb = lin % n_b
        base = bb * s_pad + jj * ts

        def body(k, carry):
            tok = ids_ref[base + k]                              # scalar SMEM load
            pltpu.make_async_copy(
                emb_hbm.at[tok], gbuf.at[dst_slot, k], sems.at[dst_slot]
            ).start()
            return carry

        lax.fori_loop(0, ts, body, 0, unroll=8)

    # Prime the current buffer only on the very first grid step; every other
    # step's buffer was filled by the previous step's prefetch below.
    @pl.when(linear == 0)
    def _():
        issue_rows(0, 0)

    # Prefetch the next step's rows (ids are fully resident in SMEM) so the
    # scattered-HBM latency is hidden behind this step's wait/compute/store.
    @pl.when(linear + 1 < total)
    def _():
        issue_rows(linear + 1, (linear + 1) % 2)

    # Single bulk wait: DMA semaphores accumulate bytes, so waiting for one
    # (ts, D)-sized transfer retires all `ts` row copies of this tile.
    # (Descriptor src is the other slot purely to provide the byte count;
    #  dst is the slot we are about to read so the wait orders the loads.)
    pltpu.make_async_copy(gbuf.at[1 - slot], gbuf.at[slot], sems.at[slot]).wait()

    rows = gbuf[slot]                                            # (ts, D)
    out_ref[...] = (rows.astype(jnp.float32) + pe_ref[...]).astype(out_ref.dtype)


# -----------------------------------------------------------------------------
# Positional-encoding table (standard, non-learnable).
# -----------------------------------------------------------------------------
def make_sinusoidal_pe(max_len: int, embed_dim: int) -> jnp.ndarray:
    pos = jnp.arange(max_len, dtype=jnp.float32)[:, None]                   # (L, 1)
    div = jnp.exp(jnp.arange(0, embed_dim, 2, dtype=jnp.float32)
                  * (-math.log(10000.0) / embed_dim))                       # (D/2,)
    ang = pos * div                                                         # (L, D/2)
    pe = jnp.zeros((max_len, embed_dim), dtype=jnp.float32)
    pe = pe.at[:, 0::2].set(jnp.sin(ang))
    pe = pe.at[:, 1::2].set(jnp.cos(ang))
    return pe
    # TODO(synk): use_learnable=True just swaps this table for a learned
    # (max_len, D) parameter; the kernels are unchanged.


def _round_up(x: int, m: int) -> int:
    return ((x + m - 1) // m) * m


@functools.partial(jax.jit, static_argnames=("tile_s", "table_in_vmem"))
def embedding_with_pe(ids, emb_table, pe_table, *, tile_s: int = 512,
                      table_in_vmem=None):
    """ids: (B, S) int -> (B, S, D) in emb_table.dtype == embedding(ids) + pe[:S]."""
    B, S = ids.shape
    V, D = emb_table.shape
    if S > pe_table.shape[0]:
        raise ValueError(f"sequence length {S} exceeds PE max_len {pe_table.shape[0]}")

    out_dtype = emb_table.dtype
    # TODO(synk): PyTorch nn.Embedding raises on out-of-range ids; here we clamp.
    ids32 = jnp.clip(ids.astype(jnp.int32), 0, V - 1)

    # Tokens per grid step: multiple of 8 (sublane), capped by (padded) S.
    ts = max(8, min(_round_up(tile_s, 8), _round_up(S, 8)))
    s_pad = _round_up(S, ts)
    n_tiles = s_pad // ts

    pe_s = pe_table[:S].astype(jnp.float32)
    if s_pad != S:
        ids32 = jnp.pad(ids32, ((0, 0), (0, s_pad - S)))          # pad with token 0
        pe_s = jnp.pad(pe_s, ((0, s_pad - S), (0, 0)))

    if table_in_vmem is None:
        table_bytes = V * D * jnp.dtype(emb_table.dtype).itemsize
        # Keep the resident table and the (ts, V) one-hot small even on v7x (64 MiB VMEM).
        table_in_vmem = (table_bytes <= (2 << 20)) and (V <= 2048)

    grid = (n_tiles, B)          # batch innermost: PE block index constant across b
    out_shape = jax.ShapeDtypeStruct((B, s_pad, D), out_dtype)

    if table_in_vmem:
        # -------- VMEM-resident fast path (one-hot MXU lookup) --------
        ids_col = ids32.reshape(B * s_pad, 1)
        out = pl.pallas_call(
            _onehot_pe_kernel,
            out_shape=out_shape,
            grid_spec=pltpu.PrefetchScalarGridSpec(
                num_scalar_prefetch=0,
                grid=grid,
                in_specs=[
                    pl.BlockSpec((ts, 1), lambda j, b: (b * n_tiles + j, 0)),
                    pl.BlockSpec((V, D), lambda j, b: (0, 0)),     # whole table, resident
                    pl.BlockSpec((ts, D), lambda j, b: (j, 0)),    # PE tile
                ],
                out_specs=pl.BlockSpec((None, ts, D), lambda j, b: (b, j, 0)),
            ),
            compiler_params=pltpu.CompilerParams(
                dimension_semantics=("parallel", "parallel")),
        )(ids_col, emb_table, pe_s)
    else:
        # -------- HBM gather path (double-buffered row DMAs) --------
        # Grid must run sequentially (cross-step prefetch into persistent
        # scratch), hence "arbitrary" on both axes.
        ids_flat = ids32.reshape(B * s_pad)
        out = pl.pallas_call(
            _gather_pe_kernel,
            out_shape=out_shape,
            grid_spec=pltpu.PrefetchScalarGridSpec(
                num_scalar_prefetch=1,                             # ids -> SMEM
                grid=grid,
                in_specs=[
                    pl.BlockSpec(memory_space=pl.ANY),             # table stays in HBM
                    pl.BlockSpec((ts, D), lambda j, b, ids: (j, 0)),
                ],
                out_specs=pl.BlockSpec((None, ts, D), lambda j, b, ids: (b, j, 0)),
                scratch_shapes=[
                    pltpu.VMEM((2, ts, D), emb_table.dtype),       # double buffer, native dtype
                    pltpu.SemaphoreType.DMA((2,)),
                ],
            ),
            compiler_params=pltpu.CompilerParams(
                dimension_semantics=("arbitrary", "arbitrary")),
        )(ids_flat, emb_table, pe_s)

    if s_pad != S:
        out = out[:, :S, :]
    return out


if __name__ == "__main__":
    # Small shapes consistent with the module; D = 128 keeps stores lane-dense.
    vocab_size, embed_dim, max_len = 512, 128, 256
    batch, seq = 2, 128

    key = jax.random.PRNGKey(0)
    k_emb, k_ids = jax.random.split(key)

    # Deterministic synthetic parameters (nn.Embedding default init ~ N(0,1)).
    emb_table = jax.random.normal(k_emb, (vocab_size, embed_dim), dtype=jnp.float32)
    pe_table = make_sinusoidal_pe(max_len, embed_dim)
    ids = jax.random.randint(k_ids, (batch, seq), 0, vocab_size, dtype=jnp.int32)

    # Plain-JAX reference (gather + PE add).
    ref = emb_table[ids] + pe_table[:seq][None, :, :]

    # Path 1: small-vocab fast path (VMEM-resident table, MXU one-hot lookup).
    out_fast = jax.block_until_ready(embedding_with_pe(ids, emb_table, pe_table))
    assert out_fast.shape == (batch, seq, embed_dim)
    # Lookup-through-matmul may round through reduced-precision MXU passes;
    # tolerance still cleanly separates "right row" from "wrong row".
    assert bool(jnp.allclose(out_fast, ref, atol=1e-2, rtol=1e-2))

    # Path 2: large-vocab path (HBM row gather, double-buffered, bulk wait),
    # forced here with a small tile so the grid has multiple steps.
    out_gather = jax.block_until_ready(
        embedding_with_pe(ids, emb_table, pe_table, tile_s=64, table_in_vmem=False))
    assert out_gather.shape == (batch, seq, embed_dim)
    assert bool(jnp.allclose(out_gather, ref, atol=1e-5, rtol=1e-5))

    print("KERNEL_OK")
</pallas_src>

<mosaic_0001>
module attributes {stable_mosaic.version = 11 : i64} {
  func.func @_onehot_pe_kernel(%arg0: i32, %arg1: i32, %arg2: memref<128x1xi32, #tpu.memory_space<vmem>>, %arg3: memref<512x128xf32, #tpu.memory_space<vmem>>, %arg4: memref<128x128xf32, #tpu.memory_space<vmem>>, %arg5: memref<1x128x128xf32, #tpu.memory_space<vmem>>) attributes {dimension_semantics = [#tpu.dimension_semantics<parallel>, #tpu.dimension_semantics<parallel>], iteration_bounds = array<i64: 1, 2>, scalar_prefetch = 0 : i64, scratch_operands = 0 : i64, tpu.core_type = #tpu.core_type<tc>, window_params = [{transform_indices = @transform_0, window_bounds = array<i64: 128, 1>}, {pipeline_mode = #tpu.pipeline_mode<synchronous>, transform_indices = @transform_1, window_bounds = array<i64: 512, 128>}, {transform_indices = @transform_2, window_bounds = array<i64: 128, 128>}, {transform_indices = @transform_3, window_bounds = array<i64: 1, 128, 128>}]} {
    %c0 = arith.constant 0 : index
    %c0_0 = arith.constant 0 : index
    %0 = vector.load %arg2[%c0, %c0_0] : memref<128x1xi32, #tpu.memory_space<vmem>>, vector<128x1xi32>
    %1 = tpu.iota {dimensions = array<i32: 1>} : vector<128x512xi32>
    %2 = vector.broadcast %0 : vector<128x1xi32> to vector<128x512xi32>
    %3 = arith.cmpi eq, %1, %2 : vector<128x512xi32>
    %4 = arith.extui %3 : vector<128x512xi1> to vector<128x512xi32>
    %5 = arith.sitofp %4 : vector<128x512xi32> to vector<128x512xf32>
    %c0_1 = arith.constant 0 : index
    %c0_2 = arith.constant 0 : index
    %6 = vector.load %arg3[%c0_1, %c0_2] : memref<512x128xf32, #tpu.memory_space<vmem>>, vector<512x128xf32>
    %cst = arith.constant dense<0.000000e+00> : vector<128x128xf32>
    %7 = tpu.matmul %5, %6, %cst {dimension_numbers = #tpu.dot_dimension_numbers<[1], [0], [0], [1], [0, 0, 1, 1], [], []>, precision = #tpu.contract_precision<fp32>} : vector<128x512xf32>, vector<512x128xf32>, vector<128x128xf32> -> vector<128x128xf32>
    %c0_3 = arith.constant 0 : index
    %c0_4 = arith.constant 0 : index
    %8 = vector.load %arg4[%c0_3, %c0_4] : memref<128x128xf32, #tpu.memory_space<vmem>>, vector<128x128xf32>
    %9 = arith.addf %7, %8 : vector<128x128xf32>
    %c0_5 = arith.constant 0 : index
    %c0_6 = arith.constant 0 : index
    %c0_7 = arith.constant 0 : index
    %10 = vector.load %arg5[%c0_5, %c0_6, %c0_7] : memref<1x128x128xf32, #tpu.memory_space<vmem>>, vector<1x128x128xf32>
    %11 = vector.shape_cast %10 : vector<1x128x128xf32> to vector<128x128xf32>
    %12 = vector.shape_cast %9 : vector<128x128xf32> to vector<1x128x128xf32>
    tpu.vector_store %arg5[%c0_5, %c0_6, %c0_7], %12 {strides = array<i32>} : memref<1x128x128xf32, #tpu.memory_space<vmem>>, vector<1x128x128xf32>,
    return
  }
  func.func @transform_0(%arg0: i32, %arg1: i32) -> (i32, i32) {
    %c1_i32 = arith.constant 1 : i32
    %0 = arith.muli %arg1, %c1_i32 : i32
    %1 = arith.addi %0, %arg0 : i32
    %c0_i32 = arith.constant 0 : i32
    %c0_i32_0 = arith.constant 0 : i32
    return %1, %c0_i32 : i32, i32
  }
  func.func @transform_1(%arg0: i32, %arg1: i32) -> (i32, i32) {
    %c0_i32 = arith.constant 0 : i32
    %c0_i32_0 = arith.constant 0 : i32
    %c0_i32_1 = arith.constant 0 : i32
    return %c0_i32, %c0_i32_0 : i32, i32
  }
  func.func @transform_2(%arg0: i32, %arg1: i32) -> (i32, i32) {
    %c0_i32 = arith.constant 0 : i32
    %c0_i32_0 = arith.constant 0 : i32
    return %arg0, %c0_i32 : i32, i32
  }
  func.func @transform_3(%arg0: i32, %arg1: i32) -> (i32, i32, i32) {
    %c0_i32 = arith.constant 0 : i32
    %c0_i32_0 = arith.constant 0 : i32
    return %arg1, %arg0, %c0_i32 : i32, i32, i32
  }
}

</mosaic_0001>

<bundles_post_ra>
// kernel: embedding_with_pe.1
= control target key start
LH: loop header
LB: loop body
LE: loop exit
PB: predicated region body
PF: predicated region fallthrough
CT: control target
= control target key end

     0   :  { %8 = vsyncpa [#allocation3], 0  ;;  %s9491_s0 = inlined_call_operand.vmem [shape: s32[256,1], index: 0, kind: input, shape index: {}]   ;;  %s9492_s1 = inlined_call_operand.hbm [shape: f32[512,128], index: 1, kind: input, shape index: {}]   ;;  %s9493_s2 = inlined_call_operand.vmem [shape: f32[128,128], index: 2, kind: input, shape index: {}]   ;;  %s9494_s3 = inlined_call_operand.hbm [shape: f32[2,128,128], index: 3, kind: output, shape index: {}]  }
   0x1   :  { %9 = vsyncpa [#allocation4], 0 }
   0x2   :  { %11 = vsyncpa [#allocation4 + $0x1], 0  ;;  %s5940_s12 = smov 0   ;;  %s5942_s13 = smov 0  }
   0x3   :  { %s5944_s14 = smov 0   ;;  %s5946_s15 = smov 0  }
   0x4   :  { %s5948_s16 = smov 0   ;;  %s5950_s17 = smov 0  }
   0x5 LB: > { %s4107_s18 = sadd.s32 4294967295, %s5909_s17   ;;  %s4108_s19 = sadd.s32 4294967294, %s5909_s17   ;;  %s5909_s17 = sphi %s5950_s17, %s17_s17   ;;  %s5905_s16 = sphi %s5948_s16, %s10370_s16   ;;  %s5901_s15 = sphi %s5946_s15, %s10369_s15   ;;  %s5897_s14 = sphi %s5944_s14, %s10368_s14   ;;  %s5893_s13 = sphi %s5942_s13, %s10367_s13   ;;  %s5889_s12 = sphi %s5940_s12, %s10366_s12  }
   0x6   : > { %s26_s20 = sadd.s32 1, %s5905_s16  ;;  %s113_s21 = sadd.s32 1, %s5897_s14 }
   0x7   : > { %p27_p0 = scmp.ge.s32.totalorder %s26_s20, 2  ;;  %p123_p1 = scmp.ne.s32.totalorder %s5897_s14, %s5893_s13 }
   0x8   : > { %p124_p2 = scmp.eq.s32.totalorder %s4107_s18, 1  ;;  %p129_p3 = scmp.ne.s32.totalorder %s5893_s13, %s5889_s12 }
   0x9   : > { %s10372_s20 = smov (%p27_p0, %s26_s20), 0  ;;  %p130_p5 = scmp.eq.s32.totalorder %s4108_s19, 1 }
   0xa   : > { %p5980_p4 = por %p124_p2, %p123_p1  ;;  %s108_s23 = ssub.s32 %s5905_s16, %s10372_s20 }
   0xb   : > { %p4109_p6 = scmp.ge.s32.totalorder %s5909_s17, 1  ;;  %p111_p7 = scmp.eq.s32.totalorder %s108_s23, 0 }
   0xc   : > { %s9818_s22 = scalar_select %p5980_p4, 1, 0 }
   0xd   : > { %p5987_p8 = por %p130_p5, %p129_p3  ;;  %p137_p9 = scmp.lt.s32.totalorder %s5909_s17, 3 }
   0xe   : > { %s5993_s25 = scalar_select %p111_p7, %s5897_s14, %s113_s21  }
   0xf   : > { %s9819_s24 = scalar_select %p5987_p8, 1, 0 }
  0x10   : > { %p5995_p10 = pnand %p4109_p6, %p137_p9  ;;  %p5999_p11 = scmp.eq.s32.totalorder %s4107_s18, 0 }
  0x11   : > { %s5911_s28 = smov [#allocation2]   ;;  %s5799_s6 = scalar_lea.hbm %s9492_s1, 8192 }
  0x12   : > { %s9820_s26 = scalar_select %p5995_p10, 1, 0 }
  0x13   : > { %s9821_s27 = scalar_select %p5999_p11, 1, 0 }
  0x14   : > { %p5730_p12 = pneg %p5995_p10  ;;  %s149_s29 = sshll.u32 %s5911_s28, 4  ;;  %s150_s29 = int_to_ptr.vmem [resolvable:$true] %s149_s29 }
  0x15   : > { %p5800_p0 = scmp.ne.s32.totalorder %s9492_s1, %s5799_s6  ;;  %p5806_p5 = scmp.lt.u32.totalorder %s5799_s6, %s9492_s1 }
  0x16   : > { %p6007_p13 = pnand %p5999_p11, %p5730_p12 }
  0x18   : > { %p5801_p1 = pneg %p6007_p13 }
  0x1a   : > { %p5802_p2 = pnand %p5801_p1, %p5800_p0 }
  0x1c   : > { %p5803_p3 = pneg %p5802_p2 }
  0x1e   : > { %p5808_p6 = pnand %p5806_p5, %p5803_p3 }
  0x20   : > { %5811 = shalt.err (!%p5808_p6)
}
  0x21   : > { %s5812_s11 = scalar_lea.vmem %s150_s29, 8192  ;;  %p5820_p8 = scmp.lt.s32.totalorder %s150_s29, %s150_s29 }
  0x22   : > { %p5813_p7 = scmp.ne.s32.totalorder %s150_s29, %s5812_s11  ;;  %p5821_p4 = scmp.lt.s32.totalorder %s5812_s11, %s5812_s11 }
  0x24   : > { %p5815_p9 = pnand %p5813_p7, %p5801_p1  ;;  %p5822_p11 = por %p5821_p4, %p5820_p8 }
  0x26   : > { %p5816_p12 = pneg %p5815_p9 }
  0x28   : > { %p5823_p10 = pnand %p5822_p11, %p5816_p12 }
  0x2a   : > { %5826 = shalt.err (!%p5823_p10)
}
  0x2b   : > { %s5912_s18 = smov 128   ;;  %s5913_s19 = smov 8  }
  0x2c   : > { %5733 = dma.hbm_to_vmem [thread:$0]  (!%p6007_p13), %s9492_s1, 8192, %s150_s29, [#allocation3], %s5912_s18, %s5912_s18, %s5913_s19  }
  0x2d   : > { %p9823_p0 = scmp.ne.s32.totalorder %s9820_s26, 0 }
  0x2f   : > { %185 = sbr.rel (%p9823_p0) target bundleno = 820 (0x334), region = 32 }
  0x36   : > { %p9824_p2 = scmp.ne.s32.totalorder %s9821_s27, 0 }
  0x38   : > { %5880 = dma.done.wait (%p9824_p2), [#allocation3], 8192  }
  0x39   : > { %5882 = vsyncadd (%p9824_p2), [#allocation3], 4294959104  ;;  %s4116_s28 = sshll.u32 %s5901_s15, 4  ;;  %v5914_v0 = vmov 0   ;;  %v507_v7 = vld [vmem:[#allocation2 + $0x80] sm:$0xff]  ;;  %v508_v8 = vld [vmem:[#allocation2 + $0x88] sm:$0xff] }
  0x3a   : > { %5798 = vset.pattern.permute.xlu1 %v5914_v0  ;;  %5797 = vset.pattern.permute.xlu0 %v5914_v0  ;;  %p217_p4 = scmp.lt.s32.totalorder %s4116_s28, 31  ;;  %v620_v9 = vand.u32 4294901760, %v507_v7  ;;  %v623_v10 = vand.u32 4294901760, %v508_v8  ;;  %v6045_v11 = vld [vmem:[#allocation2] sm:$0xff]  ;;  %v6047_v12 = vld [vmem:[#allocation2 + $0x8] sm:$0xff]  ;;  %v6049_v13 = vld [vmem:[#allocation2 + $0x90] sm:$0xff] }
  0x3b   : > { %v572_v14 = vand.u32 4294901760, %v6045_v11  ;;  %v575_v15 = vand.u32 4294901760, %v6047_v12  ;;  %v6053_v16 = vld [vmem:[#allocation2 + $0x98] sm:$0xff]  ;;  %v626_v17 = vand.u32 4294901760, %v6049_v13  ;;  %v6056_v18 = vld [vmem:[#allocation2 + $0x10] sm:$0xff]  ;;  %v6130_v52 = vld [vmem:[#allocation2 + $0xa0] sm:$0xff] }
  0x3c   : > { %s10374_s28 = smov (!%p217_p4, %s4116_s28), 31  ;;  %v6058_v19 = vld [vmem:[#allocation2 + $0x18] sm:$0xff]  ;;  %v6060_v20 = vsub.f32 %v507_v7, %v620_v9  ;;  %v6062_v21 = vsub.f32 %v508_v8, %v623_v10  ;;  %v629_v22 = vand.u32 4294901760, %v6053_v16  ;;  %v578_v23 = vand.u32 4294901760, %v6056_v18  ;;  %v6132_v53 = vld [vmem:[#allocation2 + $0xa8] sm:$0xff]  ;;  %v6137_v58 = vld [vmem:[#allocation2 + $0x20] sm:$0xff] }
  0x3d   : > { %s4117_s30 = sshll.u32 %s10374_s28, 3  ;;  %v6069_v24 = vsub.f32 %v6045_v11, %v572_v14  ;;  %v6074_v25 = vsub.f32 %v6047_v12, %v575_v15  ;;  %v6079_v26 = vsub.f32 %v6049_v13, %v626_v17  ;;  %v581_v27 = vand.u32 4294901760, %v6058_v19  ;;  %v6139_v59 = vld [vmem:[#allocation2 + $0x28] sm:$0xff]  ;;  %s212_s5 = sand.u32 1, %s5893_s13  }
  0x3e   : > { %s6037_s29 = scalar_lea.vmem %s9491_s0, %s4117_s30  ;;  %v9524_v30 = vand.u32 4294901760, %v6060_v20  ;;  %v9521_v31 = vand.u32 4294901760, %v6062_v21  ;;  %v6089_v32 = vsub.f32 %v6053_v16, %v629_v22  ;;  %v6094_v33 = vsub.f32 %v6056_v18, %v578_v23  ;;  %s4379_s27 = sshll.u32 %s5901_s15, 11 }
  0x3f   : > { %v232_v1 = vld [vmem:[%s6037_s29 + $0x10] sm:$0xff]  ;;  %v230_v2 = vld [vmem:[%s6037_s29] sm:$0xff]  ;;  %v233_v3 = vld [vmem:[%s6037_s29 + $0x18] sm:$0xff]  ;;  %v9519_v34 = vand.u32 4294901760, %v6069_v24  ;;  %v9516_v35 = vand.u32 4294901760, %v6074_v25  ;;  %v9515_v36 = vand.u32 4294901760, %v6079_v26  ;;  %v6102_v37 = vsub.f32 %v6058_v19, %v581_v27  ;;  %s9438_s9 = scalar_lea.hbm %s9494_s3, %s4379_s27 }
  0x40   : > { %258 = vperm.xlu1 %5798, %v232_v1   ;;  %252 = vperm.xlu0 %5797, %v230_v2   ;;  %v231_v4 = vld [vmem:[%s6037_s29 + $0x8] sm:$0xff]  ;;  %v234_v6 = vld [vmem:[%s6037_s29 + $0x20] sm:$0xff]  ;;  %v237_v28 = vld [vmem:[%s6037_s29 + $0x38] sm:$0xff]  ;;  %v1024_v38 = vsub.f32 %v6060_v20, %v9524_v30  ;;  %v1031_v39 = vsub.f32 %v6062_v21, %v9521_v31  ;;  %v9514_v40 = vand.u32 4294901760, %v6089_v32  ;;  %v9513_v41 = vand.u32 4294901760, %v6094_v33  ;;  %s9445_s10 = scalar_lea.sflag [#allocation4], %s212_s5 }
  0x41   : > { %v235_v5 = vld [vmem:[%s6037_s29 + $0x28] sm:$0xff]  ;;  %v236_v29 = vld [vmem:[%s6037_s29 + $0x30] sm:$0xff]  ;;  %v912_v43 = vsub.f32 %v6069_v24, %v9519_v34  ;;  %v919_v44 = vsub.f32 %v6074_v25, %v9516_v35  ;;  %v1038_v45 = vsub.f32 %v6079_v26, %v9515_v36  ;;  %v9511_v46 = vand.u32 4294901760, %v6102_v37  ;;  %v238_v47 = vld [vmem:[%s6037_s29 + $0x40] sm:$0xff]  ;;  %p10364_p10 = scmp.ne.s32.totalorder %s9818_s22, 0  ;;  %s5917_s11 = smov [#allocation5]  }
  0x42   : > { %v239_v42 = vld [vmem:[%s6037_s29 + $0x48] sm:$0xff]  ;;  %v1025_v48 = vand.u32 4294901760, %v1024_v38  ;;  %v1032_v49 = vand.u32 4294901760, %v1031_v39  ;;  %v1045_v50 = vsub.f32 %v6089_v32, %v9514_v40  ;;  %v926_v51 = vsub.f32 %v6094_v33, %v9513_v41  ;;  %v240_v7 = vld [vmem:[%s6037_s29 + $0x50] sm:$0xff]  ;;  %s5831_s18 = sshll.u32 %s5917_s11, 4  ;;  %s5832_s18 = int_to_ptr.vmem [resolvable:$false] %s5831_s18 }
  0x43   : > { %v913_v54 = vand.u32 4294901760, %v912_v43  ;;  %v920_v55 = vand.u32 4294901760, %v919_v44  ;;  %v1039_v56 = vand.u32 4294901760, %v1038_v45  ;;  %v933_v57 = vsub.f32 %v6102_v37, %v9511_v46  ;;  %v243_v45 = vld [vmem:[%s6037_s29 + $0x68] sm:$0xff]  ;;  %v6363_v46 = vld [vmem:[#allocation2 + $0x60] sm:$0xff]  ;;  %s5833_s19 = scalar_lea.vmem %s5832_s18, 4096 }
  0x44   : > { %261 = vperm.xlu1 %5798, %v233_v3   ;;  %255 = vperm.xlu0 %5797, %v231_v4   ;;  %v5372_v60 = vpack.c.bf16 %v1032_v49, %v1025_v48  ;;  %v1046_v61 = vand.u32 4294901760, %v1045_v50  ;;  %v927_v62 = vand.u32 4294901760, %v926_v51  ;;  %v6141_v63 = vpack.c.bf16 %v623_v10, %v620_v9  ;;  %v6145_v4 = vld [vmem:[#allocation2 + $0xb0] sm:$0xff]  ;;  %v504_v40 = vld [vmem:[#allocation2 + $0x68] sm:$0xff] }
  0x45   : > { %v5374_v0 = vpack.c.bf16 %v920_v55, %v913_v54  ;;  %v934_v1 = vand.u32 4294901760, %v933_v57  ;;  %v632_v2 = vand.u32 4294901760, %v6130_v52  ;;  %v635_v3 = vand.u32 4294901760, %v6132_v53 }
  0x46   : > { %5373 = vmatprep.subr.bf16.mxu1 %v5372_v60  ;;  %v5376_v8 = vpack.c.bf16 %v1046_v61, %v1039_v56  ;;  %5341 = vmatprep.subr.bf16.mxu0 %v6141_v63  ;;  %v6156_v9 = vpack.c.bf16 %v575_v15, %v572_v14  ;;  %v584_v10 = vand.u32 4294901760, %v6137_v58  ;;  %v6176_v12 = vpack.c.bf16 %v629_v22, %v626_v17 }
  0x47   : > { %5375 = vmatpush3.bf16.msra.mxu1 %v5374_v0  ;;  %v5378_v38 = vpack.c.bf16 %v934_v1, %v927_v62  ;;  %v6165_v39 = vsub.f32 %v6130_v52, %v632_v2  ;;  %v6170_v11 = vsub.f32 %v6132_v53, %v635_v3  ;;  %v638_v13 = vand.u32 4294901760, %v6145_v4  ;;  %v6242_v1 = vld [vmem:[#allocation2 + $0xc0] sm:$0xff] }
  0x48   : > { %267 = vperm.xlu1 %5798, %v235_v5   ;;  %264 = vperm.xlu0 %5797, %v234_v6   ;;  %v6147_v5 = vld [vmem:[#allocation2 + $0xb8] sm:$0xff]  ;;  %9825 = vst [vmem:[#allocation8_spill] sm:$0xff] %v6156_v9  ;;  %9826 = vst [vmem:[#allocation9_spill] sm:$0xff] %v6176_v12  ;;  %v6182_v14 = vsub.f32 %v6137_v58, %v584_v10  ;;  %v6199_v43 = vpack.c.bf16 %v581_v27, %v578_v23 }
  0x49   : > { %v241_v6 = vld [vmem:[%s6037_s29 + $0x58] sm:$0xff]  ;;  %5377 = vmatprep.subr.bf16.mxu1 %v5376_v8  ;;  %5343 = vmatpush3.bf16.msra.mxu0 %v6156_v9  ;;  %v641_v16 = vand.u32 4294901760, %v6147_v5  ;;  %v9509_v17 = vand.u32 4294901760, %v6165_v39  ;;  %v9503_v22 = vand.u32 4294901760, %v6170_v11  ;;  %v6210_v50 = vsub.f32 %v6145_v4, %v638_v13 }
  0x4a   : > { %9827 = vst [vmem:[#allocation10_spill] sm:$0xff] %v6199_v43  ;;  %v9502_v48 = vand.u32 4294901760, %v6182_v14  ;;  %5345 = vmatprep.subr.bf16.mxu0 %v6176_v12  ;;  %v6310_v4 = vld [vmem:[#allocation2 + $0x58] sm:$0xff] }
  0x4b   : > { %9828 = vst [vmem:[#allocation11_spill] sm:$0xff] %v6210_v50  ;;  %v6215_v18 = vsub.f32 %v6147_v5, %v641_v16  ;;  %5379 = vmatpush3.bf16.msra.mxu1 %v5378_v38  ;;  %v1052_v19 = vsub.f32 %v6165_v39, %v9509_v17  ;;  %v1059_v23 = vsub.f32 %v6170_v11, %v9503_v22  ;;  %v9500_v56 = vand.u32 4294901760, %v6210_v50 }
  0x4c   : > { %273 = vperm.xlu1 %5798, %v237_v28   ;;  %270 = vperm.xlu0 %5797, %v236_v29   ;;  %v587_v28 = vand.u32 4294901760, %v6139_v59  ;;  %v6160_v29 = vld [vmem:[#allocation2 + $0x30] sm:$0xff]  ;;  %v940_v54 = vsub.f32 %v6182_v14, %v9502_v48 }
  0x4d   : > { %v590_v44 = vand.u32 4294901760, %v6160_v29  ;;  %9829 = vst [vmem:[#allocation12_spill] sm:$0xff] %v6215_v18  ;;  %v9501_v57 = vand.u32 4294901760, %v6215_v18  ;;  %5347 = vmatpush3.bf16.msra.mxu0 %v6199_v43  ;;  %v1053_v60 = vand.u32 4294901760, %v1052_v19  ;;  %v1060_v61 = vand.u32 4294901760, %v1059_v23 }
  0x4e   : > { %v6187_v15 = vsub.f32 %v6139_v59, %v587_v28  ;;  %v941_v8 = vand.u32 4294901760, %v940_v54  ;;  %v6262_v54 = vpack.c.bf16 %v635_v3, %v632_v2  ;;  %v6279_v2 = vpack.c.bf16 %v587_v28, %v584_v10  ;;  %v6281_v3 = vld [vmem:[#allocation2 + $0xd8] sm:$0xff] }
  0x4f   : > { %v6227_v51 = vsub.f32 %v6160_v29, %v590_v44  ;;  %v5380_v19 = vpack.c.bf16 %v1060_v61, %v1053_v60  ;;  %v644_v60 = vand.u32 4294901760, %v6242_v1  ;;  %v6269_v61 = vld [vmem:[#allocation2 + $0xd0] sm:$0xff]  ;;  %v6297_v59 = vpack.c.bf16 %v641_v16, %v638_v13 }
  0x50   : > { %279 = vperm.xlu1 %5798, %v239_v42   ;;  %276 = vperm.xlu0 %5797, %v238_v47   ;;  %v6191_v42 = vld [vmem:[#allocation2 + $0x38] sm:$0xff]  ;;  %v242_v47 = vld [vmem:[%s6037_s29 + $0x60] sm:$0xff]  ;;  %v9499_v49 = vand.u32 4294901760, %v6187_v15  ;;  %9830 = vst [vmem:[#allocation13_spill] sm:$0xff] %v6262_v54  ;;  %v650_v10 = vand.u32 4294901760, %v6269_v61 }
  0x51   : > { %v593_v27 = vand.u32 4294901760, %v6191_v42  ;;  %v9504_v62 = vand.u32 4294901760, %v6227_v51  ;;  %5381 = vmatprep.subr.bf16.mxu1 %v5380_v19  ;;  %5349 = vmatprep.subr.bf16.mxu0 %v6262_v54  ;;  %9831 = vst [vmem:[#allocation14_spill] sm:$0xff] %v6297_v59 }
  0x52   : > { %v947_v55 = vsub.f32 %v6187_v15, %v9499_v49  ;;  %v1066_v49 = vsub.f32 %v6210_v50, %v9500_v56  ;;  %v6266_v56 = vld [vmem:[#allocation2 + $0x48] sm:$0xff]  ;;  %5351 = vmatpush3.bf16.msra.mxu0 %v6279_v2  ;;  %v6317_v16 = vsub.f32 %v6269_v61, %v650_v10 }
  0x53   : > { %v6240_v0 = vsub.f32 %v6191_v42, %v593_v27  ;;  %v954_v42 = vsub.f32 %v6227_v51, %v9504_v62  ;;  %5353 = vmatprep.subr.bf16.mxu0 %v6297_v59 }
  0x54   : > { %285 = vperm.xlu1 %5798, %v241_v6   ;;  %282 = vperm.xlu0 %5797, %v240_v7   ;;  %v245_v6 = vld [vmem:[%s6037_s29 + $0x78] sm:$0xff]  ;;  %v244_v7 = vld [vmem:[%s6037_s29 + $0x70] sm:$0xff]  ;;  %v948_v38 = vand.u32 4294901760, %v947_v55  ;;  %v6264_v55 = vld [vmem:[#allocation2 + $0x40] sm:$0xff]  ;;  %v1067_v48 = vand.u32 4294901760, %v1066_v49  ;;  %v9512_v29 = vand.u32 4294901760, %v6317_v16 }
  0x55   : > { %v9508_v23 = vand.u32 4294901760, %v6240_v0  ;;  %v955_v62 = vand.u32 4294901760, %v954_v42  ;;  %s4115_s29 = sshll.u32 %s212_s5, 7 }
  0x56   : > { %s9401_s26 = scalar_lea.vmem [#allocation5], %s4115_s29 }
  0x57   : > { %v961_v52 = vsub.f32 %v6240_v0, %v9508_v23  ;;  %s4007_s6 = sshll.u32 %s9401_s26, 4  ;;  %s9440_s6 = int_to_ptr.vmem [resolvable:$true] %s4007_s6 }
  0x58   : > { %291 = vperm.xlu1 %5798, %v243_v45   ;;  %288 = vperm.xlu0 %5797, %v242_v47   ;;  %v1073_v45 = vsub.f32 %v6215_v18, %v9501_v57  ;;  %v6252_v47 = vld [vmem:[#allocation2 + $0xc8] sm:$0xff]  ;;  %v5382_v57 = vpack.c.bf16 %v948_v38, %v941_v8  ;;  %v599_v8 = vand.u32 4294901760, %v6266_v56  ;;  %s5827_s15 = scalar_lea.vmem %s9440_s6, 2048  ;;  %p5834_p1 = scmp.lt.s32.totalorder %s9440_s6, %s5832_s18 }
  0x59   : > { %v647_v53 = vand.u32 4294901760, %v6252_v47  ;;  %v962_v38 = vand.u32 4294901760, %v961_v52  ;;  %p5828_p8 = scmp.ne.s32.totalorder %s9440_s6, %s5827_s15  ;;  %p5835_p3 = scmp.lt.s32.totalorder %s5833_s19, %s5827_s15 }
  0x5a   : > { %v1074_v22 = vand.u32 4294901760, %v1073_v45  ;;  %5383 = vmatpush3.bf16.msra.mxu1 %v5382_v57  ;;  %v653_v57 = vand.u32 4294901760, %v6281_v3 }
  0x5b   : > { %v6290_v58 = vsub.f32 %v6252_v47, %v647_v53  ;;  %v5386_v5 = vpack.c.bf16 %v962_v38, %v955_v62  ;;  %p5829_p11 = pnand %p5828_p8, %p10364_p10  ;;  %p5836_p5 = por %p5835_p3, %p5834_p1 }
  0x5c   : > { %297 = vperm.xlu1 %5798, %v245_v6   ;;  %294 = vperm.xlu0 %5797, %v244_v7   ;;  %v5384_v49 = vpack.c.bf16 %v1074_v22, %v1067_v48  ;;  %v6285_v6 = vsub.f32 %v6242_v1, %v644_v60  ;;  %v596_v7 = vand.u32 4294901760, %v6264_v55  ;;  %v6305_v48 = vsub.f32 %v6266_v56, %v599_v8  ;;  %v6308_v1 = vld [vmem:[#allocation2 + $0x50] sm:$0xff] }
  0x5d   : > { %v9505_v13 = vand.u32 4294901760, %v6290_v58  ;;  %v6321_v56 = vpack.c.bf16 %v593_v27, %v590_v44  ;;  %v6329_v19 = vsub.f32 %v6281_v3, %v653_v57  ;;  %v602_v44 = vand.u32 4294901760, %v6308_v1  ;;  %p5830_p13 = pneg %p5829_p11 }
  0x5e   : > { %5385 = vmatprep.subr.bf16.mxu1 %v5384_v49  ;;  %v9506_v28 = vand.u32 4294901760, %v6285_v6  ;;  %v6302_v22 = vsub.f32 %v6264_v55, %v596_v7  ;;  %v9510_v62 = vand.u32 4294901760, %v6305_v48  ;;  %v605_v27 = vand.u32 4294901760, %v6310_v4 }
  0x5f   : > { %9832 = vst [vmem:[#allocation15_spill] sm:$0xff] %v6321_v56  ;;  %5387 = vmatpush3.bf16.msra.mxu1 %v5386_v5  ;;  %v1087_v42 = vsub.f32 %v6290_v58, %v9505_v13  ;;  %5355 = vmatpush3.bf16.msra.mxu0 %v6321_v56  ;;  %v9517_v49 = vand.u32 4294901760, %v6329_v19  ;;  %v1094_v5 = vsub.f32 %v6317_v16, %v9512_v29  ;;  %p5837_p6 = pnand %p5836_p5, %p5830_p13 }
  0x60   : > { %v1080_v45 = vsub.f32 %v6285_v6, %v9506_v28  ;;  %v9507_v47 = vand.u32 4294901760, %v6302_v22  ;;  %v975_v3 = vsub.f32 %v6305_v48, %v9510_v62  ;;  %v6349_v13 = vsub.f32 %v6308_v1, %v602_v44  ;;  %v6354_v28 = vld [vmem:[#allocation2 + $0xe0] sm:$0xff] }
  0x61   : > { %v1088_v38 = vand.u32 4294901760, %v1087_v42  ;;  %v1101_v42 = vsub.f32 %v6329_v19, %v9517_v49  ;;  %v6361_v62 = vpack.c.bf16 %v647_v53, %v644_v60  ;;  %v1095_v1 = vand.u32 4294901760, %v1094_v5  ;;  %v522_v49 = vld [vmem:[#allocation2 + $0xf8] sm:$0xff] }
  0x62   : > { %v1081_v55 = vand.u32 4294901760, %v1080_v45  ;;  %v968_v52 = vsub.f32 %v6302_v22, %v9507_v47  ;;  %v6352_v45 = vsub.f32 %v6310_v4, %v605_v27  ;;  %v6356_v47 = vld [vmem:[#allocation2 + $0xe8] sm:$0xff]  ;;  %v976_v17 = vand.u32 4294901760, %v975_v3 }
  0x63   : > { %9833 = vst [vmem:[#allocation16_spill] sm:$0xff] %v6361_v62  ;;  %v9518_v41 = vand.u32 4294901760, %v6349_v13  ;;  %v1102_v35 = vand.u32 4294901760, %v1101_v42  ;;  %5357 = vmatprep.subr.bf16.mxu0 %v6361_v62  ;;  %v659_v3 = vand.u32 4294901760, %v6356_v47  ;;  %v611_v42 = vand.u32 4294901760, %v504_v40 }
  0x64   : > { %v969_v23 = vand.u32 4294901760, %v968_v52  ;;  %v5388_v29 = vpack.c.bf16 %v1088_v38, %v1081_v55  ;;  %v9520_v4 = vand.u32 4294901760, %v6352_v45  ;;  %v656_v52 = vand.u32 4294901760, %v6354_v28 }
  0x65   : > { %v982_v60 = vsub.f32 %v6349_v13, %v9518_v41  ;;  %v6376_v55 = vpack.c.bf16 %v599_v8, %v596_v7  ;;  %v5392_v38 = vpack.c.bf16 %v1102_v35, %v1095_v1  ;;  %v6391_v8 = vpack.c.bf16 %v653_v57, %v650_v10  ;;  %v505_v1 = vld [vmem:[#allocation2 + $0x70] sm:$0xff] }
  0x66   : > { %v5390_v36 = vpack.c.bf16 %v976_v17, %v969_v23  ;;  %5389 = vmatprep.subr.bf16.mxu1 %v5388_v29  ;;  %v989_v53 = vsub.f32 %v6352_v45, %v9520_v4  ;;  %v608_v17 = vand.u32 4294901760, %v6363_v46  ;;  %v521_v23 = vld [vmem:[#allocation2 + $0xf0] sm:$0xff]  ;;  %v6380_v5 = vsub.f32 %v6354_v28, %v656_v52 }
  0x67   : > { %9834 = vst [vmem:[#allocation17_spill] sm:$0xff] %v6376_v55  ;;  %v6383_v29 = vsub.f32 %v6356_v47, %v659_v3  ;;  %v983_v41 = vand.u32 4294901760, %v982_v60  ;;  %5359 = vmatpush3.bf16.msra.mxu0 %v6376_v55  ;;  %9835 = vst [vmem:[#allocation18_spill] sm:$0xff] %v6391_v8  ;;  %v6395_v28 = vsub.f32 %v504_v40, %v611_v42  ;;  %v662_v47 = vand.u32 4294901760, %v521_v23  ;;  %v506_v60 = vld [vmem:[#allocation2 + $0x78] sm:$0xff] }
  0x68   : > { %5391 = vmatpush3.bf16.msra.mxu1 %v5390_v36  ;;  %v990_v34 = vand.u32 4294901760, %v989_v53  ;;  %v6387_v7 = vsub.f32 %v6363_v46, %v608_v17  ;;  %v9522_v35 = vand.u32 4294901760, %v6380_v5  ;;  %5361 = vmatprep.subr.bf16.mxu0 %v6391_v8  ;;  %v665_v46 = vand.u32 4294901760, %v522_v49 }
  0x69   : > { %5393 = vmatprep.subr.bf16.mxu1 %v5392_v38  ;;  %v9523_v36 = vand.u32 4294901760, %v6383_v29  ;;  %v6399_v31 = vpack.c.bf16 %v605_v27, %v602_v44  ;;  %v9530_v10 = vand.u32 4294901760, %v6395_v28  ;;  %v6408_v57 = vsub.f32 %v521_v23, %v662_v47 }
  0x6a   : > { %v5394_v53 = vpack.c.bf16 %v990_v34, %v983_v41  ;;  %v9527_v4 = vand.u32 4294901760, %v6387_v7  ;;  %v1108_v61 = vsub.f32 %v6380_v5, %v9522_v35  ;;  %v6413_v41 = vsub.f32 %v522_v49, %v665_v46 }
  0x6b   : > { %9836 = vst [vmem:[#allocation19_spill] sm:$0xff] %v6399_v31  ;;  %v1115_v40 = vsub.f32 %v6383_v29, %v9523_v36  ;;  %5363 = vmatpush3.bf16.msra.mxu0 %v6399_v31  ;;  %v614_v44 = vand.u32 4294901760, %v505_v1  ;;  %v617_v27 = vand.u32 4294901760, %v506_v60  ;;  %v1003_v36 = vsub.f32 %v6395_v28, %v9530_v10 }
  0x6c   : > { %5395 = vmatpush3.bf16.msra.mxu1 %v5394_v53  ;;  %v996_v34 = vsub.f32 %v6387_v7, %v9527_v4  ;;  %9837 = vst [vmem:[#allocation20_spill] sm:$0xff] %v6413_v41  ;;  %v1109_v38 = vand.u32 4294901760, %v1108_v61  ;;  %v9536_v23 = vand.u32 4294901760, %v6408_v57  ;;  %v9533_v53 = vand.u32 4294901760, %v6413_v41 }
  0x6d   : > { %v1116_v35 = vand.u32 4294901760, %v1115_v40  ;;  %v6421_v8 = vsub.f32 %v505_v1, %v614_v44  ;;  %v6423_v4 = vsub.f32 %v506_v60, %v617_v27  ;;  %v1004_v55 = vand.u32 4294901760, %v1003_v36 }
  0x6e   : > { %v997_v30 = vand.u32 4294901760, %v996_v34  ;;  %v1122_v61 = vsub.f32 %v6408_v57, %v9536_v23  ;;  %v6428_v40 = vpack.c.bf16 %v659_v3, %v656_v52  ;;  %v1129_v10 = vsub.f32 %v6413_v41, %v9533_v53 }
  0x6f   : > { %v5396_v49 = vpack.c.bf16 %v1116_v35, %v1109_v38  ;;  %v9535_v34 = vand.u32 4294901760, %v6421_v8  ;;  %v9534_v31 = vand.u32 4294901760, %v6423_v4  ;;  %v6435_v1 = vpack.c.bf16 %v611_v42, %v608_v17 }
  0x70   : > { %9838 = vst [vmem:[#allocation21_spill] sm:$0xff] %v6428_v40  ;;  %v5398_v60 = vpack.c.bf16 %v1004_v55, %v997_v30  ;;  %v1123_v35 = vand.u32 4294901760, %v1122_v61  ;;  %5365 = vmatprep.subr.bf16.mxu0 %v6428_v40  ;;  %v6438_v36 = vpack.c.bf16 %v665_v46, %v662_v47  ;;  %v6440_v38 = vpack.c.bf16 %v617_v27, %v614_v44 }
  0x71   : > { %5397 = vmatprep.subr.bf16.mxu1 %v5396_v49  ;;  %v1130_v52 = vand.u32 4294901760, %v1129_v10  ;;  %v1010_v3 = vsub.f32 %v6421_v8, %v9535_v34  ;;  %v1017_v53 = vsub.f32 %v6423_v4, %v9534_v31  ;;  %5367 = vmatpush3.bf16.msra.mxu0 %v6435_v1  ;;  %v5404_v30 = vpack.c.bf16 %v6062_v21, %v6060_v20 }
  0x72   : > { %9839 = vst [vmem:[#allocation22_spill] sm:$0xff] %v6438_v36  ;;  %5399 = vmatpush3.bf16.msra.mxu1 %v5398_v60  ;;  %5369 = vmatprep.subr.bf16.mxu0 %v6438_v36  ;;  %v9841_v34 = vand.u32 4294901760, %v6062_v21  ;;  %v9552_v21 = vmov 0.0  }
  0x73   : > { %v5400_v47 = vpack.c.bf16 %v1130_v52, %v1123_v35  ;;  %v1011_v46 = vand.u32 4294901760, %v1010_v3  ;;  %v1018_v10 = vand.u32 4294901760, %v1017_v53  ;;  %v9843_v3 = vand.u32 4294901760, %v6074_v25 }
  0x74   : > { %v246_v35 = vlaneseq }
  0x75   : > { %5401 = vmatprep.subr.bf16.mxu1 %v5400_v47  ;;  %v5402_v31 = vpack.c.bf16 %v1018_v10, %v1011_v46  ;;  %5371 = vmatpush3.bf16.msra.mxu0 %v6440_v38 }
  0x76   : > { %5405 = vmatprep.subr.bf16.mxu0 %v5404_v30  ;;  %v9840_v30 = vand.u32 4294901760, %v6060_v20  ;;  %v6496_v47 = vand.u32 127, %v246_v35  ;;  %v9542_v20 = vmov 1.0  }
  0x77   : > { %5403 = vmatpush3.bf16.msra.mxu1 %v5402_v31  ;;  %v9842_v31 = vand.u32 4294901760, %v6069_v24 }
  0x78   : > { %5437 = vmatprep.subr.bf16.mxu1 %v6141_v63  ;;  %v6488_v23 = vpack.c.bf16 %v9841_v34, %v9840_v30  ;;  %9845 = vst [vmem:[#allocation24_spill] sm:$0xff] %v6496_v47  ;;  %v6499_v46 = vadd.s32 128, %v6496_v47 }
  0x79   : > { %v6494_v52 = vpack.c.bf16 %v9843_v3, %v9842_v31 }
  0x7a   : > { %9846 = vst [vmem:[#allocation25_spill] sm:$0xff] %v6499_v46 }
  0x7b   : > { %9844 = vst [vmem:[#allocation23_spill] sm:$0xff] %v6494_v52 }
  0xbf   : > { %v6501_v53 = vpop.permute.xlu1 %258  ;;  %v6503_v10 = vpop.permute.xlu0 %252 }
  0xc0   : > { %9847 = vst [vmem:[#allocation26_spill] sm:$0xff] %v6501_v53  ;;  %9848 = vst [vmem:[#allocation27_spill] sm:$0xff] %v6503_v10  ;;  %vm300_vm0 = vcmp.eq.s32.totalorder %v6499_v46, %v6503_v10  ;;  %vm299_vm1 = vcmp.eq.s32.totalorder %v6496_v47, %v6503_v10  ;;  %vm308_vm2 = vcmp.eq.s32.totalorder %v6499_v46, %v6501_v53 }
  0xc1   : > { %4182 = vmatprep.mubr.msk.f32.mxu1 %vm300_vm0, %v9542_v20  ;;  %v4118_v34 = vsel %vm299_vm1, 1.0, %v9552_v21  ;;  %v4127_v35 = vsel %vm308_vm2, 1.0, %v9552_v21  ;;  %v4119_v3 = vsel %vm300_vm0, 1.0, %v9552_v21  ;;  %vm307_vm3 = vcmp.eq.s32.totalorder %v6496_v47, %v6501_v53 }
  0xc2   : > { %v6527_v30 = vsub.f32 %v4118_v34, %v4118_v34  ;;  %4183 = vmatmul.mubr.msk.f32.vlgmr.msra.gmra.mrb[0].mxu1 %vm299_vm1, %v9542_v20  ;;  %v6533_v31 = vsub.f32 %v4119_v3, %v4119_v3  ;;  %v6539_v49 = vsub.f32 %v4127_v35, %v4127_v35  ;;  %v4126_v3 = vsel %vm307_vm3, 1.0, %v9552_v21 }
  0xc3   : > { %v6535_v60 = vpop.permute.xlu1 %261  ;;  %v6537_v61 = vpop.permute.xlu0 %255  ;;  %5439 = vmatpush3.bf16.msra.mxu1 %v6156_v9  ;;  %v6566_v44 = vsub.f32 %v4126_v3, %v4126_v3 }
  0xc4   : > { %9849 = vst [vmem:[#allocation28_spill] sm:$0xff] %v6527_v30  ;;  %9850 = vst [vmem:[#allocation29_spill] sm:$0xff] %v6533_v31  ;;  %vm304_vm4 = vcmp.eq.s32.totalorder %v6499_v46, %v6537_v61  ;;  %vm303_vm5 = vcmp.eq.s32.totalorder %v6496_v47, %v6537_v61  ;;  %v9539_v34 = vand.u32 4294901760, %v6533_v31  ;;  %5441 = vmatprep.subr.bf16.mxu1 %v6176_v12  ;;  %v9545_v42 = vand.u32 4294901760, %v6527_v30 }
  0xc5   : > { %9851 = vst [vmem:[#allocation30_spill] sm:$0xff] %v6535_v60  ;;  %9852 = vst [vmem:[#allocation31_spill] sm:$0xff] %v6537_v61  ;;  %v4123_v35 = vsel %vm304_vm4, 1.0, %v9552_v21  ;;  %4184 = vmatprep.mubr.msk.f32.mxu1 %vm304_vm4, %v9542_v20  ;;  %v4122_v27 = vsel %vm303_vm5, 1.0, %v9552_v21  ;;  %vm312_vm6 = vcmp.eq.s32.totalorder %v6499_v46, %v6535_v60  ;;  %vm311_vm7 = vcmp.eq.s32.totalorder %v6496_v47, %v6535_v60 }
  0xc6   : > { %9853 = vst [vmem:[#allocation32_spill] sm:$0xff] %v6539_v49  ;;  %v6569_v17 = vsub.f32 %v4123_v35, %v4123_v35  ;;  %v6571_v55 = vsub.f32 %v4122_v27, %v4122_v27  ;;  %4185 = vmatmul.mubr.msk.f32.gmra.mrb[2].mxu1 %vm303_vm5, %v9542_v20  ;;  %v670_v10 = vsub.f32 %v6533_v31, %v9539_v34  ;;  %v4131_v35 = vsel %vm312_vm6, 1.0, %v9552_v21 }
  0xc7   : > { %v6582_v3 = vpop.permute.xlu0 %264  ;;  %4186 = vmatprep.mubr.msk.f32.mxu1 %vm308_vm2, %v9542_v20  ;;  %v676_v27 = vsub.f32 %v6527_v30, %v9545_v42  ;;  %5443 = vmatpush3.bf16.msra.mxu1 %v6199_v43  ;;  %v6599_v61 = vpop.permute.xlu1 %267  ;;  %v6601_v20 = vsub.f32 %v4131_v35, %v4131_v35  ;;  %v4130_v42 = vsel %vm311_vm7, 1.0, %v9552_v21  ;;  %v9863_v43 = vpack.c.bf16 %v6074_v25, %v6069_v24 }
  0xc8   : > { %9854 = vst [vmem:[#allocation33_spill] sm:$0xff] %v6569_v17  ;;  %9855 = vst [vmem:[#allocation34_spill] sm:$0xff] %v6571_v55  ;;  %v671_v52 = vand.u32 4294901760, %v670_v10  ;;  %v9549_v12 = vand.u32 4294901760, %v6569_v17  ;;  %5445 = vmatprep.subr.bf16.mxu1 %v6262_v54  ;;  %v6609_v30 = vsub.f32 %v4130_v42, %v4130_v42  ;;  %vm316_vm8 = vcmp.eq.s32.totalorder %v6499_v46, %v6582_v3 }
  0xc9   : > { %9856 = vst [vmem:[#allocation35_spill] sm:$0xff] %v6582_v3  ;;  %9857 = vst [vmem:[#allocation36_spill] sm:$0xff] %v6599_v61  ;;  %v677_v9 = vand.u32 4294901760, %v676_v27  ;;  %v9858_v10 = vmov 1.0   ;;  %v4135_v42 = vsel %vm316_vm8, 1.0, %v9552_v21  ;;  %v9859_v27 = vand.u32 4294901760, %v6539_v49 }
  0xca   : > { %672 = vmatprep.mubr.f32.mxu0 %v671_v52  ;;  %4187 = vmatmul.mubr.msk.f32.gmra.mrb[4].mxu1 %vm307_vm3, %v9858_v10  ;;  %v685_v35 = vsub.f32 %v6569_v17, %v9549_v12  ;;  %vm9578_vm9 = vcmp.eq.s32.totalorder %v6496_v47, %v6582_v3  ;;  %v9861_v12 = vand.u32 4294901760, %v6571_v55  ;;  %v6639_v21 = vsub.f32 %v4135_v42, %v4135_v42 }
  0xcb   : > { %v700_v34 = vsub.f32 %v6539_v49, %v9859_v27  ;;  %678 = vmatmul.mubr.f32.vlgmr.msra.gmra.mrb[0].mxu0 %v677_v9  ;;  %4188 = vmatprep.mubr.msk.f32.mxu1 %vm312_vm6, %v9858_v10  ;;  %v6634_v52 = vpop.permute.xlu0 %270  ;;  %v9862_v54 = vmov 0.0   ;;  %v9565_v9 = vand.u32 4294901760, %v6566_v44  ;;  %vm9573_vm10 = vcmp.eq.s32.totalorder %v6499_v46, %v6599_v61 }
  0xcc   : > { %9860 = vst [vmem:[#allocation37_spill] sm:$0xff] %v6634_v52  ;;  %v691_v53 = vsub.f32 %v6571_v55, %v9861_v12  ;;  %v4134_v27 = vsel %vm9578_vm9, 1.0, %v9862_v54  ;;  %5407 = vmatpush3.bf16.msra.mxu0 %v9863_v43  ;;  %v686_v49 = vand.u32 4294901760, %v685_v35  ;;  %5447 = vmatpush3.bf16.msra.mxu1 %v6279_v2  ;;  %v9865_v42 = vpack.c.bf16 %v6089_v32, %v6079_v26  ;;  %v6666_v43 = vpop.permute.xlu1 %273 }
  0xcd   : > { %v701_v17 = vand.u32 4294901760, %v700_v34  ;;  %v6649_v31 = vsub.f32 %v4134_v27, %v4134_v27  ;;  %v706_v55 = vsub.f32 %v6566_v44, %v9565_v9  ;;  %v4139_v24 = vsel %vm9573_vm10, 1.0, %v9862_v54  ;;  %5449 = vmatprep.subr.bf16.mxu1 %v6297_v59  ;;  %9866 = vst [vmem:[#allocation39_spill] sm:$0xff] %v6666_v43 }
  0xce   : > { %v692_v12 = vand.u32 4294901760, %v691_v53  ;;  %5409 = vmatprep.subr.bf16.mxu0 %v9865_v42  ;;  %v9564_v25 = vand.u32 4294901760, %v6601_v20  ;;  %687 = vmatprep.mubr.f32.mxu0 %v686_v49  ;;  %vm9579_vm11 = vcmp.eq.s32.totalorder %v6496_v47, %v6599_v61  ;;  %v9570_v53 = vand.u32 4294901760, %v6609_v30 }
  0xcf   : > { %9864 = vst [vmem:[#allocation38_spill] sm:$0xff] %v6649_v31  ;;  %4189 = vmatmul.mubr.msk.f32.gmra.mrb[6].mxu1 %vm311_vm7, %v9858_v10  ;;  %vm9586_vm12 = vcmp.eq.s32.totalorder %v6499_v46, %v6634_v52  ;;  %v6681_v49 = vsub.f32 %v4139_v24, %v4139_v24  ;;  %v4138_v35 = vsel %vm9579_vm11, 1.0, %v9862_v54  ;;  %v9868_v42 = vpack.c.bf16 %v6102_v37, %v6094_v33  ;;  %v6703_v60 = vpop.permute.xlu0 %276 }
  0xd0   : > { %693 = vmatmul.mubr.f32.gmra.mrb[2].mxu0 %v692_v12  ;;  %4190 = vmatprep.mubr.msk.f32.mxu1 %vm316_vm8, %v9858_v10  ;;  %v715_v34 = vsub.f32 %v6601_v20, %v9564_v25  ;;  %v4143_v27 = vsel %vm9586_vm12, 1.0, %v9862_v54  ;;  %v707_v12 = vand.u32 4294901760, %v706_v55  ;;  %v6697_v24 = vsub.f32 %v4138_v35, %v4138_v35  ;;  %9869 = vst [vmem:[#allocation41_spill] sm:$0xff] %v6703_v60 }
  0xd1   : > { %9867 = vst [vmem:[#allocation40_spill] sm:$0xff] %v6681_v49  ;;  %702 = vmatprep.mubr.f32.mxu0 %v701_v17  ;;  %5411 = vmatpush3.bf16.msra.mxu0 %v9868_v42  ;;  %v721_v25 = vsub.f32 %v6609_v30, %v9570_v53  ;;  %v9569_v9 = vand.u32 4294901760, %v6639_v21  ;;  %v6705_v59 = vsub.f32 %v4143_v27, %v4143_v27  ;;  %v6737_v53 = vpop.permute.xlu1 %279 }
  0xd2   : > { %vm9587_vm13 = vcmp.eq.s32.totalorder %v6496_v47, %v6634_v52  ;;  %v9871_v55 = vpack.c.bf16 %v6170_v11, %v6165_v39  ;;  %vm9593_vm14 = vcmp.eq.s32.totalorder %v6499_v46, %v6666_v43  ;;  %5451 = vmatpush3.bf16.msra.mxu1 %v6321_v56  ;;  %v716_v35 = vand.u32 4294901760, %v715_v34  ;;  %9872 = vst [vmem:[#allocation43_spill] sm:$0xff] %v6737_v53  ;;  %v9877_v56 = vld [vmem:[#allocation17_spill] sm:$0xff] }
  0xd3   : > { %9870 = vst [vmem:[#allocation42_spill] sm:$0xff] %v6705_v59  ;;  %4191 = vmatmul.mubr.msk.f32.gmra.mrb[8].mxu1 %vm9578_vm9, %v9858_v10  ;;  %v730_v27 = vsub.f32 %v6639_v21, %v9569_v9  ;;  %v4142_v42 = vsel %vm9587_vm13, 1.0, %v9862_v54  ;;  %5453 = vmatprep.subr.bf16.mxu1 %v6361_v62  ;;  %v722_v34 = vand.u32 4294901760, %v721_v25  ;;  %v9873_v3 = vpack.c.bf16 %v6187_v15, %v6182_v14 }
  0xd4   : > { %5413 = vmatprep.subr.bf16.mxu0 %v9871_v55  ;;  %v4147_v55 = vsel %vm9593_vm14, 1.0, %v9862_v54  ;;  %708 = vmatmul.mubr.f32.gmra.mrb[4].mxu0 %v707_v12  ;;  %v6739_v17 = vsub.f32 %v4142_v42, %v4142_v42  ;;  %vm9594_vm15 = vcmp.eq.s32.totalorder %v6496_v47, %v6666_v43  ;;  %v9874_v25 = vand.u32 4294901760, %v6649_v31 }
  0xd5   : > { %4192 = vmatprep.mubr.msk.f32.mxu1 %vm9573_vm10, %v9858_v10  ;;  %717 = vmatprep.mubr.f32.mxu0 %v716_v35  ;;  %vm9599_vm10 = vcmp.eq.s32.totalorder %v6499_v46, %v6703_v60  ;;  %v6752_v62 = vsub.f32 %v4147_v55, %v4147_v55  ;;  %v9875_v35 = vand.u32 4294901760, %v6681_v49  ;;  %v9876_v12 = vpack.c.bf16 %v6215_v18, %v6210_v50 }
  0xd6   : > { %5415 = vmatpush3.bf16.msra.mxu0 %v9873_v3  ;;  %v736_v9 = vsub.f32 %v6649_v31, %v9874_v25  ;;  %v4146_v3 = vsel %vm9594_vm15, 1.0, %v9862_v54  ;;  %5455 = vmatpush3.bf16.msra.mxu1 %v9877_v56  ;;  %v731_v55 = vand.u32 4294901760, %v730_v27  ;;  %v4151_v25 = vsel %vm9599_vm10, 1.0, %v9862_v54  ;;  %v6783_v27 = vpop.permute.xlu0 %282 }
  0xd7   : > { %v745_v42 = vsub.f32 %v6681_v49, %v9875_v35  ;;  %5417 = vmatprep.subr.bf16.mxu0 %v9876_v12  ;;  %4193 = vmatmul.mubr.msk.f32.gmra.mrb[10].mxu1 %vm9579_vm11, %v9858_v10  ;;  %v9878_v49 = vld [vmem:[#allocation18_spill] sm:$0xff]  ;;  %vm9600_vm9 = vcmp.eq.s32.totalorder %v6496_v47, %v6703_v60  ;;  %vm9606_vm11 = vcmp.eq.s32.totalorder %v6499_v46, %v6737_v53  ;;  %v9880_v35 = vand.u32 4294901760, %v6697_v24 }
  0xd8   : > { %5457 = vmatprep.subr.bf16.mxu1 %v9878_v49  ;;  %723 = vmatmul.mubr.f32.gmra.mrb[6].mxu0 %v722_v34  ;;  %9879 = vst [vmem:[#allocation44_spill] sm:$0xff] %v6783_v27  ;;  %v6785_v12 = vsub.f32 %v4146_v3, %v4146_v3  ;;  %v9595_v61 = vand.u32 4294901760, %v6739_v17  ;;  %v9881_v49 = vpack.c.bf16 %v6240_v0, %v6227_v51  ;;  %v737_v56 = vand.u32 4294901760, %v736_v9 }
  0xd9   : > { %4194 = vmatprep.mubr.msk.f32.mxu1 %vm9586_vm12, %v9858_v10  ;;  %732 = vmatprep.mubr.f32.mxu0 %v731_v55  ;;  %v751_v34 = vsub.f32 %v6697_v24, %v9880_v35  ;;  %v746_v31 = vand.u32 4294901760, %v745_v42  ;;  %v6794_v18 = vsub.f32 %v4151_v25, %v4151_v25  ;;  %v9882_v3 = vpack.c.bf16 %v6290_v58, %v6285_v6  ;;  %v9883_v55 = vld [vmem:[#allocation19_spill] sm:$0xff]  ;;  %v6825_v25 = vpop.permute.xlu1 %285 }
  0xda   : > { %5419 = vmatpush3.bf16.msra.mxu0 %v9881_v49  ;;  %5459 = vmatpush3.bf16.msra.mxu1 %v9883_v55  ;;  %v9884_v35 = vand.u32 4294901760, %v6705_v59  ;;  %v4150_v49 = vsel %vm9600_vm9, 1.0, %v9862_v54  ;;  %v4155_v42 = vsel %vm9606_vm11, 1.0, %v9862_v54  ;;  %vm9605_vm12 = vcmp.eq.s32.totalorder %v6496_v47, %v6737_v53  ;;  %9885 = vst [vmem:[#allocation45_spill] sm:$0xff] %v6825_v25 }
  0xdb   : > { %5421 = vmatprep.subr.bf16.mxu0 %v9882_v3  ;;  %4195 = vmatmul.mubr.msk.f32.gmra.mrb[12].mxu1 %vm9587_vm13, %v9858_v10  ;;  %vm9615_vm13 = vcmp.eq.s32.totalorder %v6499_v46, %v6783_v27  ;;  %v752_v3 = vand.u32 4294901760, %v751_v34  ;;  %v9601_v50 = vand.u32 4294901760, %v6785_v12  ;;  %v6834_v52 = vsub.f32 %v4150_v49, %v4150_v49 }
  0xdc   : > { %v760_v9 = vsub.f32 %v6705_v59, %v9884_v35  ;;  %5461 = vmatprep.subr.bf16.mxu1 %v6428_v40  ;;  %738 = vmatmul.mubr.f32.gmra.mrb[8].mxu0 %v737_v56  ;;  %v766_v35 = vsub.f32 %v6739_v17, %v9595_v61  ;;  %v9886_v56 = vpack.c.bf16 %v6305_v48, %v6302_v22  ;;  %v9889_v55 = vand.u32 4294901760, %v6752_v62 }
  0xdd   : > { %4196 = vmatprep.mubr.msk.f32.mxu1 %vm9593_vm14, %v9858_v10  ;;  %747 = vmatprep.mubr.f32.mxu0 %v746_v31  ;;  %9887 = vst [vmem:[#allocation46_spill] sm:$0xff] %v6834_v52  ;;  %v6836_v40 = vsub.f32 %v4155_v42, %v4155_v42  ;;  %v4154_v31 = vsel %vm9605_vm12, 1.0, %v9862_v54  ;;  %v9890_v34 = vpack.c.bf16 %v6329_v19, %v6317_v16 }
  0xde   : > { %5423 = vmatpush3.bf16.msra.mxu0 %v9886_v56  ;;  %v775_v59 = vsub.f32 %v6752_v62, %v9889_v55  ;;  %5463 = vmatpush3.bf16.msra.mxu1 %v6435_v1  ;;  %v761_v49 = vand.u32 4294901760, %v760_v9  ;;  %v4159_v55 = vsel %vm9615_vm13, 1.0, %v9862_v54  ;;  %vm9614_vm14 = vcmp.eq.s32.totalorder %v6496_v47, %v6783_v27  ;;  %v6867_v9 = vpop.permute.xlu0 %288 }
  0xdf   : > { %9888 = vst [vmem:[#allocation47_spill] sm:$0xff] %v6836_v40  ;;  %5425 = vmatprep.subr.bf16.mxu0 %v9890_v34  ;;  %4197 = vmatmul.mubr.msk.f32.gmra.mrb[14].mxu1 %vm9594_vm15, %v9858_v10  ;;  %vm9622_vm15 = vcmp.eq.s32.totalorder %v6499_v46, %v6825_v25  ;;  %9891 = vst [vmem:[#allocation48_spill] sm:$0xff] %v6867_v9  ;;  %v767_v56 = vand.u32 4294901760, %v766_v35  ;;  %v6869_v34 = vsub.f32 %v4154_v31, %v4154_v31 }
  0xe0   : > { %5465 = vmatprep.subr.bf16.mxu1 %v6438_v36  ;;  %753 = vmatmul.mubr.f32.gmra.mrb[10].mxu0 %v752_v3  ;;  %v781_v61 = vsub.f32 %v6785_v12, %v9601_v50  ;;  %v9892_v3 = vpack.c.bf16 %v6352_v45, %v6349_v13  ;;  %v776_v42 = vand.u32 4294901760, %v775_v59  ;;  %v6877_v43 = vsub.f32 %v4159_v55, %v4159_v55 }
  0xe1   : > { %4198 = vmatprep.mubr.msk.f32.mxu1 %vm9599_vm10, %v9858_v10  ;;  %762 = vmatprep.mubr.f32.mxu0 %v761_v49  ;;  %v4158_v36 = vsel %vm9614_vm14, 1.0, %v9862_v54  ;;  %v9604_v35 = vand.u32 4294901760, %v6834_v52  ;;  %v9894_v31 = vpack.c.bf16 %v6383_v29, %v6380_v5  ;;  %v9895_v59 = vand.u32 4294901760, %v6794_v18 }
  0xe2   : > { %5427 = vmatpush3.bf16.msra.mxu0 %v9892_v3  ;;  %9893 = vst [vmem:[#allocation49_spill] sm:$0xff] %v6877_v43  ;;  %5467 = vmatpush3.bf16.msra.mxu1 %v6440_v38  ;;  %v4163_v55 = vsel %vm9622_vm15, 1.0, %v9862_v54  ;;  %vm9621_vm10 = vcmp.eq.s32.totalorder %v6496_v47, %v6825_v25  ;;  %v6911_v50 = vsub.f32 %v4158_v36, %v4158_v36  ;;  %v9903_v53 = vand.u32 4294901760, %v6869_v34 }
  0xe3   : > { %5429 = vmatprep.subr.bf16.mxu0 %v9894_v31  ;;  %4199 = vmatmul.mubr.msk.f32.gmra.mrb[16].mxu1 %vm9600_vm9, %v9858_v10  ;;  %v790_v49 = vsub.f32 %v6794_v18, %v9895_v59  ;;  %vm348_vm9 = vcmp.eq.s32.totalorder %v6499_v46, %v6867_v9  ;;  %v6909_v31 = vpop.permute.xlu1 %291  ;;  %v782_v59 = vand.u32 4294901760, %v781_v61  ;;  %v9897_v3 = vpack.c.bf16 %v6395_v28, %v6387_v7 }
  0xe4   : > { %5501 = vmatprep.subr.bf16.mxu1 %v6141_v63  ;;  %768 = vmatmul.mubr.f32.gmra.mrb[12].mxu0 %v767_v56  ;;  %9896 = vst [vmem:[#allocation50_spill] sm:$0xff] %v6909_v31  ;;  %v796_v63 = vsub.f32 %v6834_v52, %v9604_v35  ;;  %v6919_v56 = vsub.f32 %v4163_v55, %v4163_v55  ;;  %v4162_v60 = vsel %vm9621_vm10, 1.0, %v9862_v54  ;;  %v9900_v55 = vand.u32 4294901760, %v6836_v40 }
  0xe5   : > { %4200 = vmatprep.mubr.msk.f32.mxu1 %vm9606_vm11, %v9858_v10  ;;  %777 = vmatprep.mubr.f32.mxu0 %v776_v42  ;;  %v9899_v36 = vpack.c.bf16 %v6413_v41, %v6408_v57  ;;  %v791_v61 = vand.u32 4294901760, %v790_v49  ;;  %v4167_v35 = vsel %vm348_vm9, 1.0, %v9862_v54  ;;  %vm352_vm11 = vcmp.eq.s32.totalorder %v6499_v46, %v6909_v31  ;;  %v6949_v49 = vpop.permute.xlu0 %294 }
  0xe6   : > { %5431 = vmatpush3.bf16.msra.mxu0 %v9897_v3  ;;  %9898 = vst [vmem:[#allocation51_spill] sm:$0xff] %v6919_v56  ;;  %v805_v3 = vsub.f32 %v6836_v40, %v9900_v55  ;;  %9901 = vst [vmem:[#allocation52_spill] sm:$0xff] %v6949_v49  ;;  %v9620_v55 = vand.u32 4294901760, %v6911_v50  ;;  %v797_v42 = vand.u32 4294901760, %v796_v63  ;;  %v811_v40 = vsub.f32 %v6869_v34, %v9903_v53 }
  0xe7   : > { %5433 = vmatprep.subr.bf16.mxu0 %v9899_v36  ;;  %4201 = vmatmul.mubr.msk.f32.gmra.mrb[18].mxu1 %vm9605_vm12, %v9858_v10  ;;  %vm9627_vm12 = vcmp.eq.s32.totalorder %v6496_v47, %v6867_v9  ;;  %v6951_v36 = vsub.f32 %v4162_v60, %v4162_v60  ;;  %v6960_v52 = vsub.f32 %v4167_v35, %v4167_v35  ;;  %v6987_v35 = vpop.permute.xlu1 %297  ;;  %v9907_v27 = vand.u32 4294901760, %v6919_v56 }
  0xe8   : > { %783 = vmatmul.mubr.f32.gmra.mrb[14].mxu0 %v782_v59  ;;  %4202 = vmatprep.mubr.msk.f32.mxu1 %vm9615_vm13, %v9858_v10  ;;  %v9902_v59 = vpack.c.bf16 %v6423_v4, %v6421_v8  ;;  %v806_v60 = vand.u32 4294901760, %v805_v3  ;;  %v4166_v53 = vsel %vm9627_vm12, 1.0, %v9862_v54  ;;  %vm356_vm13 = vcmp.eq.s32.totalorder %v6499_v46, %v6949_v49  ;;  %9906 = vst [vmem:[#allocation54_spill] sm:$0xff] %v6987_v35 }
  0xe9   : > { %792 = vmatprep.mubr.f32.mxu0 %v791_v61  ;;  %9904 = vst [vmem:[#allocation53_spill] sm:$0xff] %v6960_v52  ;;  %v9905_v61 = vand.u32 4294901760, %v6877_v43  ;;  %v826_v3 = vsub.f32 %v6911_v50, %v9620_v55 }
  0xea   : > { %5435 = vmatpush3.bf16.msra.mxu0 %v9902_v59  ;;  %v812_v59 = vand.u32 4294901760, %v811_v40  ;;  %v4175_v40 = vsel %vm356_vm13, 1.0, %v9862_v54 }
  0xeb   : > { %5469 = vmatprep.subr.bf16.mxu0 %v6488_v23  ;;  %4203 = vmatmul.mubr.msk.f32.gmra.mrb[20].mxu1 %vm9614_vm14, %v9858_v10  ;;  %v820_v63 = vsub.f32 %v6877_v43, %v9905_v61  ;;  %v4171_v23 = vsel %vm352_vm11, 1.0, %v9862_v54  ;;  %vm351_vm14 = vcmp.eq.s32.totalorder %v6496_v47, %v6909_v31  ;;  %v6993_v61 = vsub.f32 %v4166_v53, %v4166_v53 }
  0xec   : > { %798 = vmatmul.mubr.f32.gmra.mrb[16].mxu0 %v797_v42  ;;  %4204 = vmatprep.mubr.msk.f32.mxu1 %vm9622_vm15, %v9858_v10  ;;  %v9628_v42 = vand.u32 4294901760, %v6951_v36  ;;  %v6995_v41 = vsub.f32 %v4171_v23, %v4171_v23  ;;  %v835_v43 = vsub.f32 %v6919_v56, %v9907_v27  ;;  %v4170_v55 = vsel %vm351_vm14, 1.0, %v9862_v54 }
  0xed   : > { %807 = vmatprep.mubr.f32.mxu0 %v806_v60  ;;  %v821_v60 = vand.u32 4294901760, %v820_v63  ;;  %vm360_vm15 = vcmp.eq.s32.totalorder %v6499_v46, %v6987_v35  ;;  %v827_v27 = vand.u32 4294901760, %v826_v3  ;;  %v7024_v53 = vsub.f32 %v4170_v55, %v4170_v55  ;;  %v9917_v46 = vld [vmem:[#allocation9_spill] sm:$0xff] }
  0xee   : > { %v841_v63 = vsub.f32 %v6951_v36, %v9628_v42  ;;  %v836_v23 = vand.u32 4294901760, %v835_v43  ;;  %v9633_v25 = vand.u32 4294901760, %v6993_v61  ;;  %v9908_v56 = vand.u32 4294901760, %v6960_v52 }
  0xef   : > { %4205 = vmatmul.mubr.msk.f32.gmra.mrb[22].mxu1 %vm9621_vm10, %v9858_v10  ;;  %vm355_vm10 = vcmp.eq.s32.totalorder %v6496_v47, %v6949_v49  ;;  %v4179_v55 = vsel %vm360_vm15, 1.0, %v9862_v54  ;;  %v9912_v49 = vld [vmem:[#allocation28_spill] sm:$0xff] }
  0xf0   : > { %813 = vmatmul.mubr.f32.gmra.mrb[18].mxu0 %v812_v59  ;;  %4206 = vmatprep.mubr.msk.f32.mxu1 %vm348_vm9, %v9858_v10  ;;  %v7026_v59 = vsub.f32 %v4175_v40, %v4175_v40  ;;  %v850_v3 = vsub.f32 %v6960_v52, %v9908_v56  ;;  %v4174_v43 = vsel %vm355_vm10, 1.0, %v9862_v54  ;;  %v842_v56 = vand.u32 4294901760, %v841_v63 }
  0xf1   : > { %822 = vmatprep.mubr.f32.mxu0 %v821_v60  ;;  %v7051_v40 = vsub.f32 %v4174_v43, %v4174_v43  ;;  %v856_v42 = vsub.f32 %v6993_v61, %v9633_v25  ;;  %v7056_v9 = vsub.f32 %v4179_v55, %v4179_v55  ;;  %v9909_v52 = vand.u32 4294901760, %v6995_v41 }
  0xf2   : > { %v851_v60 = vand.u32 4294901760, %v850_v3  ;;  %v9635_v43 = vand.u32 4294901760, %v7026_v59  ;;  %v9913_v31 = vand.u32 4294901760, %v9912_v49 }
  0xf3   : > { %4207 = vmatmul.mubr.msk.f32.gmra.mrb[24].mxu1 %vm9627_vm12, %v9858_v10  ;;  %vm359_vm12 = vcmp.eq.s32.totalorder %v6496_v47, %v6987_v35  ;;  %v865_v63 = vsub.f32 %v6995_v41, %v9909_v52  ;;  %v857_v55 = vand.u32 4294901760, %v856_v42  ;;  %v9637_v25 = vand.u32 4294901760, %v7051_v40 }
  0xf4   : > { %828 = vmatmul.mubr.f32.gmra.mrb[20].mxu0 %v827_v27  ;;  %4208 = vmatprep.mubr.msk.f32.mxu1 %vm352_vm11, %v9858_v10  ;;  %v9636_v27 = vand.u32 4294901760, %v7024_v53  ;;  %v9646_v42 = vand.u32 4294901760, %v7056_v9 }
  0xf5   : > { %837 = vmatprep.mubr.f32.mxu0 %v836_v23  ;;  %v4178_v23 = vsel %vm359_vm12, 1.0, %v9862_v54  ;;  %v880_v54 = vsub.f32 %v7026_v59, %v9635_v43 }
  0xf6   : > { %v7075_v3 = vsub.f32 %v4178_v23, %v4178_v23  ;;  %v871_v52 = vsub.f32 %v7024_v53, %v9636_v27  ;;  %v886_v23 = vsub.f32 %v7051_v40, %v9637_v25  ;;  %v9910_v27 = vld [vmem:[#allocation29_spill] sm:$0xff] }
  0xf7   : > { %4209 = vmatmul.mubr.msk.f32.gmra.mrb[26].mxu1 %vm351_vm14, %v9858_v10  ;;  %v881_v43 = vand.u32 4294901760, %v880_v54  ;;  %v9914_v54 = vld [vmem:[#allocation33_spill] sm:$0xff] }
  0xf8   : > { %843 = vmatmul.mubr.f32.gmra.mrb[22].mxu0 %v842_v56  ;;  %4210 = vmatprep.mubr.msk.f32.mxu1 %vm356_vm13, %v9858_v10  ;;  %v866_v56 = vand.u32 4294901760, %v865_v63  ;;  %v9649_v63 = vand.u32 4294901760, %v7075_v3  ;;  %v9915_v47 = vand.u32 4294901760, %v9914_v54 }
  0xf9   : > { %852 = vmatprep.mubr.f32.mxu0 %v851_v60  ;;  %v872_v60 = vand.u32 4294901760, %v871_v52  ;;  %v887_v52 = vand.u32 4294901760, %v886_v23 }
  0xfa   : > { %v901_v25 = vsub.f32 %v7075_v3, %v9649_v63 }
  0xfb   : > { %4211 = vmatmul.mubr.msk.f32.gmra.mrb[28].mxu1 %vm355_vm10, %v9858_v10 }
  0xfc   : > { %858 = vmatmul.mubr.f32.gmra.mrb[24].mxu0 %v857_v55  ;;  %4212 = vmatprep.mubr.msk.f32.mxu1 %vm360_vm15, %v9858_v10  ;;  %v895_v55 = vsub.f32 %v7056_v9, %v9646_v42  ;;  %v9916_v42 = vld [vmem:[#allocation8_spill] sm:$0xff] }
  0xfd   : > { %867 = vmatprep.mubr.f32.mxu0 %v866_v56  ;;  %v9911_v56 = vand.u32 4294901760, %v9910_v27 }
  0xfe   : > { %v896_v35 = vand.u32 4294901760, %v895_v55  ;;  %v9926_v55 = vand.u32 4294901760, %v6566_v44 }
  0xff   : > { %4213 = vmatmul.mubr.msk.f32.gmra.mrb[30].mxu1 %vm359_vm12, %v9858_v10  ;;  %v7119_v10 = vld [vmem:[#allocation2 + $0x180] sm:$0xff] }
 0x100   : > { %873 = vmatmul.mubr.f32.gmra.mrb[26].mxu0 %v872_v60  ;;  %1617 = vmatprep.mubr.f32.mxu1 %v9911_v56  ;;  %v902_v60 = vand.u32 4294901760, %v901_v25  ;;  %v9920_v56 = vld [vmem:[#allocation32_spill] sm:$0xff]  ;;  %v9924_v25 = vand.u32 4294901760, %v6089_v32  ;;  %v9930_v32 = vand.u32 4294901760, %v6102_v37 }
 0x101   : > { %882 = vmatprep.mubr.f32.mxu0 %v881_v43  ;;  %v9918_v43 = vld [vmem:[#allocation34_spill] sm:$0xff]  ;;  %v9921_v63 = vand.u32 4294901760, %v9920_v56 }
 0x102   : > { %v9919_v23 = vand.u32 4294901760, %v9918_v43 }
 0x103   : > { %1621 = vmatmul.mubr.f32.vlgmr.msra.gmra.mrb[32].mxu1 %v9913_v31  ;;  %v7121_v31 = vld [vmem:[#allocation2 + $0x188] sm:$0xff] }
 0x104   : > { %888 = vmatmul.mubr.f32.gmra.mrb[28].mxu0 %v887_v52  ;;  %1628 = vmatprep.mubr.f32.mxu1 %v9915_v47  ;;  %v9922_v47 = vld [vmem:[#allocation10_spill] sm:$0xff]  ;;  %v2325_v52 = vand.u32 4294901760, %v7121_v31 }
 0x105   : > { %897 = vmatprep.mubr.f32.mxu0 %v896_v35  ;;  %5503 = vmatpush3.bf16.msra.mxu1 %v9916_v42  ;;  %v9923_v35 = vand.u32 4294901760, %v6079_v26  ;;  %v9925_v42 = vld [vmem:[#allocation13_spill] sm:$0xff]  ;;  %v9929_v26 = vand.u32 4294901760, %v6094_v33 }
 0x106   : > { %5505 = vmatprep.subr.bf16.mxu1 %v9917_v46  ;;  %v7159_v37 = vsub.f32 %v7121_v31, %v2325_v52 }
 0x107   : > { %1632 = vmatmul.mubr.f32.gmra.mrb[34].mxu1 %v9919_v23  ;;  %v5472_v46 = vpack.c.bf16 %v9924_v25, %v9923_v35  ;;  %v5474_v23 = vpack.c.bf16 %v9930_v32, %v9929_v26  ;;  %v9932_v35 = vand.u32 4294901760, %v6170_v11  ;;  %v9936_v11 = vand.u32 4294901760, %v6182_v14  ;;  %v9942_v32 = vld [vmem:[#allocation15_spill] sm:$0xff] }
 0x108   : > { %903 = vmatmul.mubr.f32.gmra.mrb[30].mxu0 %v902_v60  ;;  %1639 = vmatprep.mubr.f32.mxu1 %v9921_v63  ;;  %v2322_v63 = vand.u32 4294901760, %v7119_v10  ;;  %v9928_v60 = vld [vmem:[#allocation23_spill] sm:$0xff]  ;;  %v9653_v14 = vand.u32 4294901760, %v7159_v37 }
 0x109   : > { %1375 = vmatprep.mubr.f32.mxu0 %v9910_v27  ;;  %5507 = vmatpush3.bf16.msra.mxu1 %v9922_v47  ;;  %v9927_v27 = vand.u32 4294901760, %v6601_v20  ;;  %v9931_v47 = vand.u32 4294901760, %v6165_v39  ;;  %v9935_v39 = vand.u32 4294901760, %v6639_v21 }
 0x10a   : > { %5509 = vmatprep.subr.bf16.mxu1 %v9925_v42  ;;  %v9934_v42 = vld [vmem:[#allocation14_spill] sm:$0xff]  ;;  %v7154_v33 = vsub.f32 %v7119_v10, %v2322_v63  ;;  %v9985_v10 = vld [vmem:[#allocation49_spill] sm:$0xff] }
 0x10b   : > { %1643 = vmatmul.mubr.f32.gmra.mrb[36].mxu1 %v9926_v55  ;;  %v5476_v25 = vpack.c.bf16 %v9932_v35, %v9931_v47  ;;  %v9945_v35 = vld [vmem:[#allocation16_spill] sm:$0xff]  ;;  %v9986_v31 = vand.u32 4294901760, %v9985_v10 }
 0x10c   : > { %1378 = vmatmul.mubr.f32.vlgmr.msra.gmra.mrb[32].mxu0 %v9912_v49  ;;  %1650 = vmatprep.mubr.f32.mxu1 %v9927_v27  ;;  %v9933_v49 = vand.u32 4294901760, %v6609_v30  ;;  %v9940_v27 = vld [vmem:[#allocation12_spill] sm:$0xff] }
 0x10d   : > { %5471 = vmatpush3.bf16.msra.mxu0 %v9928_v60  ;;  %1384 = vmatprep.mubr.f32.mxu0 %v9914_v54  ;;  %v9941_v60 = vand.u32 4294901760, %v9940_v27 }
 0x10e   : > { %5473 = vmatprep.subr.bf16.mxu0 %v5472_v46  ;;  %5511 = vmatpush3.bf16.msra.mxu1 %v6279_v2  ;;  %v9937_v2 = vand.u32 4294901760, %v6187_v15  ;;  %v9938_v46 = vld [vmem:[#allocation11_spill] sm:$0xff]  ;;  %v9946_v15 = vld [vmem:[#allocation40_spill] sm:$0xff] }
 0x10f   : > { %1654 = vmatmul.mubr.f32.gmra.mrb[38].mxu1 %v9933_v49  ;;  %5513 = vmatprep.subr.bf16.mxu1 %v9934_v42  ;;  %v9939_v55 = vand.u32 4294901760, %v9938_v46  ;;  %v9949_v49 = vand.u32 4294901760, %v6240_v0  ;;  %v9952_v46 = vld [vmem:[#allocation17_spill] sm:$0xff]  ;;  %v2733_v0 = vsub.f32 %v7159_v37, %v9653_v14 }
 0x110   : > { %1387 = vmatmul.mubr.f32.gmra.mrb[34].mxu0 %v9918_v43  ;;  %1661 = vmatprep.mubr.f32.mxu1 %v9935_v39  ;;  %v5478_v54 = vpack.c.bf16 %v9937_v2, %v9936_v11  ;;  %v9943_v43 = vld [vmem:[#allocation38_spill] sm:$0xff]  ;;  %v9950_v39 = vand.u32 4294901760, %v6285_v6  ;;  %v9951_v11 = vand.u32 4294901760, %v6290_v58 }
 0x111   : > { %1393 = vmatprep.mubr.f32.mxu0 %v9920_v56  ;;  %5475 = vmatpush3.bf16.msra.mxu0 %v5474_v23  ;;  %v5480_v26 = vpack.c.bf16 %v9941_v60, %v9939_v55  ;;  %v9944_v47 = vand.u32 4294901760, %v9943_v43  ;;  %v9656_v56 = vand.u32 4294901760, %v7154_v33  ;;  %v9947_v23 = vand.u32 4294901760, %v9946_v15  ;;  %v9954_v55 = vld [vmem:[#allocation18_spill] sm:$0xff] }
 0x112   : > { %5477 = vmatprep.subr.bf16.mxu0 %v5476_v25  ;;  %5515 = vmatpush3.bf16.msra.mxu1 %v9942_v32  ;;  %v9948_v25 = vand.u32 4294901760, %v6227_v51  ;;  %v5484_v2 = vpack.c.bf16 %v9951_v11, %v9950_v39  ;;  %v9955_v6 = vld [vmem:[#allocation42_spill] sm:$0xff]  ;;  %v9959_v60 = vand.u32 4294901760, %v6317_v16  ;;  %v9966_v16 = vand.u32 4294901760, %v6352_v45  ;;  %v7232_v39 = vld [vmem:[#allocation2 + $0x108] sm:$0xff] }
 0x113   : > { %1665 = vmatmul.mubr.f32.gmra.mrb[40].mxu1 %v9944_v47  ;;  %5517 = vmatprep.subr.bf16.mxu1 %v9945_v35  ;;  %v2726_v51 = vsub.f32 %v7154_v33, %v9656_v56  ;;  %v9956_v58 = vand.u32 4294901760, %v9955_v6  ;;  %v9961_v47 = vld [vmem:[#allocation19_spill] sm:$0xff]  ;;  %v9963_v35 = vld [vmem:[#allocation21_spill] sm:$0xff]  ;;  %v9970_v11 = vld [vmem:[#allocation22_spill] sm:$0xff]  ;;  %v9971_v45 = vand.u32 4294901760, %v6794_v18  ;;  %v10004_v56 = vand.u32 4294901760, %v6995_v41 }
 0x114   : > { %1396 = vmatmul.mubr.f32.gmra.mrb[36].mxu0 %v6566_v44  ;;  %1672 = vmatprep.mubr.f32.mxu1 %v9947_v23  ;;  %v5482_v42 = vpack.c.bf16 %v9949_v49, %v9948_v25  ;;  %v9953_v44 = vand.u32 4294901760, %v6697_v24  ;;  %v2734_v23 = vand.u32 4294901760, %v2733_v0  ;;  %v9967_v25 = vand.u32 4294901760, %v6380_v5  ;;  %v7240_v5 = vld [vmem:[#allocation2 + $0x190] sm:$0xff] }
 0x115   : > { %1402 = vmatprep.mubr.f32.mxu0 %v6601_v20  ;;  %5479 = vmatpush3.bf16.msra.mxu0 %v5478_v54  ;;  %v9957_v20 = vand.u32 4294901760, %v6302_v22  ;;  %v9958_v54 = vand.u32 4294901760, %v6305_v48  ;;  %v9964_v22 = vand.u32 4294901760, %v6752_v62  ;;  %v9965_v48 = vand.u32 4294901760, %v6349_v13 }
 0x116   : > { %5481 = vmatprep.subr.bf16.mxu0 %v5480_v26  ;;  %5519 = vmatpush3.bf16.msra.mxu1 %v9952_v46  ;;  %v9960_v26 = vand.u32 4294901760, %v6329_v19  ;;  %v9968_v49 = vand.u32 4294901760, %v6383_v29  ;;  %v9972_v29 = vand.u32 4294901760, %v6387_v7  ;;  %v2328_v7 = vand.u32 4294901760, %v7240_v5 }
 0x117   : > { %1676 = vmatmul.mubr.f32.gmra.mrb[42].mxu1 %v9953_v44  ;;  %5521 = vmatprep.subr.bf16.mxu1 %v9954_v55  ;;  %v5486_v27 = vpack.c.bf16 %v9958_v54, %v9957_v20  ;;  %v5490_v19 = vpack.c.bf16 %v9966_v16, %v9965_v48  ;;  %v2277_v44 = vand.u32 4294901760, %v7232_v39  ;;  %v7249_v55 = vld [vmem:[#allocation2 + $0x198] sm:$0xff]  ;;  %v7312_v48 = vld [vmem:[#allocation2 + $0x1a0] sm:$0xff] }
 0x118   : > { %1405 = vmatmul.mubr.f32.gmra.mrb[38].mxu0 %v6609_v30  ;;  %1683 = vmatprep.mubr.f32.mxu1 %v9956_v58  ;;  %v5488_v32 = vpack.c.bf16 %v9960_v26, %v9959_v60  ;;  %v9962_v30 = vand.u32 4294901760, %v6739_v17  ;;  %v9977_v58 = vld [vmem:[#allocation46_spill] sm:$0xff]  ;;  %v9982_v26 = vand.u32 4294901760, %v6423_v4  ;;  %v7317_v16 = vld [vmem:[#allocation2 + $0x120] sm:$0xff] }
 0x119   : > { %1411 = vmatprep.mubr.f32.mxu0 %v6639_v21  ;;  %5483 = vmatpush3.bf16.msra.mxu0 %v5482_v42  ;;  %v2727_v21 = vand.u32 4294901760, %v2726_v51  ;;  %v5492_v42 = vpack.c.bf16 %v9968_v49, %v9967_v25  ;;  %v9975_v51 = vld [vmem:[#allocation20_spill] sm:$0xff]  ;;  %v9978_v20 = vand.u32 4294901760, %v9977_v58  ;;  %v7263_v60 = vld [vmem:[#allocation2 + $0x110] sm:$0xff] }
 0x11a   : > { %5485 = vmatprep.subr.bf16.mxu0 %v5484_v2  ;;  %5523 = vmatpush3.bf16.msra.mxu1 %v9961_v47  ;;  %v9976_v0 = vand.u32 4294901760, %v9975_v51  ;;  %v7280_v47 = vsub.f32 %v7232_v39, %v2277_v44  ;;  %v7346_v51 = vld [vmem:[#allocation2 + $0x130] sm:$0xff] }
 0x11b   : > { %1687 = vmatmul.mubr.f32.gmra.mrb[44].mxu1 %v9962_v30  ;;  %5525 = vmatprep.subr.bf16.mxu1 %v9963_v35  ;;  %v5564_v13 = vpack.c.bf16 %v2734_v23, %v2727_v21  ;;  %v7295_v30 = vsub.f32 %v7240_v5, %v2328_v7  ;;  %v2280_v35 = vand.u32 4294901760, %v7263_v60 }
 0x11c   : > { %1414 = vmatmul.mubr.f32.gmra.mrb[40].mxu0 %v9943_v43  ;;  %1694 = vmatprep.mubr.f32.mxu1 %v9964_v22  ;;  %v7230_v43 = vld [vmem:[#allocation2 + $0x100] sm:$0xff]  ;;  %v9651_v22 = vand.u32 4294901760, %v7280_v47 }
 0x11d   : > { %1420 = vmatprep.mubr.f32.mxu0 %v9946_v15  ;;  %5487 = vmatpush3.bf16.msra.mxu0 %v5486_v27  ;;  %v9969_v15 = vand.u32 4294901760, %v6785_v12  ;;  %v2274_v46 = vand.u32 4294901760, %v7230_v43  ;;  %v2331_v27 = vand.u32 4294901760, %v7249_v55  ;;  %9984 = vst [vmem:[#allocation29_spill] sm:$0xff] %v7295_v30  ;;  %v9654_v49 = vand.u32 4294901760, %v7295_v30 }
 0x11e   : > { %5489 = vmatprep.subr.bf16.mxu0 %v5488_v32  ;;  %5527 = vmatpush3.bf16.msra.mxu1 %v6435_v1  ;;  %v9973_v1 = vand.u32 4294901760, %v6395_v28  ;;  %v9979_v28 = vld [vmem:[#allocation47_spill] sm:$0xff] }
 0x11f   : > { %1698 = vmatmul.mubr.f32.gmra.mrb[46].mxu1 %v9969_v15  ;;  %5529 = vmatprep.subr.bf16.mxu1 %v9970_v11  ;;  %v9980_v54 = vand.u32 4294901760, %v9979_v28  ;;  %v7334_v15 = vld [vmem:[#allocation2 + $0x1b0] sm:$0xff]  ;;  %v7336_v11 = vld [vmem:[#allocation2 + $0x1b8] sm:$0xff] }
 0x120   : > { %1423 = vmatmul.mubr.f32.gmra.mrb[42].mxu0 %v6697_v24  ;;  %1705 = vmatprep.mubr.f32.mxu1 %v9971_v45  ;;  %v5494_v2 = vpack.c.bf16 %v9973_v1, %v9972_v29  ;;  %v9974_v24 = vand.u32 4294901760, %v6408_v57  ;;  %v9981_v57 = vand.u32 4294901760, %v6421_v8  ;;  %v9983_v8 = vand.u32 4294901760, %v6869_v34  ;;  %v9991_v45 = vld [vmem:[#allocation51_spill] sm:$0xff] }
 0x121   : > { %1429 = vmatprep.mubr.f32.mxu0 %v9955_v6  ;;  %5491 = vmatpush3.bf16.msra.mxu0 %v5490_v19  ;;  %v9988_v19 = vand.u32 4294901760, %v6911_v50  ;;  %v9992_v29 = vand.u32 4294901760, %v9991_v45 }
 0x122   : > { %5493 = vmatprep.subr.bf16.mxu0 %v5492_v42  ;;  %5531 = vmatpush3.bf16.msra.mxu1 %v6440_v38  ;;  %v5496_v6 = vpack.c.bf16 %v9976_v0, %v9974_v24  ;;  %v7265_v38 = vld [vmem:[#allocation2 + $0x118] sm:$0xff]  ;;  %v5498_v32 = vpack.c.bf16 %v9982_v26, %v9981_v57  ;;  %v7332_v42 = vld [vmem:[#allocation2 + $0x128] sm:$0xff]  ;;  %v9668_v26 = vand.u32 4294901760, %v7334_v15 }
 0x123   : > { %1709 = vmatmul.mubr.f32.gmra.mrb[48].mxu1 %v9978_v20  ;;  %5565 = vmatprep.subr.bf16.mxu1 %v5564_v13  ;;  %v2283_v21 = vand.u32 4294901760, %v7265_v38  ;;  %v7356_v20 = vld [vmem:[#allocation2 + $0x138] sm:$0xff]  ;;  %v9671_v57 = vand.u32 4294901760, %v7332_v42  ;;  %v7469_v13 = vld [vmem:[#allocation2 + $0x140] sm:$0xff] }
 0x124   : > { %1432 = vmatmul.mubr.f32.gmra.mrb[44].mxu0 %v6739_v17  ;;  %1716 = vmatprep.mubr.f32.mxu1 %v9980_v54  ;;  %v7275_v17 = vsub.f32 %v7230_v43, %v2274_v46  ;;  %v9659_v14 = vand.u32 4294901760, %v7356_v20  ;;  %v7402_v43 = vsub.f32 %v7334_v15, %v9668_v26 }
 0x125   : > { %1438 = vmatprep.mubr.f32.mxu0 %v6752_v62  ;;  %5495 = vmatpush3.bf16.msra.mxu0 %v5494_v2  ;;  %v7286_v62 = vpack.c.bf16 %v2325_v52, %v2322_v63  ;;  %v7305_v63 = vsub.f32 %v7249_v55, %v2331_v27  ;;  %v7329_v25 = vsub.f32 %v7265_v38, %v2283_v21  ;;  %v2334_v2 = vand.u32 4294901760, %v7312_v48 }
 0x126   : > { %5497 = vmatprep.subr.bf16.mxu0 %v5496_v6  ;;  %v9652_v23 = vand.u32 4294901760, %v7275_v17  ;;  %v2621_v6 = vsub.f32 %v7280_v47, %v9651_v22  ;;  %10000 = vst [vmem:[#allocation13_spill] sm:$0xff] %v7402_v43  ;;  %v7432_v55 = vsub.f32 %v7356_v20, %v9659_v14  ;;  %v10007_v38 = vand.u32 4294901760, %v7024_v53  ;;  %v7480_v14 = vld [vmem:[#allocation2 + $0x148] sm:$0xff] }
 0x127   : > { %1720 = vmatmul.mubr.f32.gmra.mrb[50].mxu1 %v9983_v8  ;;  %9987 = vst [vmem:[#allocation28_spill] sm:$0xff] %v7305_v63  ;;  %9990 = vst [vmem:[#allocation8_spill] sm:$0xff] %v7329_v25  ;;  %v9655_v1 = vand.u32 4294901760, %v7305_v63  ;;  %v2740_v8 = vsub.f32 %v7295_v30, %v9654_v49 }
 0x128   : > { %1441 = vmatmul.mubr.f32.gmra.mrb[46].mxu0 %v6785_v12  ;;  %1727 = vmatprep.mubr.f32.mxu1 %v9986_v31  ;;  %v7314_v12 = vld [vmem:[#allocation2 + $0x1a8] sm:$0xff]  ;;  %v2614_v0 = vsub.f32 %v7275_v17, %v9652_v23  ;;  %v9660_v31 = vand.u32 4294901760, %v7346_v51  ;;  %v7376_v23 = vsub.f32 %v7312_v48, %v2334_v2  ;;  %v2622_v49 = vand.u32 4294901760, %v2621_v6  ;;  %10005 = vst [vmem:[#allocation11_spill] sm:$0xff] %v7432_v55 }
 0x129   : > { %1447 = vmatprep.mubr.f32.mxu0 %v6794_v18  ;;  %5499 = vmatpush3.bf16.msra.mxu0 %v5498_v32  ;;  %v7324_v18 = vsub.f32 %v7263_v60, %v2280_v35  ;;  %v2337_v24 = vand.u32 4294901760, %v7314_v12  ;;  %v9993_v32 = vand.u32 4294901760, %v6951_v36  ;;  %v2747_v22 = vsub.f32 %v7305_v63, %v9655_v1 }
 0x12a   : > { %5533 = vmatprep.subr.bf16.mxu0 %v7286_v62  ;;  %9996 = vst [vmem:[#allocation9_spill] sm:$0xff] %v7376_v23  ;;  %v9658_v6 = vand.u32 4294901760, %v7329_v25  ;;  %v7424_v1 = vsub.f32 %v7346_v51, %v9660_v31  ;;  %v9673_v4 = vand.u32 4294901760, %v7432_v55 }
 0x12b   : > { %1731 = vmatmul.mubr.f32.gmra.mrb[52].mxu1 %v9988_v19  ;;  %9989 = vst [vmem:[#allocation33_spill] sm:$0xff] %v7324_v18  ;;  %v9994_v19 = vld [vmem:[#allocation53_spill] sm:$0xff]  ;;  %v2748_v5 = vand.u32 4294901760, %v2747_v22 }
 0x12c   : > { %1450 = vmatmul.mubr.f32.gmra.mrb[48].mxu0 %v9977_v58  ;;  %1738 = vmatprep.mubr.f32.mxu1 %v9992_v29  ;;  %v9672_v58 = vand.u32 4294901760, %v7317_v16  ;;  %v9995_v29 = vand.u32 4294901760, %v9994_v19  ;;  %10003 = vst [vmem:[#allocation14_spill] sm:$0xff] %v7424_v1 }
 0x12d   : > { %1456 = vmatprep.mubr.f32.mxu0 %v9979_v28  ;;  %v9667_v28 = vand.u32 4294901760, %v7336_v11 }
 0x12e   : > { %v7392_v48 = vsub.f32 %v7317_v16, %v9672_v58 }
 0x12f   : > { %1742 = vmatmul.mubr.f32.gmra.mrb[54].mxu1 %v9993_v32  ;;  %v7379_v32 = vsub.f32 %v7314_v12, %v2337_v24  ;;  %v7397_v12 = vsub.f32 %v7332_v42, %v9671_v57  ;;  %v7407_v39 = vsub.f32 %v7336_v11, %v9667_v28  ;;  %v10012_v28 = vand.u32 4294901760, %v7056_v9 }
 0x130   : > { %1459 = vmatmul.mubr.f32.gmra.mrb[50].mxu0 %v6869_v34  ;;  %1749 = vmatprep.mubr.f32.mxu1 %v9995_v29  ;;  %v7387_v34 = vpack.c.bf16 %v2277_v44, %v2274_v46  ;;  %v2615_v29 = vand.u32 4294901760, %v2614_v0  ;;  %9998 = vst [vmem:[#allocation32_spill] sm:$0xff] %v7392_v48  ;;  %v10002_v44 = vand.u32 4294901760, %v6993_v61  ;;  %v9657_v0 = vand.u32 4294901760, %v7324_v18  ;;  %v7448_v46 = vld [vmem:[#allocation2 + $0x1c8] sm:$0xff] }
 0x131   : > { %9997 = vst [vmem:[#allocation34_spill] sm:$0xff] %v7379_v32  ;;  %1465 = vmatprep.mubr.f32.mxu0 %v9985_v10  ;;  %9999 = vst [vmem:[#allocation10_spill] sm:$0xff] %v7397_v12  ;;  %v7417_v10 = vpack.c.bf16 %v2331_v27, %v2328_v7  ;;  %v7434_v7 = vld [vmem:[#allocation2 + $0x1c0] sm:$0xff]  ;;  %v9661_v22 = vand.u32 4294901760, %v7379_v32  ;;  %v9664_v27 = vand.u32 4294901760, %v7397_v12  ;;  %v9666_v60 = vand.u32 4294901760, %v7407_v39 }
 0x132   : > { %10001 = vst [vmem:[#allocation23_spill] sm:$0xff] %v7407_v39  ;;  %v7450_v54 = vpack.c.bf16 %v2622_v49, %v2615_v29  ;;  %v9669_v49 = vand.u32 4294901760, %v7424_v1  ;;  %v9670_v29 = vand.u32 4294901760, %v7434_v7  ;;  %v10016_v57 = vand.u32 4294901760, %v7480_v14 }
 0x133   : > { %1753 = vmatmul.mubr.f32.gmra.mrb[56].mxu1 %v10002_v44  ;;  %v2741_v44 = vand.u32 4294901760, %v2740_v8  ;;  %v9662_v8 = vand.u32 4294901760, %v7392_v48 }
 0x134   : > { %1468 = vmatmul.mubr.f32.gmra.mrb[52].mxu0 %v6911_v50  ;;  %1760 = vmatprep.mubr.f32.mxu1 %v10004_v56  ;;  %v7443_v50 = vpack.c.bf16 %v2283_v21, %v2280_v35  ;;  %v9663_v56 = vand.u32 4294901760, %v7376_v23  ;;  %v7460_v35 = vsub.f32 %v7324_v18, %v9657_v0  ;;  %v7465_v21 = vsub.f32 %v7329_v25, %v9658_v6 }
 0x135   : > { %1474 = vmatprep.mubr.f32.mxu0 %v9991_v45  ;;  %v9665_v45 = vand.u32 4294901760, %v7402_v43  ;;  %v7474_v52 = vpack.c.bf16 %v2748_v5, %v2741_v44  ;;  %v7476_v0 = vpack.c.bf16 %v2337_v24, %v2334_v2  ;;  %v9674_v6 = vand.u32 4294901760, %v7448_v46 }
 0x136   : > { %10006 = vst [vmem:[#allocation12_spill] sm:$0xff] %v7443_v50  ;;  %v2754_v31 = vsub.f32 %v7376_v23, %v9663_v56  ;;  %v2642_v2 = vsub.f32 %v7392_v48, %v9662_v8  ;;  %v2649_v44 = vsub.f32 %v7397_v12, %v9664_v27  ;;  %v2775_v5 = vsub.f32 %v7407_v39, %v9666_v60  ;;  %v7506_v8 = vld [vmem:[#allocation2 + $0x1d8] sm:$0xff]  ;;  %v7583_v12 = vld [vmem:[#allocation2 + $0x160] sm:$0xff] }
 0x137   : > { %1764 = vmatmul.mubr.f32.gmra.mrb[58].mxu1 %v10007_v38  ;;  %v10008_v38 = vand.u32 4294901760, %v7026_v59  ;;  %10009 = vst [vmem:[#allocation15_spill] sm:$0xff] %v7476_v0  ;;  %v10010_v56 = vand.u32 4294901760, %v7051_v40  ;;  %v2656_v27 = vsub.f32 %v7424_v1, %v9669_v49  ;;  %v2636_v26 = vand.u32 4294901760, %v7465_v21  ;;  %v10020_v1 = vld [vmem:[#allocation27_spill] sm:$0xff] }
 0x138   : > { %1477 = vmatmul.mubr.f32.gmra.mrb[54].mxu0 %v6951_v36  ;;  %v2761_v36 = vsub.f32 %v7379_v32, %v9661_v22  ;;  %v7504_v22 = vld [vmem:[#allocation2 + $0x1d0] sm:$0xff]  ;;  %v2663_v49 = vsub.f32 %v7432_v55, %v9673_v4  ;;  %v2755_v24 = vand.u32 4294901760, %v2754_v31  ;;  %v2643_v21 = vand.u32 4294901760, %v2642_v2 }
 0x139   : > { %1771 = vmatprep.mubr.f32.mxu1 %v10008_v38  ;;  %1483 = vmatprep.mubr.f32.mxu0 %v9994_v19  ;;  %v2768_v19 = vsub.f32 %v7402_v43, %v9665_v45  ;;  %v9675_v38 = vand.u32 4294901760, %v7469_v13  ;;  %v7516_v45 = vsub.f32 %v7434_v7, %v9670_v29  ;;  %v7532_v29 = vsub.f32 %v7448_v46, %v9674_v6  ;;  %v7544_v6 = vld [vmem:[#allocation2 + $0x158] sm:$0xff] }
 0x13a   : > { %v2650_v58 = vand.u32 4294901760, %v2649_v44  ;;  %v2776_v31 = vand.u32 4294901760, %v2775_v5  ;;  %v7554_v44 = vld [vmem:[#allocation2 + $0x1e0] sm:$0xff]  ;;  %v2664_v55 = vand.u32 4294901760, %v2663_v49  ;;  %v10021_v2 = vand.u32 4294901760, %v7504_v22 }
 0x13b   : > { %1775 = vmatmul.mubr.f32.gmra.mrb[60].mxu1 %v10010_v56  ;;  %10011 = vst [vmem:[#allocation38_spill] sm:$0xff] %v7516_v45  ;;  %v2629_v56 = vand.u32 4294901760, %v7460_v35  ;;  %10013 = vst [vmem:[#allocation16_spill] sm:$0xff] %v7532_v29  ;;  %v7537_v35 = vld [vmem:[#allocation2 + $0x150] sm:$0xff]  ;;  %v2769_v60 = vand.u32 4294901760, %v2768_v19  ;;  %v7542_v4 = vsub.f32 %v7469_v13, %v9675_v38  ;;  %v10018_v19 = vmov 1.0  }
 0x13c   : > { %1486 = vmatmul.mubr.f32.gmra.mrb[56].mxu0 %v6993_v61  ;;  %1782 = vmatprep.mubr.f32.mxu1 %v10012_v28  ;;  %v2762_v61 = vand.u32 4294901760, %v2761_v36  ;;  %v2657_v36 = vand.u32 4294901760, %v2656_v27  ;;  %v7551_v28 = vsub.f32 %v7480_v14, %v10016_v57  ;;  %v10019_v38 = vld [vmem:[#allocation25_spill] sm:$0xff]  ;;  %v10023_v43 = vand.u32 4294901760, %v7506_v8 }
 0x13d   : > { %1492 = vmatprep.mubr.f32.mxu0 %v6995_v41  ;;  %10014 = vst [vmem:[#allocation40_spill] sm:$0xff] %v7542_v4  ;;  %v10015_v41 = vand.u32 4294901760, %v7075_v3  ;;  %v5570_v39 = vpack.c.bf16 %v2636_v26, %v2629_v56  ;;  %v9690_v57 = vand.u32 4294901760, %v7542_v4  ;;  %v7591_v23 = vpack.c.bf16 %v2776_v31, %v2769_v60  ;;  %v7597_v56 = vld [vmem:[#allocation2 + $0x168] sm:$0xff] }
 0x13e   : > { %10017 = vst [vmem:[#allocation17_spill] sm:$0xff] %v7551_v28  ;;  %v7576_v49 = vsub.f32 %v7506_v8, %v10023_v43  ;;  %v5572_v48 = vpack.c.bf16 %v2762_v61, %v2755_v24  ;;  %v7589_v43 = vpack.c.bf16 %v2650_v58, %v2643_v21  ;;  %v10026_v5 = vand.u32 4294901760, %v7516_v45  ;;  %v10027_v61 = vld [vmem:[#allocation31_spill] sm:$0xff]  ;;  %v7615_v24 = vld [vmem:[#allocation2 + $0x1f0] sm:$0xff] }
 0x13f   : > { %1786 = vmatmul.mubr.f32.gmra.mrb[62].mxu1 %v10015_v41  ;;  %v7563_v41 = vld [vmem:[#allocation2 + $0x1e8] sm:$0xff]  ;;  %v7604_v27 = vpack.c.bf16 %v2664_v55, %v2657_v36  ;;  %v10028_v58 = vand.u32 4294901760, %v7532_v29  ;;  %v10029_v31 = vand.u32 4294901760, %v7537_v35  ;;  %v10031_v55 = vand.u32 4294901760, %v7544_v6  ;;  %v7652_v21 = vld [vmem:[#allocation2 + $0x170] sm:$0xff] }
 0x140   : > { %1495 = vmatmul.mubr.f32.gmra.mrb[58].mxu0 %v7024_v53  ;;  %4246 = vmatprep.mubr.msk.f32.mxu1 %vm300_vm0, %v10018_v19  ;;  %v7571_v53 = vsub.f32 %v7504_v22, %v10021_v2  ;;  %10024 = vst [vmem:[#allocation42_spill] sm:$0xff] %v7576_v49  ;;  %v10025_v2 = vld [vmem:[#allocation24_spill] sm:$0xff]  ;;  %v2782_v26 = vsub.f32 %v7516_v45, %v10026_v5  ;;  %v10040_v32 = vand.u32 4294901760, %v7576_v49  ;;  %v10042_v18 = vand.u32 4294901760, %v7597_v56 }
 0x141   : > { %1501 = vmatprep.mubr.f32.mxu0 %v7026_v59  ;;  %v2789_v60 = vsub.f32 %v7532_v29, %v10028_v58  ;;  %v7613_v5 = vsub.f32 %v7537_v35, %v10029_v31  ;;  %v7624_v36 = vsub.f32 %v7544_v6, %v10031_v55  ;;  %v2670_v59 = vsub.f32 %v7542_v4, %v9690_v57  ;;  %v7654_v55 = vld [vmem:[#allocation2 + $0x178] sm:$0xff]  ;;  %v10037_v4 = vld [vmem:[#allocation26_spill] sm:$0xff] }
 0x142   : > { %10022 = vst [vmem:[#allocation18_spill] sm:$0xff] %v7571_v53  ;;  %v10038_v57 = vand.u32 4294901760, %v7551_v28 }
 0x143   : > { %4247 = vmatmul.mubr.msk.f32.vlgmr.msra.gmra.mrb[64].mxu1 %vm299_vm1, %v10018_v19  ;;  %10030 = vst [vmem:[#allocation19_spill] sm:$0xff] %v7613_v5  ;;  %10032 = vst [vmem:[#allocation21_spill] sm:$0xff] %v7624_v36  ;;  %v2790_v45 = vand.u32 4294901760, %v2789_v60  ;;  %v10047_v30 = vand.u32 4294901760, %v7624_v36 }
 0x144   : > { %1504 = vmatmul.mubr.f32.gmra.mrb[60].mxu0 %v7051_v40  ;;  %4248 = vmatprep.mubr.msk.f32.mxu1 %vm304_vm4, %v10018_v19  ;;  %v7617_v40 = vld [vmem:[#allocation2 + $0x1f8] sm:$0xff] }
 0x145   : > { %1510 = vmatprep.mubr.f32.mxu0 %v7056_v9  ;;  %5567 = vmatpush3.bf16.msra.mxu1 %v7450_v54  ;;  %v10033_v9 = vand.u32 4294901760, %v7554_v44 }
 0x146   : > { %5569 = vmatprep.subr.bf16.mxu1 %v7474_v52  ;;  %v10035_v52 = vand.u32 4294901760, %v7563_v41 }
 0x147   : > { %v7636_v54 = vsub.f32 %v7554_v44, %v10033_v9  ;;  %4249 = vmatmul.mubr.msk.f32.gmra.mrb[66].mxu1 %vm303_vm5, %v10018_v19  ;;  %v2677_v9 = vsub.f32 %v7551_v28, %v10038_v57  ;;  %v10041_v57 = vand.u32 4294901760, %v7583_v12  ;;  %v2671_v28 = vand.u32 4294901760, %v2670_v59 }
 0x148   : > { %v7648_v31 = vsub.f32 %v7563_v41, %v10035_v52  ;;  %1513 = vmatmul.mubr.f32.gmra.mrb[62].mxu0 %v7075_v3  ;;  %4250 = vmatprep.mubr.msk.f32.mxu1 %vm308_vm2, %v10018_v19  ;;  %v2783_v52 = vand.u32 4294901760, %v2782_v26  ;;  %v10039_v3 = vand.u32 4294901760, %v7571_v53  ;;  %v2803_v26 = vsub.f32 %v7576_v49, %v10040_v32  ;;  %v10045_v32 = vld [vmem:[#allocation30_spill] sm:$0xff] }
 0x149   : > { %10034 = vst [vmem:[#allocation22_spill] sm:$0xff] %v7636_v54  ;;  %4214 = vmatprep.mubr.msk.f32.mxu0 %vm300_vm0, %v10018_v19  ;;  %5571 = vmatpush3.bf16.msra.mxu1 %v5570_v39  ;;  %v7681_v29 = vsub.f32 %v7583_v12, %v10041_v57  ;;  %v7686_v39 = vsub.f32 %v7597_v56, %v10042_v18  ;;  %v10044_v18 = vand.u32 4294901760, %v7617_v40 }
 0x14a   : > { %10036 = vst [vmem:[#allocation20_spill] sm:$0xff] %v7648_v31  ;;  %v2796_v58 = vsub.f32 %v7571_v53, %v10039_v3  ;;  %5573 = vmatprep.subr.bf16.mxu1 %v5572_v48  ;;  %v10043_v48 = vand.u32 4294901760, %v7615_v24  ;;  %v5580_v57 = vpack.c.bf16 %v2790_v45, %v2783_v52  ;;  %v2678_v53 = vand.u32 4294901760, %v2677_v9 }
 0x14b   : > { %4251 = vmatmul.mubr.msk.f32.gmra.mrb[68].mxu1 %vm307_vm3, %v10018_v19  ;;  %v7704_v3 = vsub.f32 %v7617_v40, %v10044_v18  ;;  %v2804_v25 = vand.u32 4294901760, %v2803_v26  ;;  %v2691_v45 = vsub.f32 %v7624_v36, %v10047_v30  ;;  %v10051_v52 = vand.u32 4294901760, %v7648_v31 }
 0x14c   : > { %v7699_v59 = vsub.f32 %v7615_v24, %v10043_v48  ;;  %4215 = vmatmul.mubr.msk.f32.vlgmr.msra.gmra.mrb[64].mxu0 %vm299_vm1, %v10018_v19  ;;  %4252 = vmatprep.mubr.msk.f32.mxu1 %vm312_vm6, %v10018_v19  ;;  %v10046_v48 = vand.u32 4294901760, %v7613_v5  ;;  %v2797_v49 = vand.u32 4294901760, %v2796_v58  ;;  %v10049_v58 = vand.u32 4294901760, %v7654_v55 }
 0x14d   : > { %5535 = vmatpush3.bf16.msra.mxu0 %v7387_v34  ;;  %4216 = vmatprep.mubr.msk.f32.mxu0 %vm304_vm4, %v10018_v19  ;;  %v2817_v9 = vsub.f32 %v7648_v31, %v10051_v52  ;;  %v10054_v30 = vand.u32 4294901760, %v7332_v42  ;;  %v10056_v52 = vand.u32 4294901760, %v7334_v15  ;;  %v5582_v31 = vpack.c.bf16 %v2678_v53, %v2671_v28 }
 0x14e   : > { %v2684_v60 = vsub.f32 %v7613_v5, %v10046_v48  ;;  %5537 = vmatprep.subr.bf16.mxu0 %v7417_v10  ;;  %5575 = vmatpush3.bf16.msra.mxu1 %v7589_v43  ;;  %v10048_v48 = vand.u32 4294901760, %v7652_v21  ;;  %v7739_v26 = vsub.f32 %v7654_v55, %v10049_v58  ;;  %v10050_v43 = vand.u32 4294901760, %v7636_v54 }
 0x14f   : > { %4253 = vmatmul.mubr.msk.f32.gmra.mrb[70].mxu1 %vm311_vm7, %v10018_v19  ;;  %5577 = vmatprep.subr.bf16.mxu1 %v7591_v23  ;;  %v10052_v23 = vld [vmem:[#allocation35_spill] sm:$0xff]  ;;  %v10057_v5 = vand.u32 4294901760, %v7336_v11  ;;  %v2692_v63 = vand.u32 4294901760, %v2691_v45  ;;  %v10059_v42 = vand.u32 4294901760, %v7681_v29  ;;  %v10060_v11 = vand.u32 4294901760, %v7686_v39 }
 0x150   : > { %v7734_v18 = vsub.f32 %v7652_v21, %v10048_v48  ;;  %v2810_v48 = vsub.f32 %v7636_v54, %v10050_v43  ;;  %4217 = vmatmul.mubr.msk.f32.gmra.mrb[66].mxu0 %vm303_vm5, %v10018_v19  ;;  %4254 = vmatprep.mubr.msk.f32.mxu1 %vm316_vm8, %v10018_v19  ;;  %v10053_v43 = vand.u32 4294901760, %v7317_v16  ;;  %v2685_v36 = vand.u32 4294901760, %v2684_v60 }
 0x151   : > { %v7774_v58 = vpack.c.bf16 %v10057_v5, %v10056_v52  ;;  %4218 = vmatprep.mubr.msk.f32.mxu0 %vm308_vm2, %v10018_v19  ;;  %5539 = vmatpush3.bf16.msra.mxu0 %v7443_v50  ;;  %v5584_v16 = vpack.c.bf16 %v2804_v25, %v2797_v49  ;;  %v2705_v28 = vsub.f32 %v7686_v39, %v10060_v11  ;;  %v2818_v60 = vand.u32 4294901760, %v2817_v9 }
 0x152   : > { %v7768_v54 = vpack.c.bf16 %v10054_v30, %v10053_v43  ;;  %v2698_v30 = vsub.f32 %v7681_v29, %v10059_v42  ;;  %5541 = vmatprep.subr.bf16.mxu0 %v7476_v0  ;;  %5579 = vmatpush3.bf16.msra.mxu1 %v7604_v27  ;;  %v9721_v53 = vand.u32 4294901760, %v7734_v18  ;;  %vm10061_vm0 = vcmp.eq.s32.totalorder %v10025_v2, %v10052_v23  ;;  %v10064_v42 = vld [vmem:[#allocation36_spill] sm:$0xff] }
 0x153   : > { %10058 = vst [vmem:[#allocation47_spill] sm:$0xff] %v7774_v58  ;;  %4255 = vmatmul.mubr.msk.f32.gmra.mrb[72].mxu1 %vm10061_vm0, %v10018_v19  ;;  %5581 = vmatprep.subr.bf16.mxu1 %v5580_v57  ;;  %v2811_v5 = vand.u32 4294901760, %v2810_v48  ;;  %v10062_v27 = vand.u32 4294901760, %v7699_v59  ;;  %v10063_v43 = vand.u32 4294901760, %v7704_v3  ;;  %vm10065_vm1 = vcmp.eq.s32.totalorder %v10019_v38, %v10064_v42  ;;  %vm10083_vm5 = vmmov %vm10061_vm0 }
 0x154   : > { %10055 = vst [vmem:[#allocation46_spill] sm:$0xff] %v7768_v54  ;;  %4219 = vmatmul.mubr.msk.f32.gmra.mrb[68].mxu0 %vm307_vm3, %v10018_v19  ;;  %4256 = vmatprep.mubr.msk.f32.mxu1 %vm10065_vm1, %v10018_v19  ;;  %v10066_v57 = vand.u32 4294901760, %v7346_v51  ;;  %v10067_v9 = vand.u32 4294901760, %v7356_v20  ;;  %v10069_v11 = vand.u32 4294901760, %v7434_v7  ;;  %v5586_v49 = vpack.c.bf16 %v2692_v63, %v2685_v36  ;;  %v10074_v36 = vld [vmem:[#allocation37_spill] sm:$0xff] }
 0x155   : > { %v2824_v45 = vsub.f32 %v7699_v59, %v10062_v27  ;;  %v2831_v52 = vsub.f32 %v7704_v3, %v10063_v43  ;;  %4220 = vmatprep.mubr.msk.f32.mxu0 %vm312_vm6, %v10018_v19  ;;  %5543 = vmatpush3.bf16.msra.mxu0 %v7768_v54  ;;  %v10070_v27 = vand.u32 4294901760, %v7448_v46  ;;  %v2699_v15 = vand.u32 4294901760, %v2698_v30 }
 0x156   : > { %v7822_v48 = vpack.c.bf16 %v10067_v9, %v10066_v57  ;;  %5545 = vmatprep.subr.bf16.mxu0 %v7774_v58  ;;  %5583 = vmatpush3.bf16.msra.mxu1 %v5582_v31  ;;  %v2706_v25 = vand.u32 4294901760, %v2705_v28  ;;  %v2712_v51 = vsub.f32 %v7734_v18, %v9721_v53  ;;  %v10072_v20 = vand.u32 4294901760, %v7739_v26 }
 0x157   : > { %v7828_v43 = vpack.c.bf16 %v10070_v27, %v10069_v11  ;;  %vm10073_vm2 = vcmp.eq.s32.totalorder %v10025_v2, %v10064_v42  ;;  %5585 = vmatprep.subr.bf16.mxu1 %v5584_v16  ;;  %v5588_v63 = vpack.c.bf16 %v2818_v60, %v2811_v5  ;;  %v2825_v46 = vand.u32 4294901760, %v2824_v45 }
 0x158   : > { %10068 = vst [vmem:[#allocation49_spill] sm:$0xff] %v7822_v48  ;;  %v2719_v57 = vsub.f32 %v7739_v26, %v10072_v20  ;;  %4257 = vmatmul.mubr.msk.f32.gmra.mrb[74].mxu1 %vm10073_vm2, %v10018_v19  ;;  %v2832_v7 = vand.u32 4294901760, %v2831_v52  ;;  %4221 = vmatmul.mubr.msk.f32.gmra.mrb[70].mxu0 %vm311_vm7, %v10018_v19  ;;  %vm10075_vm3 = vcmp.eq.s32.totalorder %v10019_v38, %v10074_v36  ;;  %v10076_v31 = vand.u32 4294901760, %v7469_v13  ;;  %v10084_v13 = vld [vmem:[#allocation39_spill] sm:$0xff]  ;;  %vm10086_vm7 = vmmov %vm10065_vm1 }
 0x159   : > { %10071 = vst [vmem:[#allocation51_spill] sm:$0xff] %v7828_v43  ;;  %4258 = vmatprep.mubr.msk.f32.mxu1 %vm10075_vm3, %v10018_v19  ;;  %4222 = vmatprep.mubr.msk.f32.mxu0 %vm316_vm8, %v10018_v19  ;;  %v10077_v16 = vand.u32 4294901760, %v7480_v14  ;;  %v10079_v28 = vand.u32 4294901760, %v7504_v22  ;;  %v10080_v5 = vand.u32 4294901760, %v7506_v8  ;;  %v5590_v45 = vpack.c.bf16 %v2706_v25, %v2699_v15  ;;  %vm10094_vm0 = vmmov %vm10073_vm2 }
 0x15a   : > { %5547 = vmatpush3.bf16.msra.mxu0 %v7822_v48  ;;  %5587 = vmatpush3.bf16.msra.mxu1 %v5586_v49  ;;  %v2713_v52 = vand.u32 4294901760, %v2712_v51  ;;  %v2720_v9 = vand.u32 4294901760, %v2719_v57  ;;  %vm10082_vm4 = vcmp.eq.s32.totalorder %v10025_v2, %v10074_v36  ;;  %v5592_v14 = vpack.c.bf16 %v2832_v7, %v2825_v46  ;;  %vm10097_vm2 = vmmov %vm10075_vm3  ;;  %v10118_v46 = vld [vmem:[#allocation48_spill] sm:$0xff] }
 0x15b   : > { %v7858_v30 = vpack.c.bf16 %v10077_v16, %v10076_v31  ;;  %5549 = vmatprep.subr.bf16.mxu0 %v7828_v43  ;;  %v7865_v60 = vpack.c.bf16 %v10080_v5, %v10079_v28  ;;  %5589 = vmatprep.subr.bf16.mxu1 %v5588_v63  ;;  %vm10085_vm6 = vcmp.eq.s32.totalorder %v10019_v38, %v10084_v13  ;;  %v10087_v22 = vand.u32 4294901760, %v7537_v35  ;;  %v10111_v63 = vld [vmem:[#allocation44_spill] sm:$0xff]  ;;  %v10124_v16 = vld [vmem:[#allocation50_spill] sm:$0xff] }
 0x15c   : > { %4259 = vmatmul.mubr.msk.f32.gmra.mrb[76].mxu1 %vm10082_vm4, %v10018_v19  ;;  %4223 = vmatmul.mubr.msk.f32.gmra.mrb[72].mxu0 %vm10083_vm5, %v10018_v19  ;;  %v10088_v8 = vand.u32 4294901760, %v7544_v6  ;;  %v10090_v25 = vand.u32 4294901760, %v7554_v44  ;;  %v10091_v49 = vand.u32 4294901760, %v7563_v41  ;;  %v5594_v27 = vpack.c.bf16 %v2720_v9, %v2713_v52  ;;  %v10095_v6 = vld [vmem:[#allocation41_spill] sm:$0xff]  ;;  %v10127_v28 = vld [vmem:[#allocation52_spill] sm:$0xff] }
 0x15d   : > { %10078 = vst [vmem:[#allocation53_spill] sm:$0xff] %v7858_v30  ;;  %10081 = vst [vmem:[#allocation25_spill] sm:$0xff] %v7865_v60  ;;  %4260 = vmatprep.mubr.msk.f32.mxu1 %vm10085_vm6, %v10018_v19  ;;  %4224 = vmatprep.mubr.msk.f32.mxu0 %vm10086_vm7, %v10018_v19  ;;  %vm10093_vm8 = vcmp.eq.s32.totalorder %v10025_v2, %v10084_v13  ;;  %vm10096_vm1 = vcmp.eq.s32.totalorder %v10019_v38, %v10095_v6  ;;  %v10098_v35 = vand.u32 4294901760, %v7583_v12  ;;  %v10105_v12 = vld [vmem:[#allocation43_spill] sm:$0xff]  ;;  %v10128_v5 = vmov 0.0  }
 0x15e   : > { %5551 = vmatpush3.bf16.msra.mxu0 %v7858_v30  ;;  %v7888_v15 = vpack.c.bf16 %v10088_v8, %v10087_v22  ;;  %v7895_v11 = vpack.c.bf16 %v10091_v49, %v10090_v25  ;;  %5591 = vmatpush3.bf16.msra.mxu1 %v5590_v45  ;;  %v10099_v44 = vand.u32 4294901760, %v7597_v56  ;;  %v10101_v51 = vand.u32 4294901760, %v7615_v24  ;;  %v10130_v22 = vld [vmem:[#allocation54_spill] sm:$0xff] }
 0x15f   : > { %5553 = vmatprep.subr.bf16.mxu0 %v7865_v60  ;;  %5593 = vmatprep.subr.bf16.mxu1 %v5592_v14  ;;  %v10102_v20 = vand.u32 4294901760, %v7617_v40  ;;  %vm10104_vm3 = vcmp.eq.s32.totalorder %v10025_v2, %v10095_v6  ;;  %vm10106_vm5 = vcmp.eq.s32.totalorder %v10019_v38, %v10105_v12  ;;  %v10107_v24 = vand.u32 4294901760, %v7652_v21 }
 0x160   : > { %10089 = vst [vmem:[#allocation24_spill] sm:$0xff] %v7888_v15  ;;  %10092 = vst [vmem:[#allocation55_spill] sm:$0xff] %v7895_v11  ;;  %4261 = vmatmul.mubr.msk.f32.gmra.mrb[78].mxu1 %vm10093_vm8, %v10018_v19  ;;  %4225 = vmatmul.mubr.msk.f32.gmra.mrb[74].mxu0 %vm10094_vm0, %v10018_v19  ;;  %v7918_v41 = vpack.c.bf16 %v10099_v44, %v10098_v35  ;;  %v10108_v56 = vand.u32 4294901760, %v7654_v55  ;;  %vm10110_vm7 = vcmp.eq.s32.totalorder %v10025_v2, %v10105_v12  ;;  %v10115_v55 = vld [vmem:[#allocation45_spill] sm:$0xff] }
 0x161   : > { %4262 = vmatprep.mubr.msk.f32.mxu1 %vm10096_vm1, %v10018_v19  ;;  %4226 = vmatprep.mubr.msk.f32.mxu0 %vm10097_vm2, %v10018_v19  ;;  %v7925_v57 = vpack.c.bf16 %v10102_v20, %v10101_v51  ;;  %vm10112_vm0 = vcmp.eq.s32.totalorder %v10019_v38, %v10111_v63  ;;  %v10113_v21 = vpack.c.bf16 %v7159_v37, %v7154_v33  ;;  %v8005_v7 = vadd.s32 384, %v10025_v2 }
 0x162   : > { %5555 = vmatpush3.bf16.msra.mxu0 %v7888_v15  ;;  %10100 = vst [vmem:[#allocation56_spill] sm:$0xff] %v7918_v41  ;;  %5595 = vmatpush3.bf16.msra.mxu1 %v5594_v27  ;;  %v7949_v40 = vpack.c.bf16 %v10108_v56, %v10107_v24  ;;  %vm10114_vm2 = vcmp.eq.s32.totalorder %v10025_v2, %v10111_v63  ;;  %v8012_v31 = vadd.s32 256, %v10025_v2 }
 0x163   : > { %5557 = vmatprep.subr.bf16.mxu0 %v7895_v11  ;;  %10103 = vst [vmem:[#allocation57_spill] sm:$0xff] %v7925_v57  ;;  %5629 = vmatprep.subr.bf16.mxu1 %v7286_v62  ;;  %10120 = vst [vmem:[#allocation59_spill] sm:$0xff] %v8005_v7 }
 0x164   : > { %4263 = vmatmul.mubr.msk.f32.gmra.mrb[80].mxu1 %vm10104_vm3, %v10018_v19  ;;  %4227 = vmatmul.mubr.msk.f32.gmra.mrb[76].mxu0 %vm10082_vm4, %v10018_v19  ;;  %10109 = vst [vmem:[#allocation58_spill] sm:$0xff] %v7949_v40  ;;  %vm10116_vm4 = vcmp.eq.s32.totalorder %v10019_v38, %v10115_v55  ;;  %10122 = vst [vmem:[#allocation60_spill] sm:$0xff] %v8012_v31 }
 0x165   : > { %4264 = vmatprep.mubr.msk.f32.mxu1 %vm10106_vm5, %v10018_v19  ;;  %4228 = vmatprep.mubr.msk.f32.mxu0 %vm10085_vm6, %v10018_v19  ;;  %vm10117_vm6 = vcmp.eq.s32.totalorder %v10025_v2, %v10115_v55 }
 0x166   : > { %5559 = vmatpush3.bf16.msra.mxu0 %v7918_v41 }
 0x167   : > { %5561 = vmatprep.subr.bf16.mxu0 %v7925_v57 }
 0x168   : > { %4265 = vmatmul.mubr.msk.f32.gmra.mrb[82].mxu1 %vm10110_vm7, %v10018_v19  ;;  %4229 = vmatmul.mubr.msk.f32.gmra.mrb[78].mxu0 %vm10093_vm8, %v10018_v19  ;;  %vm10119_vm8 = vmmov %vm10112_vm0 }
 0x169   : > { %4266 = vmatprep.mubr.msk.f32.mxu1 %vm10112_vm0, %v10018_v19  ;;  %4230 = vmatprep.mubr.msk.f32.mxu0 %vm10096_vm1, %v10018_v19  ;;  %vm10121_vm0 = vcmp.eq.s32.totalorder %v10025_v2, %v10118_v46  ;;  %vm10123_vm1 = vmmov %vm10114_vm2 }
 0x16a   : > { %5563 = vmatpush3.bf16.msra.mxu0 %v7949_v40 }
 0x16b   : > { %5597 = vmatprep.subr.bf16.mxu0 %v10113_v21 }
 0x16c   : > { %4267 = vmatmul.mubr.msk.f32.gmra.mrb[84].mxu1 %vm10114_vm2, %v10018_v19  ;;  %4231 = vmatmul.mubr.msk.f32.gmra.mrb[80].mxu0 %vm10104_vm3, %v10018_v19  ;;  %vm10125_vm2 = vmmov %vm10116_vm4  ;;  %vm302_vm3 = vcmp.eq.s32.totalorder %v8005_v7, %v10020_v1 }
 0x16d   : > { %4268 = vmatprep.mubr.msk.f32.mxu1 %vm10116_vm4, %v10018_v19  ;;  %4232 = vmatprep.mubr.msk.f32.mxu0 %vm10106_vm5, %v10018_v19  ;;  %vm301_vm4 = vcmp.eq.s32.totalorder %v8012_v31, %v10020_v1  ;;  %vm10126_vm5 = vmmov %vm10117_vm6  ;;  %v4121_v45 = vsel %vm302_vm3, 1.0, %v10128_v5  ;;  %v10138_v1 = vld [vmem:[#allocation28_spill] sm:$0xff] }
 0x16e   : > { %v4120_v52 = vsel %vm301_vm4, 1.0, %v10128_v5  ;;  %v8060_v9 = vsub.f32 %v4121_v45, %v4121_v45 }
 0x16f   : > { %v8082_v8 = vsub.f32 %v4120_v52, %v4120_v52 }
 0x170   : > { %4269 = vmatmul.mubr.msk.f32.gmra.mrb[86].mxu1 %vm10117_vm6, %v10018_v19  ;;  %4233 = vmatmul.mubr.msk.f32.gmra.mrb[82].mxu0 %vm10110_vm7, %v10018_v19  ;;  %vm306_vm6 = vcmp.eq.s32.totalorder %v8005_v7, %v10027_v61  ;;  %vm305_vm7 = vcmp.eq.s32.totalorder %v8012_v31, %v10027_v61  ;;  %v9724_v27 = vand.u32 4294901760, %v8060_v9 }
 0x171   : > { %4270 = vmatprep.mubr.msk.f32.mxu1 %vm348_vm9, %v10018_v19  ;;  %4234 = vmatprep.mubr.msk.f32.mxu0 %vm10119_vm8, %v10018_v19  ;;  %v4125_v14 = vsel %vm306_vm6, 1.0, %v10128_v5  ;;  %vm310_vm8 = vcmp.eq.s32.totalorder %v8005_v7, %v10037_v4  ;;  %v4124_v49 = vsel %vm305_vm7, 1.0, %v10128_v5  ;;  %v9723_v20 = vand.u32 4294901760, %v8082_v8 }
 0x172   : > { %v8084_v25 = vsub.f32 %v4125_v14, %v4125_v14  ;;  %v4129_v35 = vsel %vm310_vm8, 1.0, %v10128_v5  ;;  %v8115_v44 = vsub.f32 %v4124_v49, %v4124_v49  ;;  %v2372_v21 = vsub.f32 %v8060_v9, %v9724_v27 }
 0x173   : > { %v8127_v56 = vsub.f32 %v4129_v35, %v4129_v35  ;;  %v2378_v14 = vsub.f32 %v8082_v8, %v9723_v20 }
 0x174   : > { %4271 = vmatmul.mubr.msk.f32.gmra.mrb[88].mxu1 %vm10121_vm0, %v10018_v19  ;;  %4235 = vmatmul.mubr.msk.f32.gmra.mrb[84].mxu0 %vm10123_vm1, %v10018_v19  ;;  %v9722_v24 = vand.u32 4294901760, %v8084_v25  ;;  %v9726_v38 = vand.u32 4294901760, %v8115_v44  ;;  %vm9761_vm1 = vcmp.eq.s32.totalorder %v8005_v7, %v10074_v36 }
 0x175   : > { %4272 = vmatprep.mubr.msk.f32.mxu1 %vm352_vm11, %v10018_v19  ;;  %4236 = vmatprep.mubr.msk.f32.mxu0 %vm10125_vm2, %v10018_v19  ;;  %v2379_v2 = vand.u32 4294901760, %v2378_v14  ;;  %vm9759_vm2 = vcmp.eq.s32.totalorder %v8012_v31, %v10074_v36 }
 0x176   : > { %v2387_v49 = vsub.f32 %v8084_v25, %v9722_v24  ;;  %v2393_v20 = vsub.f32 %v8115_v44, %v9726_v38 }
 0x178   : > { %4273 = vmatmul.mubr.msk.f32.gmra.mrb[90].mxu1 %vm351_vm14, %v10018_v19  ;;  %4237 = vmatmul.mubr.msk.f32.gmra.mrb[86].mxu0 %vm10126_vm5, %v10018_v19  ;;  %v2388_v27 = vand.u32 4294901760, %v2387_v49  ;;  %v2394_v49 = vand.u32 4294901760, %v2393_v20  ;;  %vm9765_vm5 = vcmp.eq.s32.totalorder %v8005_v7, %v10084_v13 }
 0x179   : > { %4274 = vmatprep.mubr.msk.f32.mxu1 %vm356_vm13, %v10018_v19  ;;  %4238 = vmatprep.mubr.msk.f32.mxu0 %vm348_vm9, %v10018_v19  ;;  %vm10129_vm9 = vmmov %vm10121_vm0  ;;  %vm314_vm0 = vcmp.eq.s32.totalorder %v8005_v7, %v10045_v32 }
 0x17a   : > { %v4133_v45 = vsel %vm314_vm0, 1.0, %v10128_v5 }
 0x17b   : > { %v8171_v53 = vsub.f32 %v4133_v45, %v4133_v45 }
 0x17c   : > { %4275 = vmatmul.mubr.msk.f32.gmra.mrb[92].mxu1 %vm355_vm10, %v10018_v19  ;;  %4239 = vmatmul.mubr.msk.f32.gmra.mrb[88].mxu0 %vm10129_vm9, %v10018_v19  ;;  %vm9770_vm9 = vcmp.eq.s32.totalorder %v8012_v31, %v10084_v13 }
 0x17d   : > { %4276 = vmatprep.mubr.msk.f32.mxu1 %vm360_vm15, %v10018_v19  ;;  %4240 = vmatprep.mubr.msk.f32.mxu0 %vm352_vm11, %v10018_v19  ;;  %vm309_vm11 = vcmp.eq.s32.totalorder %v8012_v31, %v10037_v4  ;;  %10132 = vst [vmem:[#allocation62_spill] sm:$0xff] %v8171_v53 }
 0x17e   : > { %v4128_v51 = vsel %vm309_vm11, 1.0, %v10128_v5 }
 0x17f   : > { %v8152_v52 = vsub.f32 %v4128_v51, %v4128_v51  ;;  %v2373_v51 = vand.u32 4294901760, %v2372_v21 }
 0x180   : > { %4277 = vmatmul.mubr.msk.f32.gmra.mrb[94].mxu1 %vm359_vm12, %v10018_v19  ;;  %4241 = vmatmul.mubr.msk.f32.gmra.mrb[90].mxu0 %vm351_vm14, %v10018_v19  ;;  %vm9737_vm14 = vcmp.eq.s32.totalorder %v8005_v7, %v10052_v23 }
 0x181   : > { %4278 = vmatprep.mubr.msk.f32.mxu1 %vm302_vm3, %v10018_v19  ;;  %4242 = vmatprep.mubr.msk.f32.mxu0 %vm356_vm13, %v10018_v19  ;;  %vm313_vm13 = vcmp.eq.s32.totalorder %v8012_v31, %v10045_v32  ;;  %10131 = vst [vmem:[#allocation61_spill] sm:$0xff] %v8152_v52  ;;  %v4137_v24 = vsel %vm9737_vm14, 1.0, %v10128_v5  ;;  %v9731_v45 = vand.u32 4294901760, %v8152_v52 }
 0x182   : > { %v4132_v35 = vsel %vm313_vm13, 1.0, %v10128_v5  ;;  %v8197_v61 = vsub.f32 %v4137_v24, %v4137_v24 }
 0x183   : > { %v8188_v21 = vsub.f32 %v4132_v35, %v4132_v35  ;;  %v10135_v35 = vand.u32 4294901760, %v8127_v56  ;;  %v2408_v38 = vsub.f32 %v8152_v52, %v9731_v45  ;;  %v10142_v45 = vand.u32 4294901760, %v8171_v53 }
 0x184   : > { %4279 = vmatmul.mubr.msk.f32.vlgmr.msra.gmra.mrb[96].mxu1 %vm301_vm4, %v10018_v19  ;;  %4243 = vmatmul.mubr.msk.f32.gmra.mrb[92].mxu0 %vm355_vm10, %v10018_v19  ;;  %vm9786_vm10 = vcmp.eq.s32.totalorder %v8012_v31, %v10052_v23  ;;  %10134 = vst [vmem:[#allocation64_spill] sm:$0xff] %v8197_v61 }
 0x185   : > { %4280 = vmatprep.mubr.msk.f32.mxu1 %vm306_vm6, %v10018_v19  ;;  %4244 = vmatprep.mubr.msk.f32.mxu0 %vm360_vm15, %v10018_v19  ;;  %10133 = vst [vmem:[#allocation63_spill] sm:$0xff] %v8188_v21  ;;  %vm9747_vm15 = vcmp.eq.s32.totalorder %v8005_v7, %v10064_v42  ;;  %v4136_v14 = vsel %vm9786_vm10, 1.0, %v10128_v5  ;;  %v10147_v32 = vand.u32 4294901760, %v8188_v21 }
 0x186   : > { %5631 = vmatpush3.bf16.msra.mxu1 %v7387_v34  ;;  %v4141_v24 = vsel %vm9747_vm15, 1.0, %v10128_v5  ;;  %v8231_v4 = vsub.f32 %v4136_v14, %v4136_v14 }
 0x187   : > { %5633 = vmatprep.subr.bf16.mxu1 %v7417_v10  ;;  %v8246_v14 = vsub.f32 %v4141_v24, %v4141_v24  ;;  %v10143_v24 = vld [vmem:[#allocation8_spill] sm:$0xff] }
 0x188   : > { %4281 = vmatmul.mubr.msk.f32.gmra.mrb[98].mxu1 %vm305_vm7, %v10018_v19  ;;  %4245 = vmatmul.mubr.msk.f32.gmra.mrb[94].mxu0 %vm359_vm12, %v10018_v19  ;;  %vm9749_vm12 = vcmp.eq.s32.totalorder %v8012_v31, %v10064_v42  ;;  %10137 = vst [vmem:[#allocation65_spill] sm:$0xff] %v8231_v4 }
 0x189   : > { %4282 = vmatprep.mubr.msk.f32.mxu1 %vm310_vm8, %v10018_v19  ;;  %2374 = vmatprep.mubr.f32.mxu0 %v2373_v51  ;;  %v2402_v51 = vsub.f32 %v8127_v56, %v10135_v35  ;;  %v10136_v35 = vpack.c.bf16 %v7280_v47, %v7275_v17  ;;  %10141 = vst [vmem:[#allocation28_spill] sm:$0xff] %v8246_v14 }
 0x18a   : > { %5635 = vmatpush3.bf16.msra.mxu1 %v7443_v50 }
 0x18b   : > { %5637 = vmatprep.subr.bf16.mxu1 %v7476_v0  ;;  %v10139_v0 = vld [vmem:[#allocation29_spill] sm:$0xff]  ;;  %v2403_v20 = vand.u32 4294901760, %v2402_v51  ;;  %v4145_v51 = vsel %vm9761_vm1, 1.0, %v10128_v5 }
 0x18c   : > { %4283 = vmatmul.mubr.msk.f32.gmra.mrb[100].mxu1 %vm309_vm11, %v10018_v19  ;;  %2380 = vmatmul.mubr.f32.vlgmr.msra.gmra.mrb[96].mxu0 %v2379_v2  ;;  %v10140_v50 = vpack.c.bf16 %v10138_v1, %v10139_v0 }
 0x18d   : > { %4284 = vmatprep.mubr.msk.f32.mxu1 %vm314_vm0, %v10018_v19  ;;  %5599 = vmatpush3.bf16.msra.mxu0 %v10136_v35  ;;  %v10144_v35 = vld [vmem:[#allocation33_spill] sm:$0xff] }
 0x18e   : > { %2389 = vmatprep.mubr.f32.mxu0 %v2388_v27  ;;  %5601 = vmatprep.subr.bf16.mxu0 %v10140_v50  ;;  %v4140_v27 = vsel %vm9749_vm12, 1.0, %v10128_v5  ;;  %v2417_v50 = vsub.f32 %v8171_v53, %v10142_v45  ;;  %v2409_v45 = vand.u32 4294901760, %v2408_v38  ;;  %v10145_v2 = vpack.c.bf16 %v10143_v24, %v10144_v35 }
 0x18f   : > { %5639 = vmatpush3.bf16.msra.mxu1 %v7768_v54  ;;  %v10148_v54 = vand.u32 4294901760, %v8197_v61  ;;  %v4144_v38 = vsel %vm9759_vm2, 1.0, %v10128_v5 }
 0x190   : > { %4285 = vmatmul.mubr.msk.f32.gmra.mrb[102].mxu1 %vm313_vm13, %v10018_v19  ;;  %5641 = vmatprep.subr.bf16.mxu1 %v7774_v58  ;;  %v2423_v58 = vsub.f32 %v8188_v21, %v10147_v32  ;;  %v8292_v32 = vsub.f32 %v4145_v51, %v4145_v51  ;;  %v8308_v23 = vsub.f32 %v4144_v38, %v4144_v38  ;;  %v10159_v38 = vld [vmem:[#allocation23_spill] sm:$0xff] }
 0x191   : > { %2395 = vmatmul.mubr.f32.gmra.mrb[98].mxu0 %v2394_v49  ;;  %4286 = vmatprep.mubr.msk.f32.mxu1 %vm9737_vm14, %v10018_v19  ;;  %v8267_v49 = vsub.f32 %v4140_v27, %v4140_v27  ;;  %v2432_v53 = vsub.f32 %v8197_v61, %v10148_v54  ;;  %vm9772_vm14 = vcmp.eq.s32.totalorder %v8005_v7, %v10095_v6  ;;  %v2418_v54 = vand.u32 4294901760, %v2417_v50  ;;  %v10155_v61 = vld [vmem:[#allocation32_spill] sm:$0xff] }
 0x192   : > { %2404 = vmatprep.mubr.f32.mxu0 %v2403_v20  ;;  %5603 = vmatpush3.bf16.msra.mxu0 %v10145_v2  ;;  %v10149_v20 = vld [vmem:[#allocation34_spill] sm:$0xff]  ;;  %v10150_v2 = vld [vmem:[#allocation9_spill] sm:$0xff]  ;;  %10152 = vst [vmem:[#allocation66_spill] sm:$0xff] %v8292_v32  ;;  %v4148_v50 = vsel %vm9770_vm9, 1.0, %v10128_v5  ;;  %v2424_v51 = vand.u32 4294901760, %v2423_v58  ;;  %10153 = vst [vmem:[#allocation67_spill] sm:$0xff] %v8308_v23 }
 0x193   : > { %10146 = vst [vmem:[#allocation29_spill] sm:$0xff] %v8267_v49  ;;  %v10151_v27 = vpack.c.bf16 %v10149_v20, %v10150_v2  ;;  %5643 = vmatpush3.bf16.msra.mxu1 %v7822_v48  ;;  %v10154_v48 = vld [vmem:[#allocation10_spill] sm:$0xff]  ;;  %v2433_v21 = vand.u32 4294901760, %v2432_v53  ;;  %v10157_v20 = vand.u32 4294901760, %v8231_v4  ;;  %v10162_v53 = vand.u32 4294901760, %v8246_v14 }
 0x194   : > { %4287 = vmatmul.mubr.msk.f32.gmra.mrb[104].mxu1 %vm9786_vm10, %v10018_v19  ;;  %5645 = vmatprep.subr.bf16.mxu1 %v7828_v43  ;;  %v10156_v24 = vpack.c.bf16 %v10154_v48, %v10155_v61  ;;  %v10166_v58 = vld [vmem:[#allocation14_spill] sm:$0xff]  ;;  %vm353_vm10 = vcmp.eq.s32.totalorder %v8012_v31, %v10124_v16 }
 0x195   : > { %5605 = vmatprep.subr.bf16.mxu0 %v10151_v27  ;;  %v4149_v27 = vsel %vm9765_vm5, 1.0, %v10128_v5  ;;  %2410 = vmatmul.mubr.f32.gmra.mrb[100].mxu0 %v2409_v45  ;;  %v4153_v45 = vsel %vm9772_vm14, 1.0, %v10128_v5  ;;  %v4492_v43 = vpop.f32.mrb[0].mxu1  ;;  %v2438_v2 = vsub.f32 %v8231_v4, %v10157_v20  ;;  %v2447_v20 = vsub.f32 %v8246_v14, %v10162_v53  ;;  %v10165_v53 = vld [vmem:[#allocation11_spill] sm:$0xff]  ;;  %v10170_v4 = vld [vmem:[#allocation38_spill] sm:$0xff] }
 0x196   : > { %4288 = vmatprep.mubr.msk.f32.mxu1 %vm9747_vm15, %v10018_v19  ;;  %2419 = vmatprep.mubr.f32.mxu0 %v2418_v54  ;;  %v8320_v35 = vsub.f32 %v4149_v27, %v4149_v27  ;;  %v10160_v54 = vld [vmem:[#allocation13_spill] sm:$0xff]  ;;  %v8334_v27 = vsub.f32 %v4148_v50, %v4148_v50  ;;  %vm9779_vm15 = vcmp.eq.s32.totalorder %v8012_v31, %v10095_v6 }
 0x197   : > { %5607 = vmatpush3.bf16.msra.mxu0 %v10156_v24  ;;  %v10161_v52 = vpack.c.bf16 %v10159_v38, %v10160_v54  ;;  %5647 = vmatpush3.bf16.msra.mxu1 %v7858_v30  ;;  %v4493_v24 = vpop.f32.mrb[1].mxu1  ;;  %v8346_v42 = vsub.f32 %v4153_v45, %v4153_v45  ;;  %v10167_v30 = vpack.c.bf16 %v10165_v53, %v10166_v58  ;;  %v4152_v45 = vsel %vm9779_vm15, 1.0, %v10128_v5 }
 0x198   : > { %10158 = vst [vmem:[#allocation10_spill] sm:$0xff] %v8320_v35  ;;  %4289 = vmatmul.mubr.msk.f32.gmra.mrb[106].mxu1 %vm9749_vm12, %v10018_v19  ;;  %10163 = vst [vmem:[#allocation32_spill] sm:$0xff] %v8334_v27  ;;  %5649 = vmatprep.subr.bf16.mxu1 %v7865_v60  ;;  %vm9785_vm12 = vcmp.eq.s32.totalorder %v8005_v7, %v10105_v12 }
 0x199   : > { %5609 = vmatprep.subr.bf16.mxu0 %v10161_v52  ;;  %v8340_v52 = vadd.f32 %v4493_v24, %v4492_v43  ;;  %2425 = vmatmul.mubr.f32.gmra.mrb[102].mxu0 %v2424_v51  ;;  %10164 = vst [vmem:[#allocation13_spill] sm:$0xff] %v8346_v42  ;;  %v4495_v43 = vpop.f32.mrb[2].mxu1  ;;  %v2439_v24 = vand.u32 4294901760, %v2438_v2  ;;  %v10168_v51 = vand.u32 4294901760, %v8267_v49  ;;  %v2448_v2 = vand.u32 4294901760, %v2447_v20 }
 0x19a   : > { %4290 = vmatprep.mubr.msk.f32.mxu1 %vm9761_vm1, %v10018_v19  ;;  %2434 = vmatprep.mubr.f32.mxu0 %v2433_v21  ;;  %v10169_v21 = vld [vmem:[#allocation16_spill] sm:$0xff]  ;;  %v4157_v14 = vsel %vm9785_vm12, 1.0, %v10128_v5  ;;  %vm342_vm1 = vcmp.eq.s32.totalorder %v8005_v7, %v10111_v63  ;;  %v10178_v20 = vand.u32 4294901760, %v8320_v35 }
 0x19b   : > { %5611 = vmatpush3.bf16.msra.mxu0 %v10167_v30  ;;  %v2453_v60 = vsub.f32 %v8267_v49, %v10168_v51  ;;  %v10171_v50 = vpack.c.bf16 %v10169_v21, %v10170_v4  ;;  %5651 = vmatpush3.bf16.msra.mxu1 %v7888_v15  ;;  %v4496_v30 = vpop.f32.mrb[3].mxu1  ;;  %v10172_v51 = vand.u32 4294901760, %v8292_v32  ;;  %v8398_v21 = vsub.f32 %v4157_v14, %v4157_v14 }
 0x19c   : > { %4291 = vmatmul.mubr.msk.f32.gmra.mrb[108].mxu1 %vm9759_vm2, %v10018_v19  ;;  %5653 = vmatprep.subr.bf16.mxu1 %v7895_v11  ;;  %v8379_v15 = vadd.f32 %v4496_v30, %v4495_v43  ;;  %vm9784_vm2 = vcmp.eq.s32.totalorder %v8012_v31, %v10105_v12  ;;  %v10175_v43 = vld [vmem:[#allocation17_spill] sm:$0xff] }
 0x19d   : > { %5613 = vmatprep.subr.bf16.mxu0 %v10171_v50  ;;  %v2462_v49 = vsub.f32 %v8292_v32, %v10172_v51  ;;  %2440 = vmatmul.mubr.f32.gmra.mrb[104].mxu0 %v2439_v24  ;;  %v8388_v51 = vsub.f32 %v4152_v45, %v4152_v45  ;;  %v10174_v50 = vand.u32 4294901760, %v8308_v23  ;;  %v10176_v24 = vld [vmem:[#allocation40_spill] sm:$0xff]  ;;  %v4498_v11 = vpop.f32.mrb[4].mxu1  ;;  %v2454_v32 = vand.u32 4294901760, %v2453_v60 }
 0x19e   : > { %4292 = vmatprep.mubr.msk.f32.mxu1 %vm9765_vm5, %v10018_v19  ;;  %2449 = vmatprep.mubr.f32.mxu0 %v2448_v2  ;;  %v10177_v30 = vpack.c.bf16 %v10175_v43, %v10176_v24  ;;  %v2477_v45 = vsub.f32 %v8320_v35, %v10178_v20  ;;  %vm9795_vm5 = vcmp.eq.s32.totalorder %v8012_v31, %v10111_v63  ;;  %v10179_v2 = vld [vmem:[#allocation42_spill] sm:$0xff]  ;;  %v4412_v4 = vpop.f32.mrb[0].mxu0  ;;  %v4499_v43 = vpop.f32.mrb[5].mxu1  ;;  %v4156_v14 = vsel %vm9784_vm2, 1.0, %v10128_v5  ;;  %v10185_v35 = vld [vmem:[#allocation19_spill] sm:$0xff] }
 0x19f   : > { %10173 = vst [vmem:[#allocation68_spill] sm:$0xff] %v8388_v51  ;;  %v2468_v36 = vsub.f32 %v8308_v23, %v10174_v50  ;;  %v10180_v50 = vld [vmem:[#allocation18_spill] sm:$0xff]  ;;  %5655 = vmatpush3.bf16.msra.mxu1 %v7918_v41  ;;  %v2463_v60 = vand.u32 4294901760, %v2462_v49  ;;  %v10182_v20 = vand.u32 4294901760, %v8334_v27  ;;  %v555_v41 = vld [vmem:[%s9493_s2] sm:$0xff]  ;;  %v4413_v13 = vpop.f32.mrb[1].mxu0  ;;  %v8449_v24 = vsub.f32 %v4156_v14, %v4156_v14 }
 0x1a0   : > { %5615 = vmatpush3.bf16.msra.mxu0 %v10177_v30  ;;  %v10181_v23 = vpack.c.bf16 %v10179_v2, %v10180_v50  ;;  %4293 = vmatmul.mubr.msk.f32.gmra.mrb[110].mxu1 %vm9770_vm9, %v10018_v19  ;;  %v4161_v49 = vsel %vm342_vm1, 1.0, %v10128_v5  ;;  %vm9787_vm9 = vcmp.eq.s32.totalorder %v8005_v7, %v10115_v55  ;;  %v2478_v50 = vand.u32 4294901760, %v2477_v45 }
 0x1a1   : > { %v2483_v30 = vsub.f32 %v8334_v27, %v10182_v20  ;;  %5657 = vmatprep.subr.bf16.mxu1 %v7925_v57  ;;  %2455 = vmatmul.mubr.f32.gmra.mrb[106].mxu0 %v2454_v32  ;;  %v10183_v20 = vand.u32 4294901760, %v8346_v42  ;;  %v4160_v32 = vsel %vm9795_vm5, 1.0, %v10128_v5  ;;  %v10184_v27 = vld [vmem:[#allocation21_spill] sm:$0xff]  ;;  %v8460_v45 = vsub.f32 %v4161_v49, %v4161_v49 }
 0x1a2   : > { %5617 = vmatprep.subr.bf16.mxu0 %v10181_v23  ;;  %v8421_v23 = vadd.f32 %v4499_v43, %v4498_v11  ;;  %4294 = vmatprep.mubr.msk.f32.mxu1 %vm9772_vm14, %v10018_v19  ;;  %v4414_v43 = vadd.f32 %v4413_v13, %v4412_v4  ;;  %vm9796_vm14 = vcmp.eq.s32.totalorder %v8012_v31, %v10115_v55  ;;  %v10187_v13 = vld [vmem:[#allocation20_spill] sm:$0xff] }
 0x1a3   : > { %v2492_v11 = vsub.f32 %v8346_v42, %v10183_v20  ;;  %2464 = vmatprep.mubr.f32.mxu0 %v2463_v60  ;;  %v10186_v2 = vpack.c.bf16 %v10184_v27, %v10185_v35  ;;  %v4501_v20 = vpop.f32.mrb[6].mxu1  ;;  %v2469_v42 = vand.u32 4294901760, %v2468_v36  ;;  %v10188_v60 = vld [vmem:[#allocation22_spill] sm:$0xff]  ;;  %5659 = vmatpush3.bf16.msra.mxu1 %v7949_v40  ;;  %v4415_v58 = vpop.f32.mrb[2].mxu0  ;;  %v2484_v36 = vand.u32 4294901760, %v2483_v30  ;;  %10190 = vst [vmem:[#allocation21_spill] sm:$0xff] %v8460_v45 }
 0x1a4   : > { %v10189_v53 = vpack.c.bf16 %v10187_v13, %v10188_v60  ;;  %v680_v57 = vadd.f32 %v4414_v43, %v555_v41  ;;  %v4502_v38 = vpop.f32.mrb[7].mxu1  ;;  %4295 = vmatmul.mubr.msk.f32.gmra.mrb[112].mxu1 %vm9779_vm15, %v10018_v19  ;;  %5693 = vmatprep.subr.bf16.mxu1 %v7286_v62  ;;  %v556_v41 = vld [vmem:[%s9493_s2 + $0x8] sm:$0xff]  ;;  %v4416_v14 = vpop.f32.mrb[3].mxu0  ;;  %v8476_v30 = vsub.f32 %v4160_v32, %v4160_v32  ;;  %v4164_v62 = vsel %vm9796_vm14, 1.0, %v10128_v5 }
 0x1a5   : > { %5619 = vmatpush3.bf16.msra.mxu0 %v10186_v2  ;;  %v4165_v2 = vsel %vm9787_vm9, 1.0, %v10128_v5  ;;  %4296 = vmatprep.mubr.msk.f32.mxu1 %vm9785_vm12, %v10018_v19  ;;  %vm9799_vm15 = vcmp.eq.s32.totalorder %v8005_v7, %v10118_v46  ;;  %v2493_v49 = vand.u32 4294901760, %v2492_v11  ;;  %v10194_v40 = vand.u32 4294901760, %v8398_v21 }
 0x1a6   : > { %5621 = vmatprep.subr.bf16.mxu0 %v10189_v53  ;;  %v8467_v53 = vadd.f32 %v4502_v38, %v4501_v20  ;;  %2470 = vmatmul.mubr.f32.gmra.mrb[108].mxu0 %v2469_v42  ;;  %10191 = vst [vmem:[#allocation19_spill] sm:$0xff] %v8476_v30  ;;  %v4417_v38 = vadd.f32 %v4416_v14, %v4415_v58  ;;  %v10192_v42 = vand.u32 4294901760, %v8388_v51  ;;  %v4504_v4 = vpop.f32.mrb[8].mxu1  ;;  %v10196_v14 = vand.u32 4294901760, %v7154_v33 }
 0x1a7   : > { %2479 = vmatprep.mubr.f32.mxu0 %v2478_v50  ;;  %v10193_v20 = vpack.c.bf16 %v7686_v39, %v7681_v29  ;;  %v8491_v32 = vadd.f32 %v8340_v52, %v680_v57  ;;  %v8493_v6 = vsub.f32 %v4165_v2, %v4165_v2  ;;  %v2507_v58 = vsub.f32 %v8398_v21, %v10194_v40  ;;  %v4418_v52 = vpop.f32.mrb[4].mxu0 }
 0x1a8   : > { %v2498_v43 = vsub.f32 %v8388_v51, %v10192_v42  ;;  %v9788_v50 = vand.u32 4294901760, %v8449_v24  ;;  %v10195_v11 = vpack.c.bf16 %v7704_v3, %v7699_v59  ;;  %v10197_v42 = vand.u32 4294901760, %v7159_v37  ;;  %v4505_v51 = vpop.f32.mrb[9].mxu1  ;;  %4297 = vmatmul.mubr.msk.f32.gmra.mrb[114].mxu1 %vm9784_vm2, %v10018_v19  ;;  %v557_v37 = vld [vmem:[%s9493_s2 + $0x10] sm:$0xff] }
 0x1a9   : > { %5623 = vmatpush3.bf16.msra.mxu0 %v10193_v20  ;;  %v695_v57 = vadd.f32 %v4417_v38, %v556_v41  ;;  %v8510_v40 = vsub.f32 %v4164_v62, %v4164_v62  ;;  %v4169_v2 = vsel %vm9799_vm15, 1.0, %v10128_v5  ;;  %v4419_v41 = vpop.f32.mrb[5].mxu0  ;;  %4298 = vmatprep.mubr.msk.f32.mxu1 %vm342_vm1, %v10018_v19  ;;  %vm349_vm2 = vcmp.eq.s32.totalorder %v8012_v31, %v10118_v46 }
 0x1aa   : > { %5625 = vmatprep.subr.bf16.mxu0 %v10195_v11  ;;  %v5660_v20 = vpack.c.bf16 %v10197_v42, %v10196_v14  ;;  %v8517_v11 = vadd.f32 %v4505_v51, %v4504_v4  ;;  %2485 = vmatmul.mubr.f32.gmra.mrb[110].mxu0 %v2484_v36  ;;  %vm354_vm12 = vcmp.eq.s32.totalorder %v8005_v7, %v10124_v16  ;;  %v4507_v38 = vpop.f32.mrb[10].mxu1  ;;  %v2499_v14 = vand.u32 4294901760, %v2498_v43 }
 0x1ab   : > { %10198 = vst [vmem:[#allocation20_spill] sm:$0xff] %v8510_v40  ;;  %v4420_v51 = vadd.f32 %v4419_v41, %v4418_v52  ;;  %2494 = vmatprep.mubr.f32.mxu0 %v2493_v49  ;;  %v10199_v4 = vpack.c.bf16 %v7739_v26, %v7734_v18  ;;  %v8537_v36 = vadd.f32 %v8379_v15, %v695_v57  ;;  %v4421_v41 = vpop.f32.mrb[6].mxu0  ;;  %v4508_v33 = vpop.f32.mrb[11].mxu1  ;;  %v2508_v15 = vand.u32 4294901760, %v2507_v58 }
 0x1ac   : > { %v2513_v42 = vsub.f32 %v8449_v24, %v9788_v50  ;;  %v8542_v62 = vsub.f32 %v4169_v2, %v4169_v2  ;;  %4299 = vmatmul.mubr.msk.f32.gmra.mrb[116].mxu1 %vm9795_vm5, %v10018_v19  ;;  %v10201_v43 = vand.u32 4294901760, %v8460_v45  ;;  %v4168_v2 = vsel %vm349_vm2, 1.0, %v10128_v5 }
 0x1ad   : > { %5627 = vmatpush3.bf16.msra.mxu0 %v10199_v4  ;;  %v710_v52 = vadd.f32 %v4420_v51, %v557_v37  ;;  %v8556_v4 = vadd.f32 %v4508_v33, %v4507_v38  ;;  %v4422_v37 = vpop.f32.mrb[7].mxu0  ;;  %4300 = vmatprep.mubr.msk.f32.mxu1 %vm9787_vm9, %v10018_v19  ;;  %v10202_v58 = vand.u32 4294901760, %v8476_v30  ;;  %v4173_v33 = vsel %vm354_vm12, 1.0, %v10128_v5 }
 0x1ae   : > { %10200 = vst [vmem:[#allocation22_spill] sm:$0xff] %v8542_v62  ;;  %5661 = vmatprep.subr.bf16.mxu0 %v5660_v20  ;;  %v2522_v57 = vsub.f32 %v8460_v45, %v10201_v43  ;;  %v558_v20 = vld [vmem:[%s9493_s2 + $0x18] sm:$0xff]  ;;  %2500 = vmatmul.mubr.f32.gmra.mrb[112].mxu0 %v2499_v14  ;;  %v4172_v38 = vsel %vm353_vm10, 1.0, %v10128_v5  ;;  %v4423_v14 = vadd.f32 %v4422_v37, %v4421_v41  ;;  %v9797_v43 = vand.u32 4294901760, %v8510_v40 }
 0x1af   : > { %v2528_v51 = vsub.f32 %v8476_v30, %v10202_v58  ;;  %2509 = vmatprep.mubr.f32.mxu0 %v2508_v15  ;;  %vm358_vm9 = vcmp.eq.s32.totalorder %v8005_v7, %v10127_v28  ;;  %v8580_v50 = vadd.f32 %v8421_v23, %v710_v52  ;;  %v4510_v58 = vpop.f32.mrb[12].mxu1  ;;  %v2514_v49 = vand.u32 4294901760, %v2513_v42  ;;  %v4424_v15 = vpop.f32.mrb[8].mxu0 }
 0x1b0   : > { %v8582_v63 = vsub.f32 %v4168_v2, %v4168_v2  ;;  %v10204_v12 = vand.u32 4294901760, %v8493_v6  ;;  %v9800_v45 = vand.u32 4294901760, %v8542_v62  ;;  %v725_v41 = vadd.f32 %v4423_v14, %v558_v20  ;;  %v4511_v37 = vpop.f32.mrb[13].mxu1  ;;  %4301 = vmatmul.mubr.msk.f32.gmra.mrb[118].mxu1 %vm9796_vm14, %v10018_v19  ;;  %v4425_v2 = vpop.f32.mrb[9].mxu0 }
 0x1b1   : > { %v2523_v23 = vand.u32 4294901760, %v2522_v57  ;;  %v8592_v52 = vsub.f32 %v4173_v33, %v4173_v33  ;;  %vm357_vm5 = vcmp.eq.s32.totalorder %v8012_v31, %v10127_v28  ;;  %v8596_v42 = vadd.f32 %v4511_v37, %v4510_v58  ;;  %4302 = vmatprep.mubr.msk.f32.mxu1 %vm9799_vm15, %v10018_v19 }
 0x1b2   : > { %10203 = vst [vmem:[#allocation69_spill] sm:$0xff] %v8582_v63  ;;  %v2537_v30 = vsub.f32 %v8493_v6, %v10204_v12  ;;  %v559_v12 = vld [vmem:[%s9493_s2 + $0x20] sm:$0xff]  ;;  %2515 = vmatmul.mubr.f32.gmra.mrb[114].mxu0 %v2514_v49  ;;  %v2529_v20 = vand.u32 4294901760, %v2528_v51  ;;  %v8605_v57 = vsub.f32 %v4172_v38, %v4172_v38  ;;  %v4177_v33 = vsel %vm358_vm9, 1.0, %v10128_v5  ;;  %v4513_v51 = vpop.f32.mrb[14].mxu1 }
 0x1b3   : > { %10205 = vst [vmem:[#allocation70_spill] sm:$0xff] %v8592_v52  ;;  %v4426_v14 = vadd.f32 %v4425_v2, %v4424_v15  ;;  %2524 = vmatprep.mubr.f32.mxu0 %v2523_v23  ;;  %v2543_v58 = vsub.f32 %v8510_v40, %v9797_v43  ;;  %vm362_vm14 = vcmp.eq.s32.totalorder %v8005_v7, %v10130_v22  ;;  %v4176_v15 = vsel %vm357_vm5, 1.0, %v10128_v5  ;;  %v4427_v43 = vpop.f32.mrb[10].mxu0  ;;  %v4514_v55 = vpop.f32.mrb[15].mxu1 }
 0x1b4   : > { %v8617_v49 = vadd.f32 %v8467_v53, %v725_v41  ;;  %v2538_v38 = vand.u32 4294901760, %v2537_v30  ;;  %v2552_v37 = vsub.f32 %v8542_v62, %v9800_v45  ;;  %4303 = vmatmul.mubr.msk.f32.gmra.mrb[120].mxu1 %vm349_vm2, %v10018_v19  ;;  %v8631_v53 = vsub.f32 %v4177_v33, %v4177_v33 }
 0x1b5   : > { %v740_v2 = vadd.f32 %v4426_v14, %v559_v12  ;;  %vm361_vm15 = vcmp.eq.s32.totalorder %v8012_v31, %v10130_v22  ;;  %v8636_v41 = vadd.f32 %v4514_v55, %v4513_v51  ;;  %v560_v12 = vld [vmem:[%s9493_s2 + $0x28] sm:$0xff]  ;;  %v4428_v14 = vpop.f32.mrb[11].mxu0  ;;  %4304 = vmatprep.mubr.msk.f32.mxu1 %vm354_vm12, %v10018_v19  ;;  %v4181_v33 = vsel %vm362_vm14, 1.0, %v10128_v5 }
 0x1b6   : > { %2530 = vmatmul.mubr.f32.gmra.mrb[116].mxu0 %v2529_v20  ;;  %v4429_v45 = vadd.f32 %v4428_v14, %v4427_v43  ;;  %v2544_v55 = vand.u32 4294901760, %v2543_v58  ;;  %v8649_v51 = vsub.f32 %v4176_v15, %v4176_v15  ;;  %v4516_v23 = vpop.f32.mrb[16].mxu1  ;;  %v2553_v20 = vand.u32 4294901760, %v2552_v37 }
 0x1b7   : > { %2539 = vmatprep.mubr.f32.mxu0 %v2538_v38  ;;  %v8652_v30 = vadd.f32 %v8517_v11, %v740_v2  ;;  %v10206_v46 = vand.u32 4294901760, %v8582_v63  ;;  %v4180_v40 = vsel %vm361_vm15, 1.0, %v10128_v5  ;;  %v4430_v58 = vpop.f32.mrb[12].mxu0  ;;  %v4517_v15 = vpop.f32.mrb[17].mxu1  ;;  %v8666_v11 = vsub.f32 %v4181_v33, %v4181_v33  ;;  %v561_v5 = vld [vmem:[%s9493_s2 + $0x30] sm:$0xff] }
 0x1b8   : > { %v755_v38 = vadd.f32 %v4429_v45, %v560_v12  ;;  %4305 = vmatmul.mubr.msk.f32.gmra.mrb[122].mxu1 %vm353_vm10, %v10018_v19  ;;  %v10207_v37 = vand.u32 4294901760, %v8592_v52  ;;  %v4518_v14 = vadd.f32 %v4517_v15, %v4516_v23  ;;  %v4431_v45 = vpop.f32.mrb[13].mxu0  ;;  %v8682_v2 = vsub.f32 %v4180_v40, %v4180_v40 }
 0x1b9   : > { %v2558_v62 = vsub.f32 %v8582_v63, %v10206_v46  ;;  %4306 = vmatprep.mubr.msk.f32.mxu1 %vm358_vm9, %v10018_v19  ;;  %v4432_v12 = vadd.f32 %v4431_v45, %v4430_v58  ;;  %v10208_v23 = vand.u32 4294901760, %v8605_v57  ;;  %v562_v58 = vld [vmem:[%s9493_s2 + $0x38] sm:$0xff]  ;;  %v10213_v31 = vand.u32 4294901760, %v8082_v8 }
 0x1ba   : > { %v2567_v46 = vsub.f32 %v8592_v52, %v10207_v37  ;;  %2545 = vmatmul.mubr.f32.gmra.mrb[118].mxu0 %v2544_v55  ;;  %v8680_v33 = vadd.f32 %v8556_v4, %v755_v38  ;;  %v4519_v37 = vpop.f32.mrb[18].mxu1  ;;  %v9811_v55 = vand.u32 4294901760, %v8649_v51  ;;  %v10212_v22 = vand.u32 4294901760, %v8682_v2 }
 0x1bb   : > { %2554 = vmatprep.mubr.f32.mxu0 %v2553_v20  ;;  %v2559_v43 = vand.u32 4294901760, %v2558_v62  ;;  %v2573_v15 = vsub.f32 %v8605_v57, %v10208_v23  ;;  %v770_v16 = vadd.f32 %v4432_v12, %v561_v5  ;;  %v4433_v52 = vpop.f32.mrb[14].mxu0  ;;  %v4520_v63 = vpop.f32.mrb[19].mxu1  ;;  %v10209_v20 = vand.u32 4294901760, %v8631_v53 }
 0x1bc   : > { %4307 = vmatmul.mubr.msk.f32.gmra.mrb[124].mxu1 %vm357_vm5, %v10018_v19  ;;  %v2568_v4 = vand.u32 4294901760, %v2567_v46  ;;  %v4521_v38 = vadd.f32 %v4520_v63, %v4519_v37  ;;  %v4434_v5 = vpop.f32.mrb[15].mxu0  ;;  %v2588_v63 = vsub.f32 %v8649_v51, %v9811_v55 }
 0x1bd   : > { %v2582_v40 = vsub.f32 %v8631_v53, %v10209_v20  ;;  %4308 = vmatprep.mubr.msk.f32.mxu1 %vm362_vm14, %v10018_v19  ;;  %v4435_v45 = vadd.f32 %v4434_v5, %v4433_v52  ;;  %v8704_v46 = vadd.f32 %v8596_v42, %v770_v16  ;;  %v2574_v23 = vand.u32 4294901760, %v2573_v15 }
 0x1be   : > { %2560 = vmatmul.mubr.f32.gmra.mrb[120].mxu0 %v2559_v43  ;;  %v4522_v12 = vpop.f32.mrb[20].mxu1  ;;  %v10210_v16 = vand.u32 4294901760, %v8666_v11  ;;  %v2589_v37 = vand.u32 4294901760, %v2588_v63  ;;  %v10214_v63 = vand.u32 4294901760, %v8084_v25 }
 0x1bf   : > { %2569 = vmatprep.mubr.f32.mxu0 %v2568_v4  ;;  %v785_v20 = vadd.f32 %v4435_v45, %v562_v58  ;;  %v4436_v43 = vpop.f32.mrb[16].mxu0  ;;  %v4523_v62 = vpop.f32.mrb[21].mxu1  ;;  %v2583_v52 = vand.u32 4294901760, %v2582_v40  ;;  %v563_v4 = vld [vmem:[%s9493_s2 + $0x40] sm:$0xff]  ;;  %v10211_v58 = vand.u32 4294901760, %v8060_v9 }
 0x1c0   : > { %4309 = vmatmul.mubr.msk.f32.gmra.mrb[126].mxu1 %vm361_vm15, %v10018_v19  ;;  %v2597_v42 = vsub.f32 %v8666_v11, %v10210_v16  ;;  %v4524_v15 = vadd.f32 %v4523_v62, %v4522_v12  ;;  %v4437_v5 = vpop.f32.mrb[17].mxu0  ;;  %v2603_v62 = vsub.f32 %v8682_v2, %v10212_v22 }
 0x1c1   : > { %3319 = vmatprep.mubr.f32.mxu1 %v10211_v58  ;;  %v4438_v45 = vadd.f32 %v4437_v5, %v4436_v43  ;;  %v8723_v55 = vadd.f32 %v8636_v41, %v785_v20  ;;  %v564_v43 = vld [vmem:[%s9493_s2 + $0x48] sm:$0xff]  ;;  %v10215_v5 = vand.u32 4294901760, %v8115_v44  ;;  %v565_v58 = vld [vmem:[%s9493_s2 + $0x50] sm:$0xff] }
 0x1c2   : > { %2575 = vmatmul.mubr.f32.gmra.mrb[122].mxu0 %v2574_v23  ;;  %v4525_v40 = vpop.f32.mrb[22].mxu1  ;;  %v2598_v23 = vand.u32 4294901760, %v2597_v42 }
 0x1c3   : > { %2584 = vmatprep.mubr.f32.mxu0 %v2583_v52  ;;  %v800_v12 = vadd.f32 %v4438_v45, %v563_v4  ;;  %v4439_v16 = vpop.f32.mrb[18].mxu0  ;;  %v4526_v28 = vpop.f32.mrb[23].mxu1  ;;  %v2604_v4 = vand.u32 4294901760, %v2603_v62 }
 0x1c4   : > { %3323 = vmatmul.mubr.f32.vlgmr.msra.gmra.mrb[128].mxu1 %v10213_v31  ;;  %v4527_v7 = vadd.f32 %v4526_v28, %v4525_v40  ;;  %v4440_v41 = vpop.f32.mrb[19].mxu0  ;;  %v10218_v40 = vand.u32 4294901760, %v7280_v47 }
 0x1c5   : > { %3330 = vmatprep.mubr.f32.mxu1 %v10214_v63  ;;  %v4441_v20 = vadd.f32 %v4440_v41, %v4439_v16  ;;  %5695 = vmatpush3.bf16.msra.mxu1 %v7387_v34  ;;  %v8736_v22 = vadd.f32 %v4518_v14, %v800_v12  ;;  %v10216_v34 = vand.u32 4294901760, %v8127_v56  ;;  %v10219_v12 = vld [vmem:[#allocation12_spill] sm:$0xff]  ;;  %v10221_v41 = vand.u32 4294901760, %v10138_v1 }
 0x1c6   : > { %2590 = vmatmul.mubr.f32.gmra.mrb[124].mxu0 %v2589_v37  ;;  %v4528_v52 = vpop.f32.mrb[24].mxu1  ;;  %5697 = vmatprep.subr.bf16.mxu1 %v7417_v10  ;;  %v10217_v10 = vand.u32 4294901760, %v7275_v17 }
 0x1c7   : > { %2599 = vmatprep.mubr.f32.mxu0 %v2598_v23  ;;  %v815_v31 = vadd.f32 %v4441_v20, %v564_v43  ;;  %v4442_v28 = vpop.f32.mrb[20].mxu0  ;;  %v4529_v42 = vpop.f32.mrb[25].mxu1  ;;  %v10220_v43 = vand.u32 4294901760, %v10139_v0  ;;  %v10222_v20 = vld [vmem:[#allocation15_spill] sm:$0xff]  ;;  %v10225_v0 = vld [vmem:[#allocation62_spill] sm:$0xff] }
 0x1c8   : > { %3334 = vmatmul.mubr.f32.gmra.mrb[130].mxu1 %v10215_v5  ;;  %v8741_v37 = vadd.f32 %v4529_v42, %v4528_v52  ;;  %v4443_v45 = vpop.f32.mrb[21].mxu0  ;;  %v5662_v62 = vpack.c.bf16 %v10218_v40, %v10217_v10  ;;  %v10226_v1 = vand.u32 4294901760, %v10225_v0  ;;  %v10227_v5 = vld [vmem:[#allocation33_spill] sm:$0xff] }
 0x1c9   : > { %3341 = vmatprep.mubr.f32.mxu1 %v10216_v34  ;;  %v4444_v14 = vadd.f32 %v4443_v45, %v4442_v28  ;;  %5699 = vmatpush3.bf16.msra.mxu1 %v10219_v12  ;;  %v8754_v16 = vadd.f32 %v4521_v38, %v815_v31  ;;  %v5664_v63 = vpack.c.bf16 %v10221_v41, %v10220_v43  ;;  %v10223_v28 = vld [vmem:[#allocation61_spill] sm:$0xff]  ;;  %v566_v38 = vld [vmem:[%s9493_s2 + $0x58] sm:$0xff]  ;;  %v10229_v45 = vld [vmem:[#allocation8_spill] sm:$0xff] }
 0x1ca   : > { %2605 = vmatmul.mubr.f32.gmra.mrb[126].mxu0 %v2604_v4  ;;  %v4531_v23 = vpop.f32.mrb[26].mxu1  ;;  %5701 = vmatprep.subr.bf16.mxu1 %v10222_v20  ;;  %v10224_v17 = vand.u32 4294901760, %v10223_v28  ;;  %v10230_v34 = vand.u32 4294901760, %v10229_v45  ;;  %v10231_v12 = vld [vmem:[#allocation9_spill] sm:$0xff]  ;;  %v10233_v43 = vld [vmem:[#allocation34_spill] sm:$0xff] }
 0x1cb   : > { %3077 = vmatprep.mubr.f32.mxu0 %v8060_v9  ;;  %v830_v52 = vadd.f32 %v4444_v14, %v565_v58  ;;  %v4445_v4 = vpop.f32.mrb[22].mxu0  ;;  %v4532_v9 = vpop.f32.mrb[27].mxu1  ;;  %v10228_v58 = vand.u32 4294901760, %v10227_v5  ;;  %v10235_v20 = vld [vmem:[#allocation46_spill] sm:$0xff] }
 0x1cc   : > { %3345 = vmatmul.mubr.f32.gmra.mrb[132].mxu1 %v10224_v17  ;;  %v8763_v47 = vadd.f32 %v4532_v9, %v4531_v23  ;;  %v4446_v31 = vpop.f32.mrb[23].mxu0  ;;  %v10232_v23 = vand.u32 4294901760, %v10231_v12  ;;  %v10243_v12 = vand.u32 4294901760, %v10160_v54 }
 0x1cd   : > { %3352 = vmatprep.mubr.f32.mxu1 %v10226_v1  ;;  %v4447_v42 = vadd.f32 %v4446_v31, %v4445_v4  ;;  %v5666_v14 = vpack.c.bf16 %v10230_v34, %v10228_v58  ;;  %v8776_v10 = vadd.f32 %v4524_v15, %v830_v52  ;;  %5703 = vmatpush3.bf16.msra.mxu1 %v10235_v20  ;;  %v10238_v31 = vld [vmem:[#allocation47_spill] sm:$0xff]  ;;  %v567_v15 = vld [vmem:[%s9493_s2 + $0x60] sm:$0xff]  ;;  %v10242_v58 = vand.u32 4294901760, %v10154_v48 }
 0x1ce   : > { %3080 = vmatmul.mubr.f32.vlgmr.msra.gmra.mrb[128].mxu0 %v8082_v8  ;;  %v4534_v40 = vpop.f32.mrb[28].mxu1  ;;  %v10234_v8 = vand.u32 4294901760, %v10233_v43  ;;  %5705 = vmatprep.subr.bf16.mxu1 %v10238_v31  ;;  %v10239_v52 = vld [vmem:[#allocation64_spill] sm:$0xff]  ;;  %v10252_v31 = vld [vmem:[#allocation14_spill] sm:$0xff] }
 0x1cf   : > { %5663 = vmatpush3.bf16.msra.mxu0 %v5662_v62  ;;  %3086 = vmatprep.mubr.f32.mxu0 %v8084_v25  ;;  %v845_v4 = vadd.f32 %v4447_v42, %v566_v38  ;;  %v4448_v62 = vpop.f32.mrb[24].mxu0  ;;  %v4535_v9 = vpop.f32.mrb[29].mxu1  ;;  %v10236_v25 = vld [vmem:[#allocation63_spill] sm:$0xff]  ;;  %v10240_v5 = vand.u32 4294901760, %v10239_v52  ;;  %v10241_v42 = vand.u32 4294901760, %v10155_v61 }
 0x1d0   : > { %5665 = vmatprep.subr.bf16.mxu0 %v5664_v63  ;;  %v5668_v41 = vpack.c.bf16 %v10234_v8, %v10232_v23  ;;  %v10237_v17 = vand.u32 4294901760, %v10236_v25  ;;  %v8786_v1 = vadd.f32 %v4535_v9, %v4534_v40  ;;  %v4449_v63 = vpop.f32.mrb[25].mxu0  ;;  %v10244_v23 = vld [vmem:[#allocation23_spill] sm:$0xff]  ;;  %v10246_v8 = vld [vmem:[#allocation49_spill] sm:$0xff] }
 0x1d1   : > { %v4450_v38 = vadd.f32 %v4449_v63, %v4448_v62  ;;  %v5670_v45 = vpack.c.bf16 %v10242_v58, %v10241_v42  ;;  %v8799_v34 = vadd.f32 %v4527_v7, %v845_v4  ;;  %5707 = vmatpush3.bf16.msra.mxu1 %v10246_v8  ;;  %v10249_v61 = vld [vmem:[#allocation51_spill] sm:$0xff]  ;;  %v568_v7 = vld [vmem:[%s9493_s2 + $0x68] sm:$0xff] }
 0x1d2   : > { %3356 = vmatmul.mubr.f32.gmra.mrb[134].mxu1 %v10237_v17  ;;  %3089 = vmatmul.mubr.f32.gmra.mrb[130].mxu0 %v8115_v44  ;;  %v4537_v40 = vpop.f32.mrb[30].mxu1  ;;  %v10245_v44 = vand.u32 4294901760, %v10244_v23  ;;  %v10254_v63 = vld [vmem:[#allocation11_spill] sm:$0xff]  ;;  %v10260_v8 = vld [vmem:[#allocation53_spill] sm:$0xff] }
 0x1d3   : > { %3363 = vmatprep.mubr.f32.mxu1 %v10240_v5  ;;  %3095 = vmatprep.mubr.f32.mxu0 %v8127_v56  ;;  %v860_v20 = vadd.f32 %v4450_v38, %v567_v15  ;;  %v4451_v62 = vpop.f32.mrb[26].mxu0  ;;  %v4538_v56 = vpop.f32.mrb[31].mxu1  ;;  %v10253_v15 = vand.u32 4294901760, %v10252_v31  ;;  %v10255_v5 = vand.u32 4294901760, %v10254_v63 }
 0x1d4   : > { %5667 = vmatpush3.bf16.msra.mxu0 %v5666_v14  ;;  %v5672_v43 = vpack.c.bf16 %v10245_v44, %v10243_v12  ;;  %v10247_v14 = vld [vmem:[#allocation65_spill] sm:$0xff]  ;;  %5709 = vmatprep.subr.bf16.mxu1 %v10249_v61  ;;  %v8809_v48 = vadd.f32 %v4538_v56, %v4537_v40  ;;  %v4452_v54 = vpop.f32.mrb[27].mxu0  ;;  %v10256_v40 = vld [vmem:[#allocation38_spill] sm:$0xff] }
 0x1d5   : > { %5669 = vmatprep.subr.bf16.mxu0 %v5668_v41  ;;  %v10248_v9 = vand.u32 4294901760, %v10247_v14  ;;  %v10250_v41 = vld [vmem:[#allocation28_spill] sm:$0xff]  ;;  %v4453_v17 = vadd.f32 %v4452_v54, %v4451_v62  ;;  %v5674_v38 = vpack.c.bf16 %v10255_v5, %v10253_v15  ;;  %v8823_v42 = vadd.f32 %v8741_v37, %v860_v20  ;;  %5711 = vmatpush3.bf16.msra.mxu1 %v10260_v8  ;;  %v10261_v56 = vld [vmem:[#allocation29_spill] sm:$0xff]  ;;  %v569_v37 = vld [vmem:[%s9493_s2 + $0x70] sm:$0xff] }
 0x1d6   : > { %3098 = vmatmul.mubr.f32.gmra.mrb[132].mxu0 %v10223_v28  ;;  %v10251_v4 = vand.u32 4294901760, %v10250_v41  ;;  %v4652_v58 = vpop.f32.mrb[32].mxu1  ;;  %v10257_v12 = vand.u32 4294901760, %v10256_v40  ;;  %v10258_v28 = vld [vmem:[#allocation16_spill] sm:$0xff]  ;;  %v10263_v61 = vld [vmem:[#allocation25_spill] sm:$0xff]  ;;  %v10264_v20 = vld [vmem:[#allocation66_spill] sm:$0xff] }
 0x1d7   : > { %3367 = vmatmul.mubr.f32.gmra.mrb[136].mxu1 %v10248_v9  ;;  %3104 = vmatprep.mubr.f32.mxu0 %v10225_v0  ;;  %v10259_v23 = vand.u32 4294901760, %v10258_v28  ;;  %v875_v62 = vadd.f32 %v4453_v17, %v568_v7  ;;  %v4454_v0 = vpop.f32.mrb[28].mxu0  ;;  %v10262_v9 = vand.u32 4294901760, %v10261_v56  ;;  %v10266_v17 = vld [vmem:[#allocation40_spill] sm:$0xff]  ;;  %v10268_v15 = vld [vmem:[#allocation17_spill] sm:$0xff] }
 0x1d8   : > { %3374 = vmatprep.mubr.f32.mxu1 %v10251_v4  ;;  %5671 = vmatpush3.bf16.msra.mxu0 %v5670_v45  ;;  %v4653_v45 = vpop.f32.mrb[33].mxu1  ;;  %v10265_v4 = vand.u32 4294901760, %v10264_v20  ;;  %v10267_v31 = vand.u32 4294901760, %v10266_v17  ;;  %v10269_v63 = vand.u32 4294901760, %v10268_v15 }
 0x1d9   : > { %5673 = vmatprep.subr.bf16.mxu0 %v5672_v43  ;;  %v5676_v44 = vpack.c.bf16 %v10259_v23, %v10257_v12  ;;  %5713 = vmatprep.subr.bf16.mxu1 %v10263_v61  ;;  %v8833_v54 = vadd.f32 %v4653_v45, %v4652_v58  ;;  %v4455_v43 = vpop.f32.mrb[29].mxu0  ;;  %v8847_v58 = vadd.f32 %v8763_v47, %v875_v62  ;;  %v10270_v12 = vld [vmem:[#allocation18_spill] sm:$0xff]  ;;  %v10274_v45 = vld [vmem:[#allocation24_spill] sm:$0xff]  ;;  %v570_v47 = vld [vmem:[%s9493_s2 + $0x78] sm:$0xff] }
 0x1da   : > { %3107 = vmatmul.mubr.f32.gmra.mrb[134].mxu0 %v10236_v25  ;;  %v4456_v7 = vadd.f32 %v4455_v43, %v4454_v0  ;;  %v5678_v5 = vpack.c.bf16 %v10269_v63, %v10267_v31  ;;  %v4655_v40 = vpop.f32.mrb[34].mxu1  ;;  %v10271_v28 = vand.u32 4294901760, %v10270_v12  ;;  %v10272_v25 = vld [vmem:[#allocation42_spill] sm:$0xff]  ;;  %5715 = vmatpush3.bf16.msra.mxu1 %v10274_v45  ;;  %v10277_v43 = vld [vmem:[#allocation55_spill] sm:$0xff]  ;;  %v10282_v12 = vand.u32 4294901760, %v10188_v60  ;;  %v10285_v45 = vld [vmem:[#allocation32_spill] sm:$0xff] }
 0x1db   : > { %3378 = vmatmul.mubr.f32.gmra.mrb[138].mxu1 %v10262_v9  ;;  %3113 = vmatprep.mubr.f32.mxu0 %v10239_v52  ;;  %v10273_v23 = vand.u32 4294901760, %v10272_v25  ;;  %v4457_v52 = vpop.f32.mrb[30].mxu0  ;;  %v10275_v9 = vld [vmem:[#allocation67_spill] sm:$0xff]  ;;  %v10278_v62 = vld [vmem:[#allocation10_spill] sm:$0xff]  ;;  %v10284_v25 = vld [vmem:[#allocation56_spill] sm:$0xff] }
 0x1dc   : > { %3385 = vmatprep.mubr.f32.mxu1 %v10265_v4  ;;  %5675 = vmatpush3.bf16.msra.mxu0 %v5674_v38  ;;  %v890_v0 = vadd.f32 %v4456_v7, %v569_v37  ;;  %v4656_v38 = vpop.f32.mrb[35].mxu1  ;;  %v10276_v61 = vand.u32 4294901760, %v10275_v9  ;;  %v10279_v17 = vand.u32 4294901760, %v10278_v62  ;;  %v10280_v37 = vand.u32 4294901760, %v10185_v35 }
 0x1dd   : > { %5677 = vmatprep.subr.bf16.mxu0 %v5676_v44  ;;  %v5680_v8 = vpack.c.bf16 %v10273_v23, %v10271_v28  ;;  %5717 = vmatprep.subr.bf16.mxu1 %v10277_v43  ;;  %v4657_v4 = vadd.f32 %v4656_v38, %v4655_v40  ;;  %v4458_v44 = vpop.f32.mrb[31].mxu0  ;;  %v10281_v7 = vand.u32 4294901760, %v10184_v27  ;;  %v10286_v35 = vand.u32 4294901760, %v10285_v45  ;;  %v10287_v27 = vld [vmem:[#allocation57_spill] sm:$0xff] }
 0x1de   : > { %3116 = vmatmul.mubr.f32.gmra.mrb[136].mxu0 %v10247_v14  ;;  %v4459_v31 = vadd.f32 %v4458_v44, %v4457_v52  ;;  %v8869_v63 = vadd.f32 %v8786_v1, %v890_v0  ;;  %v4658_v40 = vpop.f32.mrb[36].mxu1  ;;  %v10283_v14 = vand.u32 4294901760, %v10187_v13  ;;  %5719 = vmatpush3.bf16.msra.mxu1 %v10284_v25  ;;  %v10290_v13 = vand.u32 4294901760, %v7681_v29  ;;  %v10292_v44 = vld [vmem:[#allocation58_spill] sm:$0xff]  ;;  %v10295_v29 = vld [vmem:[#allocation68_spill] sm:$0xff] }
 0x1df   : > { %3389 = vmatmul.mubr.f32.gmra.mrb[140].mxu1 %v10276_v61  ;;  %3122 = vmatprep.mubr.f32.mxu0 %v10250_v41  ;;  %v5682_v15 = vpack.c.bf16 %v10281_v7, %v10280_v37  ;;  %v4572_v41 = vpop.f32.mrb[32].mxu0  ;;  %v10291_v38 = vand.u32 4294901760, %v7686_v39 }
 0x1e0   : > { %3396 = vmatprep.mubr.f32.mxu1 %v10279_v17  ;;  %5679 = vmatpush3.bf16.msra.mxu0 %v5678_v5  ;;  %v5684_v28 = vpack.c.bf16 %v10283_v14, %v10282_v12  ;;  %v905_v23 = vadd.f32 %v4459_v31, %v570_v47  ;;  %v4659_v5 = vpop.f32.mrb[37].mxu1  ;;  %v4573_v1 = vpop.f32.mrb[33].mxu0  ;;  %v10294_v17 = vand.u32 4294901760, %v7704_v3  ;;  %v10298_v3 = vand.u32 4294901760, %v7734_v18  ;;  %v10301_v18 = vld [vmem:[#allocation21_spill] sm:$0xff] }
 0x1e1   : > { %5681 = vmatprep.subr.bf16.mxu0 %v5680_v8  ;;  %5721 = vmatprep.subr.bf16.mxu1 %v10287_v27  ;;  %v4660_v52 = vadd.f32 %v4659_v5, %v4658_v40  ;;  %v10288_v8 = vld [vmem:[#allocation13_spill] sm:$0xff]  ;;  %v4574_v60 = vadd.f32 %v4573_v1, %v4572_v41  ;;  %v5686_v61 = vpack.c.bf16 %v10291_v38, %v10290_v13  ;;  %v10300_v41 = vand.u32 4294901760, %v8449_v24 }
 0x1e2   : > { %3125 = vmatmul.mubr.f32.gmra.mrb[138].mxu0 %v10261_v56  ;;  %v10289_v0 = vand.u32 4294901760, %v10288_v8  ;;  %v8888_v43 = vadd.f32 %v8809_v48, %v905_v23  ;;  %v4661_v47 = vpop.f32.mrb[38].mxu1  ;;  %5723 = vmatpush3.bf16.msra.mxu1 %v10292_v44  ;;  %v10293_v56 = vand.u32 4294901760, %v7699_v59  ;;  %v10297_v48 = vand.u32 4294901760, %v8398_v21 }
 0x1e3   : > { %3400 = vmatmul.mubr.f32.gmra.mrb[142].mxu1 %v10286_v35  ;;  %3131 = vmatprep.mubr.f32.mxu0 %v10264_v20  ;;  %v1380_v20 = vadd.f32 %v4574_v60, %v8491_v32  ;;  %v4575_v37 = vpop.f32.mrb[34].mxu0  ;;  %v4662_v7 = vpop.f32.mrb[39].mxu1  ;;  %v10299_v59 = vand.u32 4294901760, %v7739_v26  ;;  %v10302_v35 = vand.u32 4294901760, %v10301_v18  ;;  %v10303_v60 = vld [vmem:[#allocation19_spill] sm:$0xff] }
 0x1e4   : > { %3407 = vmatprep.mubr.f32.mxu1 %v10289_v0  ;;  %5683 = vmatpush3.bf16.msra.mxu0 %v5682_v15  ;;  %v5688_v31 = vpack.c.bf16 %v10294_v17, %v10293_v56  ;;  %v10296_v15 = vand.u32 4294901760, %v10295_v29  ;;  %v4663_v39 = vadd.f32 %v4662_v7, %v4661_v47  ;;  %v4576_v40 = vpop.f32.mrb[35].mxu0  ;;  %v10304_v13 = vand.u32 4294901760, %v10303_v60  ;;  %v10306_v17 = vld [vmem:[#allocation20_spill] sm:$0xff]  ;;  %v10308_v7 = vld [vmem:[#allocation22_spill] sm:$0xff] }
 0x1e5   : > { %5685 = vmatprep.subr.bf16.mxu0 %v5684_v28  ;;  %v4577_v12 = vadd.f32 %v4576_v40, %v4575_v37  ;;  %v5690_v32 = vpack.c.bf16 %v10299_v59, %v10298_v3  ;;  %v8907_v14 = vadd.f32 %v8833_v54, %v1380_v20 }
 0x1e6   : > { %3134 = vmatmul.mubr.f32.gmra.mrb[140].mxu0 %v10275_v9  ;;  %v4664_v28 = vpop.f32.mrb[40].mxu1 }
 0x1e7   : > { %3411 = vmatmul.mubr.f32.gmra.mrb[144].mxu1 %v10296_v15  ;;  %3140 = vmatprep.mubr.f32.mxu0 %v10278_v62  ;;  %v1389_v25 = vadd.f32 %v4577_v12, %v8537_v36  ;;  %v4578_v9 = vpop.f32.mrb[36].mxu0  ;;  %v4665_v23 = vpop.f32.mrb[41].mxu1  ;;  %v10310_v12 = vld [vmem:[#allocation69_spill] sm:$0xff] }
 0x1e8   : > { %3418 = vmatprep.mubr.f32.mxu1 %v10297_v48  ;;  %5687 = vmatpush3.bf16.msra.mxu0 %v5686_v61  ;;  %v4666_v5 = vadd.f32 %v4665_v23, %v4664_v28  ;;  %v4579_v62 = vpop.f32.mrb[37].mxu0  ;;  %v10311_v3 = vand.u32 4294901760, %v10310_v12 }
 0x1e9   : > { %5689 = vmatprep.subr.bf16.mxu0 %v5688_v31  ;;  %v4580_v26 = vadd.f32 %v4579_v62, %v4578_v9  ;;  %v8916_v54 = vadd.f32 %v4657_v4, %v1389_v25  ;;  %v10307_v31 = vand.u32 4294901760, %v10306_v17  ;;  %v10314_v62 = vand.u32 4294901760, %v8605_v57 }
 0x1ea   : > { %3143 = vmatmul.mubr.f32.gmra.mrb[142].mxu0 %v10285_v45  ;;  %v4667_v27 = vpop.f32.mrb[42].mxu1  ;;  %v10305_v45 = vand.u32 4294901760, %v8493_v6 }
 0x1eb   : > { %3422 = vmatmul.mubr.f32.gmra.mrb[146].mxu1 %v10300_v41  ;;  %3149 = vmatprep.mubr.f32.mxu0 %v10288_v8  ;;  %v1398_v36 = vadd.f32 %v4580_v26, %v8580_v50  ;;  %v4581_v1 = vpop.f32.mrb[38].mxu0  ;;  %v4668_v0 = vpop.f32.mrb[43].mxu1  ;;  %v10315_v26 = vand.u32 4294901760, %v8631_v53 }
 0x1ec   : > { %3429 = vmatprep.mubr.f32.mxu1 %v10302_v35  ;;  %5691 = vmatpush3.bf16.msra.mxu0 %v5690_v32  ;;  %v4669_v38 = vadd.f32 %v4668_v0, %v4667_v27  ;;  %v4582_v61 = vpop.f32.mrb[39].mxu0  ;;  %v10316_v0 = vand.u32 4294901760, %v8649_v51 }
 0x1ed   : > { %v4583_v47 = vadd.f32 %v4582_v61, %v4581_v1  ;;  %v8925_v4 = vadd.f32 %v4660_v52, %v1398_v36  ;;  %v10317_v61 = vand.u32 4294901760, %v8666_v11 }
 0x1ee   : > { %3152 = vmatmul.mubr.f32.gmra.mrb[144].mxu0 %v10295_v29  ;;  %v4670_v8 = vpop.f32.mrb[44].mxu1  ;;  %v10309_v29 = vand.u32 4294901760, %v10308_v7 }
 0x1ef   : > { %3433 = vmatmul.mubr.f32.gmra.mrb[148].mxu1 %v10304_v13  ;;  %3158 = vmatprep.mubr.f32.mxu0 %v8398_v21  ;;  %v1407_v50 = vadd.f32 %v4583_v47, %v8617_v49  ;;  %v4584_v44 = vpop.f32.mrb[40].mxu0  ;;  %v4671_v56 = vpop.f32.mrb[45].mxu1 }
 0x1f0   : > { %3440 = vmatprep.mubr.f32.mxu1 %v10305_v45  ;;  %v4672_v20 = vadd.f32 %v4671_v56, %v4670_v8  ;;  %v4585_v37 = vpop.f32.mrb[41].mxu0 }
 0x1f1   : > { %v4586_v15 = vadd.f32 %v4585_v37, %v4584_v44  ;;  %v8934_v21 = vadd.f32 %v4663_v39, %v1407_v50  ;;  %v10318_v44 = vand.u32 4294901760, %v8682_v2 }
 0x1f2   : > { %3161 = vmatmul.mubr.f32.gmra.mrb[146].mxu0 %v8449_v24  ;;  %v4673_v52 = vpop.f32.mrb[46].mxu1  ;;  %v10312_v24 = vld [vmem:[#allocation70_spill] sm:$0xff] }
 0x1f3   : > { %3444 = vmatmul.mubr.f32.gmra.mrb[150].mxu1 %v10307_v31  ;;  %3167 = vmatprep.mubr.f32.mxu0 %v10301_v18  ;;  %v1416_v49 = vadd.f32 %v4586_v15, %v8652_v30  ;;  %v4587_v40 = vpop.f32.mrb[42].mxu0  ;;  %v4674_v48 = vpop.f32.mrb[47].mxu1  ;;  %v10313_v28 = vand.u32 4294901760, %v10312_v24  ;;  %v10319_v31 = vld [vmem:[#allocation59_spill] sm:$0xff] }
 0x1f4   : > { %3451 = vmatprep.mubr.f32.mxu1 %v10309_v29  ;;  %v4675_v59 = vadd.f32 %v4674_v48, %v4673_v52  ;;  %v4588_v32 = vpop.f32.mrb[43].mxu0 }
 0x1f5   : > { %v4589_v25 = vadd.f32 %v4588_v32, %v4587_v40  ;;  %v8943_v39 = vadd.f32 %v4666_v5, %v1416_v49  ;;  %v10321_v49 = vld [vmem:[#allocation60_spill] sm:$0xff] }
 0x1f6   : > { %3170 = vmatmul.mubr.f32.gmra.mrb[148].mxu0 %v10303_v60  ;;  %v4676_v9 = vpop.f32.mrb[48].mxu1 }
 0x1f7   : > { %3455 = vmatmul.mubr.f32.gmra.mrb[152].mxu1 %v10311_v3  ;;  %3176 = vmatprep.mubr.f32.mxu0 %v8493_v6  ;;  %v1425_v30 = vadd.f32 %v4589_v25, %v8680_v33  ;;  %v4590_v23 = vpop.f32.mrb[44].mxu0  ;;  %v4677_v41 = vpop.f32.mrb[49].mxu1 }
 0x1f8   : > { %3462 = vmatprep.mubr.f32.mxu1 %v10313_v28  ;;  %v4678_v18 = vadd.f32 %v4677_v41, %v4676_v9  ;;  %v4591_v35 = vpop.f32.mrb[45].mxu0 }
 0x1f9   : > { %v4592_v27 = vadd.f32 %v4591_v35, %v4590_v23  ;;  %v8952_v6 = vadd.f32 %v4669_v38, %v1425_v30 }
 0x1fa   : > { %3179 = vmatmul.mubr.f32.gmra.mrb[150].mxu0 %v10306_v17  ;;  %v4679_v5 = vpop.f32.mrb[50].mxu1 }
 0x1fb   : > { %3466 = vmatmul.mubr.f32.gmra.mrb[154].mxu1 %v10314_v62  ;;  %3185 = vmatprep.mubr.f32.mxu0 %v10308_v7  ;;  %v1434_v33 = vadd.f32 %v4592_v27, %v8704_v46  ;;  %v4593_v36 = vpop.f32.mrb[46].mxu0  ;;  %v4680_v1 = vpop.f32.mrb[51].mxu1 }
 0x1fc   : > { %3473 = vmatprep.mubr.f32.mxu1 %v10315_v26  ;;  %v4681_v60 = vadd.f32 %v4680_v1, %v4679_v5  ;;  %v4594_v13 = vpop.f32.mrb[47].mxu0  ;;  %v10325_v1 = vld [vmem:[#allocation35_spill] sm:$0xff] }
 0x1fd   : > { %v4595_v45 = vadd.f32 %v4594_v13, %v4593_v36  ;;  %v8961_v38 = vadd.f32 %v4672_v20, %v1434_v33 }
 0x1fe   : > { %3188 = vmatmul.mubr.f32.gmra.mrb[152].mxu0 %v10310_v12  ;;  %v4682_v47 = vpop.f32.mrb[52].mxu1 }
 0x1ff   : > { %3477 = vmatmul.mubr.f32.gmra.mrb[156].mxu1 %v10316_v0  ;;  %3194 = vmatprep.mubr.f32.mxu0 %v10312_v24  ;;  %v1443_v46 = vadd.f32 %v4595_v45, %v8723_v55  ;;  %v4596_v8 = vpop.f32.mrb[48].mxu0  ;;  %v4683_v50 = vpop.f32.mrb[53].mxu1 }
 0x200   : > { %3484 = vmatprep.mubr.f32.mxu1 %v10317_v61  ;;  %v4684_v56 = vadd.f32 %v4683_v50, %v4682_v47  ;;  %v4597_v17 = vpop.f32.mrb[49].mxu0 }
 0x201   : > { %v4598_v7 = vadd.f32 %v4597_v17, %v4596_v8  ;;  %v8972_v20 = vadd.f32 %v4675_v59, %v1443_v46  ;;  %v10328_v8 = vld [vmem:[#allocation36_spill] sm:$0xff] }
 0x202   : > { %3197 = vmatmul.mubr.f32.gmra.mrb[154].mxu0 %v8605_v57  ;;  %v4685_v55 = vpop.f32.mrb[54].mxu1 }
 0x203   : > { %3488 = vmatmul.mubr.f32.gmra.mrb[158].mxu1 %v10318_v44  ;;  %3203 = vmatprep.mubr.f32.mxu0 %v8631_v53  ;;  %v1452_v29 = vadd.f32 %v4598_v7, %v8736_v22  ;;  %v4599_v15 = vpop.f32.mrb[50].mxu0  ;;  %v4686_v52 = vpop.f32.mrb[55].mxu1 }
 0x204   : > { %4342 = vmatprep.mubr.msk.f32.mxu1 %vm302_vm3, %v10018_v19  ;;  %v4687_v57 = vadd.f32 %v4686_v52, %v4685_v55  ;;  %v4600_v40 = vpop.f32.mrb[51].mxu0 }
 0x205   : > { %v4601_v53 = vadd.f32 %v4600_v40, %v4599_v15  ;;  %v8985_v22 = vadd.f32 %v4678_v18, %v1452_v29  ;;  %v10331_v29 = vld [vmem:[#allocation37_spill] sm:$0xff] }
 0x206   : > { %3206 = vmatmul.mubr.f32.gmra.mrb[156].mxu0 %v8649_v51  ;;  %v4688_v12 = vpop.f32.mrb[56].mxu1 }
 0x207   : > { %4343 = vmatmul.mubr.msk.f32.vlgmr.msra.gmra.mrb[160].mxu1 %vm301_vm4, %v10018_v19  ;;  %3212 = vmatprep.mubr.f32.mxu0 %v8666_v11  ;;  %v1461_v3 = vadd.f32 %v4601_v53, %v8754_v16  ;;  %v4602_v59 = vpop.f32.mrb[52].mxu0  ;;  %v4689_v32 = vpop.f32.mrb[57].mxu1 }
 0x208   : > { %4344 = vmatprep.mubr.msk.f32.mxu1 %vm306_vm6, %v10018_v19  ;;  %v4690_v51 = vadd.f32 %v4689_v32, %v4688_v12  ;;  %v4603_v24 = vpop.f32.mrb[53].mxu0 }
 0x209   : > { %v4604_v11 = vadd.f32 %v4603_v24, %v4602_v59  ;;  %v9001_v16 = vadd.f32 %v4681_v60, %v1461_v3  ;;  %v10336_v3 = vld [vmem:[#allocation39_spill] sm:$0xff] }
 0x20a   : > { %3215 = vmatmul.mubr.f32.gmra.mrb[158].mxu0 %v8682_v2  ;;  %v4691_v25 = vpop.f32.mrb[58].mxu1 }
 0x20b   : > { %4345 = vmatmul.mubr.msk.f32.gmra.mrb[162].mxu1 %vm305_vm7, %v10018_v19  ;;  %4310 = vmatprep.mubr.msk.f32.mxu0 %vm302_vm3, %v10018_v19  ;;  %v1470_v9 = vadd.f32 %v4604_v11, %v8776_v10  ;;  %v4605_v30 = vpop.f32.mrb[54].mxu0  ;;  %v4692_v23 = vpop.f32.mrb[59].mxu1  ;;  %vm10326_vm3 = vcmp.eq.s32.totalorder %v10319_v31, %v10325_v1 }
 0x20c   : > { %4346 = vmatprep.mubr.msk.f32.mxu1 %vm310_vm8, %v10018_v19  ;;  %v4693_v2 = vadd.f32 %v4692_v23, %v4691_v25  ;;  %v4606_v41 = vpop.f32.mrb[55].mxu0 }
 0x20d   : > { %v4607_v10 = vadd.f32 %v4606_v41, %v4605_v30  ;;  %v9020_v18 = vadd.f32 %v4684_v56, %v1470_v9  ;;  %v10340_v9 = vld [vmem:[#allocation41_spill] sm:$0xff] }
 0x20e   : > { %4311 = vmatmul.mubr.msk.f32.vlgmr.msra.gmra.mrb[160].mxu0 %vm301_vm4, %v10018_v19  ;;  %v4694_v35 = vpop.f32.mrb[60].mxu1  ;;  %vm10327_vm4 = vcmp.eq.s32.totalorder %v10321_v49, %v10325_v1 }
 0x20f   : > { %4347 = vmatmul.mubr.msk.f32.gmra.mrb[164].mxu1 %vm309_vm11, %v10018_v19  ;;  %4312 = vmatprep.mubr.msk.f32.mxu0 %vm306_vm6, %v10018_v19  ;;  %v1479_v26 = vadd.f32 %v4607_v10, %v8799_v34  ;;  %v4608_v27 = vpop.f32.mrb[56].mxu0  ;;  %v4695_v5 = vpop.f32.mrb[61].mxu1  ;;  %vm10329_vm6 = vcmp.eq.s32.totalorder %v10319_v31, %v10328_v8 }
 0x210   : > { %4348 = vmatprep.mubr.msk.f32.mxu1 %vm314_vm0, %v10018_v19  ;;  %v4696_v33 = vadd.f32 %v4695_v5, %v4694_v35  ;;  %v4609_v36 = vpop.f32.mrb[57].mxu0 }
 0x211   : > { %v4610_v34 = vadd.f32 %v4609_v36, %v4608_v27  ;;  %v9039_v0 = vadd.f32 %v4687_v57, %v1479_v26  ;;  %v10345_v26 = vld [vmem:[#allocation43_spill] sm:$0xff] }
 0x212   : > { %4313 = vmatmul.mubr.msk.f32.gmra.mrb[162].mxu0 %vm305_vm7, %v10018_v19  ;;  %v4697_v60 = vpop.f32.mrb[62].mxu1  ;;  %vm10330_vm7 = vcmp.eq.s32.totalorder %v10321_v49, %v10328_v8 }
 0x213   : > { %4349 = vmatmul.mubr.msk.f32.gmra.mrb[166].mxu1 %vm313_vm13, %v10018_v19  ;;  %4314 = vmatprep.mubr.msk.f32.mxu0 %vm310_vm8, %v10018_v19  ;;  %v1488_v13 = vadd.f32 %v4610_v34, %v8823_v42  ;;  %v4611_v61 = vpop.f32.mrb[58].mxu0  ;;  %v4698_v45 = vpop.f32.mrb[63].mxu1  ;;  %vm10332_vm8 = vcmp.eq.s32.totalorder %v10319_v31, %v10331_v29 }
 0x214   : > { %4350 = vmatprep.mubr.msk.f32.mxu1 %vm10326_vm3, %v10018_v19  ;;  %v4699_v47 = vadd.f32 %v4698_v45, %v4697_v60  ;;  %v4612_v46 = vpop.f32.mrb[59].mxu0 }
 0x215   : > { %v4613_v42 = vadd.f32 %v4612_v46, %v4611_v61  ;;  %v9058_v50 = vadd.f32 %v4690_v51, %v1488_v13  ;;  %v10350_v13 = vld [vmem:[#allocation44_spill] sm:$0xff] }
 0x216   : > { %4315 = vmatmul.mubr.msk.f32.gmra.mrb[164].mxu0 %vm309_vm11, %v10018_v19  ;;  %v4812_v44 = vpop.f32.mrb[64].mxu1  ;;  %vm10333_vm11 = vmmov %vm10326_vm3  ;;  %vm10337_vm3 = vcmp.eq.s32.totalorder %v10319_v31, %v10336_v3 }
 0x217   : > { %4351 = vmatmul.mubr.msk.f32.gmra.mrb[168].mxu1 %vm10327_vm4, %v10018_v19  ;;  %4316 = vmatprep.mubr.msk.f32.mxu0 %vm314_vm0, %v10018_v19  ;;  %v1497_v56 = vadd.f32 %v4613_v42, %v8847_v58  ;;  %v4614_v17 = vpop.f32.mrb[60].mxu0  ;;  %v4813_v37 = vpop.f32.mrb[65].mxu1  ;;  %vm10334_vm0 = vcmp.eq.s32.totalorder %v10321_v49, %v10331_v29 }
 0x218   : > { %4352 = vmatprep.mubr.msk.f32.mxu1 %vm10329_vm6, %v10018_v19  ;;  %v4814_v7 = vadd.f32 %v4813_v37, %v4812_v44  ;;  %v4615_v55 = vpop.f32.mrb[61].mxu0 }
 0x219   : > { %v4616_v58 = vadd.f32 %v4615_v55, %v4614_v17  ;;  %v9077_v15 = vadd.f32 %v4693_v2, %v1497_v56  ;;  %v10352_v56 = vld [vmem:[#allocation45_spill] sm:$0xff] }
 0x21a   : > { %4317 = vmatmul.mubr.msk.f32.gmra.mrb[166].mxu0 %vm313_vm13, %v10018_v19  ;;  %v4815_v52 = vpop.f32.mrb[66].mxu1  ;;  %vm10335_vm13 = vmmov %vm10327_vm4 }
 0x21b   : > { %4353 = vmatmul.mubr.msk.f32.gmra.mrb[170].mxu1 %vm10330_vm7, %v10018_v19  ;;  %4318 = vmatprep.mubr.msk.f32.mxu0 %vm10333_vm11, %v10018_v19  ;;  %v1506_v57 = vadd.f32 %v4616_v58, %v8869_v63  ;;  %v4617_v40 = vpop.f32.mrb[62].mxu0  ;;  %v4816_v48 = vpop.f32.mrb[67].mxu1  ;;  %vm10338_vm4 = vmmov %vm10329_vm6  ;;  %vm10339_vm6 = vcmp.eq.s32.totalorder %v10321_v49, %v10336_v3  ;;  %vm10342_vm11 = vcmp.eq.s32.totalorder %v10319_v31, %v10331_v29 }
 0x21c   : > { %4354 = vmatprep.mubr.msk.f32.mxu1 %vm10332_vm8, %v10018_v19  ;;  %v4817_v53 = vadd.f32 %v4816_v48, %v4815_v52  ;;  %v4618_v12 = vpop.f32.mrb[63].mxu0  ;;  %vm10341_vm8 = vcmp.eq.s32.totalorder %v10319_v31, %v10340_v9 }
 0x21d   : > { %v4619_v63 = vadd.f32 %v4618_v12, %v4617_v40  ;;  %v9096_v59 = vadd.f32 %v4696_v33, %v1506_v57  ;;  %v10355_v57 = vld [vmem:[#allocation48_spill] sm:$0xff] }
 0x21e   : > { %4319 = vmatmul.mubr.msk.f32.gmra.mrb[168].mxu0 %vm10335_vm13, %v10018_v19  ;;  %v4818_v32 = vpop.f32.mrb[68].mxu1  ;;  %vm10344_vm13 = vcmp.eq.s32.totalorder %v10321_v49, %v10331_v29 }
 0x21f   : > { %4355 = vmatmul.mubr.msk.f32.gmra.mrb[172].mxu1 %vm10334_vm0, %v10018_v19  ;;  %4320 = vmatprep.mubr.msk.f32.mxu0 %vm10338_vm4, %v10018_v19  ;;  %v1515_v51 = vadd.f32 %v4619_v63, %v8888_v43  ;;  %v4732_v24 = vpop.f32.mrb[64].mxu0  ;;  %v4819_v28 = vpop.f32.mrb[69].mxu1  ;;  %vm10343_vm0 = vcmp.eq.s32.totalorder %v10321_v49, %v10340_v9  ;;  %vm10347_vm4 = vcmp.eq.s32.totalorder %v10319_v31, %v10336_v3 }
 0x220   : > { %4356 = vmatprep.mubr.msk.f32.mxu1 %vm10337_vm3, %v10018_v19  ;;  %v4820_v11 = vadd.f32 %v4819_v28, %v4818_v32  ;;  %v4733_v25 = vpop.f32.mrb[65].mxu0  ;;  %vm10346_vm3 = vcmp.eq.s32.totalorder %v10319_v31, %v10345_v26 }
 0x221   : > { %v4734_v43 = vadd.f32 %v4733_v25, %v4732_v24  ;;  %v9115_v30 = vadd.f32 %v4699_v47, %v1515_v51 }
 0x222   : > { %4321 = vmatmul.mubr.msk.f32.gmra.mrb[170].mxu0 %vm10330_vm7, %v10018_v19  ;;  %v4821_v23 = vpop.f32.mrb[70].mxu1  ;;  %vm10349_vm7 = vcmp.eq.s32.totalorder %v10321_v49, %v10336_v3 }
 0x223   : > { %4357 = vmatmul.mubr.msk.f32.gmra.mrb[174].mxu1 %vm10339_vm6, %v10018_v19  ;;  %4322 = vmatprep.mubr.msk.f32.mxu0 %vm10342_vm11, %v10018_v19  ;;  %v1956_v2 = vadd.f32 %v4734_v43, %v8907_v14  ;;  %v4735_v41 = vpop.f32.mrb[66].mxu0  ;;  %v4822_v62 = vpop.f32.mrb[71].mxu1  ;;  %vm10348_vm6 = vcmp.eq.s32.totalorder %v10321_v49, %v10345_v26  ;;  %vm10351_vm11 = vcmp.eq.s32.totalorder %v10321_v49, %v10350_v13 }
 0x224   : > { %4358 = vmatprep.mubr.msk.f32.mxu1 %vm10341_vm8, %v10018_v19  ;;  %v4823_v10 = vadd.f32 %v4822_v62, %v4821_v23  ;;  %v4736_v35 = vpop.f32.mrb[67].mxu0 }
 0x225   : > { %v4737_v14 = vadd.f32 %v4736_v35, %v4735_v41  ;;  %v9134_v27 = vadd.f32 %v4814_v7, %v1956_v2 }
 0x226   : > { %4323 = vmatmul.mubr.msk.f32.gmra.mrb[172].mxu0 %vm10344_vm13, %v10018_v19  ;;  %v4824_v5 = vpop.f32.mrb[72].mxu1  ;;  %vm10353_vm13 = vcmp.eq.s32.totalorder %v10319_v31, %v10352_v56 }
 0x227   : > { %4359 = vmatmul.mubr.msk.f32.gmra.mrb[176].mxu1 %vm10343_vm0, %v10018_v19  ;;  %4324 = vmatprep.mubr.msk.f32.mxu0 %vm10347_vm4, %v10018_v19  ;;  %v1963_v33 = vadd.f32 %v4737_v14, %v8916_v54  ;;  %v4738_v36 = vpop.f32.mrb[68].mxu0  ;;  %v4825_v1 = vpop.f32.mrb[73].mxu1  ;;  %vm10354_vm4 = vcmp.eq.s32.totalorder %v10321_v49, %v10352_v56 }
 0x228   : > { %4360 = vmatprep.mubr.msk.f32.mxu1 %vm10346_vm3, %v10018_v19  ;;  %v4826_v34 = vadd.f32 %v4825_v1, %v4824_v5  ;;  %v4739_v60 = vpop.f32.mrb[69].mxu0 }
 0x229   : > { %v4740_v54 = vadd.f32 %v4739_v60, %v4738_v36  ;;  %v9153_v61 = vadd.f32 %v4817_v53, %v1963_v33 }
 0x22a   : > { %4325 = vmatmul.mubr.msk.f32.gmra.mrb[174].mxu0 %vm10349_vm7, %v10018_v19  ;;  %vm10356_vm7 = vcmp.eq.s32.totalorder %v10319_v31, %v10355_v57 }
 0x22b   : > { %4361 = vmatmul.mubr.msk.f32.gmra.mrb[178].mxu1 %vm10348_vm6, %v10018_v19  ;;  %4326 = vmatprep.mubr.msk.f32.mxu0 %vm10341_vm8, %v10018_v19  ;;  %v4827_v45 = vpop.f32.mrb[74].mxu1  ;;  %v1970_v47 = vadd.f32 %v4740_v54, %v8925_v4  ;;  %v4741_v46 = vpop.f32.mrb[70].mxu0  ;;  %vm10357_vm8 = vmmov %vm10351_vm11 }
 0x22c   : > { %4362 = vmatprep.mubr.msk.f32.mxu1 %vm342_vm1, %v10018_v19  ;;  %v4828_v8 = vpop.f32.mrb[75].mxu1  ;;  %v4742_v44 = vpop.f32.mrb[71].mxu0 }
 0x22d   : > { %v4829_v42 = vadd.f32 %v4828_v8, %v4827_v45  ;;  %v4743_v4 = vadd.f32 %v4742_v44, %v4741_v46  ;;  %v9172_v17 = vadd.f32 %v4820_v11, %v1970_v47 }
 0x22e   : > { %4327 = vmatmul.mubr.msk.f32.gmra.mrb[176].mxu0 %vm10343_vm0, %v10018_v19  ;;  %vm10362_vm0 = vmmov %vm10356_vm7 }
 0x22f   : > { %4363 = vmatmul.mubr.msk.f32.gmra.mrb[180].mxu1 %vm10351_vm11, %v10018_v19  ;;  %4328 = vmatprep.mubr.msk.f32.mxu0 %vm10346_vm3, %v10018_v19  ;;  %v4830_v37 = vpop.f32.mrb[76].mxu1  ;;  %v1977_v7 = vadd.f32 %v4743_v4, %v8934_v21  ;;  %v4744_v55 = vpop.f32.mrb[72].mxu0  ;;  %vm10360_vm11 = vmmov %vm10354_vm4 }
 0x230   : > { %4364 = vmatprep.mubr.msk.f32.mxu1 %vm10353_vm13, %v10018_v19  ;;  %v4831_v29 = vpop.f32.mrb[77].mxu1  ;;  %v4745_v52 = vpop.f32.mrb[73].mxu0 }
 0x231   : > { %v4832_v58 = vadd.f32 %v4831_v29, %v4830_v37  ;;  %v4746_v21 = vadd.f32 %v4745_v52, %v4744_v55  ;;  %v9191_v40 = vadd.f32 %v4823_v10, %v1977_v7 }
 0x232   : > { %4329 = vmatmul.mubr.msk.f32.gmra.mrb[178].mxu0 %vm10348_vm6, %v10018_v19 }
 0x233   : > { %4365 = vmatmul.mubr.msk.f32.gmra.mrb[182].mxu1 %vm10354_vm4, %v10018_v19  ;;  %4330 = vmatprep.mubr.msk.f32.mxu0 %vm342_vm1, %v10018_v19  ;;  %v4833_v48 = vpop.f32.mrb[78].mxu1  ;;  %v1984_v53 = vadd.f32 %v4746_v21, %v8943_v39  ;;  %v4747_v12 = vpop.f32.mrb[74].mxu0  ;;  %vm10359_vm1 = vmmov %vm10353_vm13 }
 0x234   : > { %4366 = vmatprep.mubr.msk.f32.mxu1 %vm10356_vm7, %v10018_v19  ;;  %v4834_v3 = vpop.f32.mrb[79].mxu1  ;;  %v4748_v32 = vpop.f32.mrb[75].mxu0 }
 0x235   : > { %v4835_v63 = vadd.f32 %v4834_v3, %v4833_v48  ;;  %v4749_v39 = vadd.f32 %v4748_v32, %v4747_v12  ;;  %v9210_v24 = vadd.f32 %v4826_v34, %v1984_v53 }
 0x236   : > { %4331 = vmatmul.mubr.msk.f32.gmra.mrb[180].mxu0 %vm10357_vm8, %v10018_v19 }
 0x237   : > { %4367 = vmatmul.mubr.msk.f32.gmra.mrb[184].mxu1 %vm349_vm2, %v10018_v19  ;;  %4332 = vmatprep.mubr.msk.f32.mxu0 %vm10359_vm1, %v10018_v19  ;;  %v4836_v28 = vpop.f32.mrb[80].mxu1  ;;  %v1991_v11 = vadd.f32 %v4749_v39, %v8952_v6  ;;  %v4750_v25 = vpop.f32.mrb[76].mxu0 }
 0x238   : > { %4368 = vmatprep.mubr.msk.f32.mxu1 %vm354_vm12, %v10018_v19  ;;  %v4837_v9 = vpop.f32.mrb[81].mxu1  ;;  %v4751_v23 = vpop.f32.mrb[77].mxu0 }
 0x239   : > { %v4838_v43 = vadd.f32 %v4837_v9, %v4836_v28  ;;  %v4752_v6 = vadd.f32 %v4751_v23, %v4750_v25  ;;  %v9229_v41 = vadd.f32 %v4829_v42, %v1991_v11 }
 0x23a   : > { %4333 = vmatmul.mubr.msk.f32.gmra.mrb[182].mxu0 %vm10360_vm11, %v10018_v19 }
 0x23b   : > { %4369 = vmatmul.mubr.msk.f32.gmra.mrb[186].mxu1 %vm353_vm10, %v10018_v19  ;;  %4334 = vmatprep.mubr.msk.f32.mxu0 %vm10362_vm0, %v10018_v19  ;;  %v4839_v62 = vpop.f32.mrb[82].mxu1  ;;  %v1998_v10 = vadd.f32 %v4752_v6, %v8961_v38  ;;  %v4753_v35 = vpop.f32.mrb[78].mxu0 }
 0x23c   : > { %4370 = vmatprep.mubr.msk.f32.mxu1 %vm358_vm9, %v10018_v19  ;;  %v4840_v26 = vpop.f32.mrb[83].mxu1  ;;  %v4754_v5 = vpop.f32.mrb[79].mxu0 }
 0x23d   : > { %v4841_v14 = vadd.f32 %v4840_v26, %v4839_v62  ;;  %v4755_v38 = vadd.f32 %v4754_v5, %v4753_v35  ;;  %v9248_v36 = vadd.f32 %v4832_v58, %v1998_v10 }
 0x23e   : > { %4335 = vmatmul.mubr.msk.f32.gmra.mrb[184].mxu0 %vm349_vm2, %v10018_v19 }
 0x23f   : > { %4371 = vmatmul.mubr.msk.f32.gmra.mrb[188].mxu1 %vm357_vm5, %v10018_v19  ;;  %4336 = vmatprep.mubr.msk.f32.mxu0 %vm354_vm12, %v10018_v19  ;;  %v4842_v1 = vpop.f32.mrb[84].mxu1  ;;  %v2005_v34 = vadd.f32 %v4755_v38, %v8972_v20  ;;  %v4756_v60 = vpop.f32.mrb[80].mxu0 }
 0x240   : > { %4372 = vmatprep.mubr.msk.f32.mxu1 %vm362_vm14, %v10018_v19  ;;  %v4843_v13 = vpop.f32.mrb[85].mxu1  ;;  %v4757_v45 = vpop.f32.mrb[81].mxu0 }
 0x241   : > { %v4844_v54 = vadd.f32 %v4843_v13, %v4842_v1  ;;  %v4758_v47 = vadd.f32 %v4757_v45, %v4756_v60  ;;  %v9263_v20 = vadd.f32 %v4835_v63, %v2005_v34 }
 0x242   : > { %4337 = vmatmul.mubr.msk.f32.gmra.mrb[186].mxu0 %vm353_vm10, %v10018_v19 }
 0x243   : > { %4373 = vmatmul.mubr.msk.f32.gmra.mrb[190].mxu1 %vm361_vm15, %v10018_v19  ;;  %4338 = vmatprep.mubr.msk.f32.mxu0 %vm358_vm9, %v10018_v19  ;;  %v4845_v46 = vpop.f32.mrb[86].mxu1  ;;  %v2012_v8 = vadd.f32 %v4758_v47, %v8985_v22  ;;  %v4759_v42 = vpop.f32.mrb[82].mxu0 }
 0x244   : > { %v4846_v44 = vpop.f32.mrb[87].mxu1  ;;  %v4760_v4 = vpop.f32.mrb[83].mxu0 }
 0x245   : > { %v4847_v56 = vadd.f32 %v4846_v44, %v4845_v46  ;;  %v4761_v37 = vadd.f32 %v4760_v4, %v4759_v42  ;;  %v9274_v7 = vadd.f32 %v4838_v43, %v2012_v8 }
 0x246   : > { %4339 = vmatmul.mubr.msk.f32.gmra.mrb[188].mxu0 %vm357_vm5, %v10018_v19 }
 0x247   : > { %4340 = vmatprep.mubr.msk.f32.mxu0 %vm362_vm14, %v10018_v19  ;;  %v4848_v55 = vpop.f32.mrb[88].mxu1  ;;  %v2019_v22 = vadd.f32 %v4761_v37, %v9001_v16  ;;  %v4762_v29 = vpop.f32.mrb[84].mxu0 }
 0x248   : > { %v4849_v58 = vpop.f32.mrb[89].mxu1  ;;  %v4763_v57 = vpop.f32.mrb[85].mxu0 }
 0x249   : > { %v4850_v52 = vadd.f32 %v4849_v58, %v4848_v55  ;;  %v4764_v21 = vadd.f32 %v4763_v57, %v4762_v29  ;;  %v9281_v48 = vadd.f32 %v4841_v14, %v2019_v22 }
 0x24a   : > { %4341 = vmatmul.mubr.msk.f32.gmra.mrb[190].mxu0 %vm361_vm15, %v10018_v19 }
 0x24b   : > { %v4851_v53 = vpop.f32.mrb[90].mxu1  ;;  %v2026_v31 = vadd.f32 %v4764_v21, %v9020_v18  ;;  %v4765_v12 = vpop.f32.mrb[86].mxu0 }
 0x24c   : > { %v4852_v3 = vpop.f32.mrb[91].mxu1  ;;  %v4766_v32 = vpop.f32.mrb[87].mxu0 }
 0x24d   : > { %v4853_v63 = vadd.f32 %v4852_v3, %v4851_v53  ;;  %v4767_v16 = vadd.f32 %v4766_v32, %v4765_v12  ;;  %v9284_v51 = vadd.f32 %v4844_v54, %v2026_v31 }
 0x24f   : > { %v4854_v39 = vpop.f32.mrb[92].mxu1  ;;  %v2033_v28 = vadd.f32 %v4767_v16, %v9039_v0  ;;  %v4768_v11 = vpop.f32.mrb[88].mxu0 }
 0x250   : > { %v4855_v25 = vpop.f32.mrb[93].mxu1  ;;  %v4769_v19 = vpop.f32.mrb[89].mxu0 }
 0x251   : > { %v4856_v49 = vadd.f32 %v4855_v25, %v4854_v39  ;;  %v4770_v9 = vadd.f32 %v4769_v19, %v4768_v11  ;;  %v9287_v43 = vadd.f32 %v4847_v56, %v2033_v28 }
 0x253   : > { %v4857_v23 = vpop.f32.mrb[94].mxu1  ;;  %v2040_v18 = vadd.f32 %v4770_v9, %v9058_v50  ;;  %v4771_v2 = vpop.f32.mrb[90].mxu0 }
 0x254   : > { %v4858_v6 = vpop.f32.mrb[95].mxu1  ;;  %v4772_v10 = vpop.f32.mrb[91].mxu0 }
 0x255   : > { %v4859_v62 = vadd.f32 %v4858_v6, %v4857_v23  ;;  %v4773_v35 = vadd.f32 %v4772_v10, %v4771_v2  ;;  %v9290_v26 = vadd.f32 %v4850_v52, %v2040_v18 }
 0x257   : > { %v4972_v14 = vpop.f32.mrb[96].mxu1  ;;  %v2047_v0 = vadd.f32 %v4773_v35, %v9077_v15  ;;  %v4774_v5 = vpop.f32.mrb[92].mxu0 }
 0x258   : > { %v4973_v33 = vpop.f32.mrb[97].mxu1  ;;  %v4775_v1 = vpop.f32.mrb[93].mxu0 }
 0x259   : > { %v4974_v38 = vadd.f32 %v4973_v33, %v4972_v14  ;;  %v4776_v34 = vadd.f32 %v4775_v1, %v4774_v5  ;;  %v9293_v60 = vadd.f32 %v4853_v63, %v2047_v0 }
 0x25b   : > { %v4975_v13 = vpop.f32.mrb[98].mxu1  ;;  %v2054_v50 = vadd.f32 %v4776_v34, %v9096_v59  ;;  %v4777_v54 = vpop.f32.mrb[94].mxu0 }
 0x25c   : > { %v4976_v45 = vpop.f32.mrb[99].mxu1  ;;  %v4778_v46 = vpop.f32.mrb[95].mxu0 }
 0x25d   : > { %v4977_v47 = vadd.f32 %v4976_v45, %v4975_v13  ;;  %v4779_v8 = vadd.f32 %v4778_v46, %v4777_v54  ;;  %v9296_v42 = vadd.f32 %v4856_v49, %v2054_v50 }
 0x25f   : > { %v4978_v44 = vpop.f32.mrb[100].mxu1  ;;  %v2061_v15 = vadd.f32 %v4779_v8, %v9115_v30  ;;  %v4892_v56 = vpop.f32.mrb[96].mxu0 }
 0x260   : > { %v4979_v4 = vpop.f32.mrb[101].mxu1  ;;  %v4893_v55 = vpop.f32.mrb[97].mxu0 }
 0x261   : > { %v4980_v37 = vadd.f32 %v4979_v4, %v4978_v44  ;;  %v4894_v22 = vadd.f32 %v4893_v55, %v4892_v56  ;;  %v9299_v29 = vadd.f32 %v4859_v62, %v2061_v15 }
 0x263   : > { %v4981_v58 = vpop.f32.mrb[102].mxu1  ;;  %v2382_v59 = vadd.f32 %v4894_v22, %v9134_v27 }
 0x264   : > { %v4895_v52 = vpop.f32.mrb[98].mxu0  ;;  %v4982_v57 = vpop.f32.mrb[103].mxu1 }
 0x265   : > { %v4983_v21 = vadd.f32 %v4982_v57, %v4981_v58  ;;  %v4896_v53 = vpop.f32.mrb[99].mxu0  ;;  %v9302_v12 = vadd.f32 %v4974_v38, %v2382_v59 }
 0x266   : > { %v4897_v31 = vadd.f32 %v4896_v53, %v4895_v52 }
 0x267   : > { %v4984_v3 = vpop.f32.mrb[104].mxu1 }
 0x268   : > { %v2397_v30 = vadd.f32 %v4897_v31, %v9153_v61  ;;  %v4898_v63 = vpop.f32.mrb[100].mxu0  ;;  %v4985_v32 = vpop.f32.mrb[105].mxu1 }
 0x269   : > { %v4986_v16 = vadd.f32 %v4985_v32, %v4984_v3  ;;  %v4899_v39 = vpop.f32.mrb[101].mxu0 }
 0x26a   : > { %v4900_v28 = vadd.f32 %v4899_v39, %v4898_v63  ;;  %v9305_v11 = vadd.f32 %v4977_v47, %v2397_v30 }
 0x26b   : > { %v4987_v25 = vpop.f32.mrb[106].mxu1 }
 0x26c   : > { %v2412_v27 = vadd.f32 %v4900_v28, %v9172_v17  ;;  %v4901_v49 = vpop.f32.mrb[102].mxu0  ;;  %v4988_v19 = vpop.f32.mrb[107].mxu1 }
 0x26d   : > { %v4989_v9 = vadd.f32 %v4988_v19, %v4987_v25  ;;  %v4902_v23 = vpop.f32.mrb[103].mxu0 }
 0x26e   : > { %v4903_v18 = vadd.f32 %v4902_v23, %v4901_v49  ;;  %v9308_v2 = vadd.f32 %v4980_v37, %v2412_v27 }
 0x26f   : > { %v4990_v6 = vpop.f32.mrb[108].mxu1 }
 0x270   : > { %v2427_v61 = vadd.f32 %v4903_v18, %v9191_v40  ;;  %v4904_v62 = vpop.f32.mrb[104].mxu0  ;;  %v4991_v10 = vpop.f32.mrb[109].mxu1 }
 0x271   : > { %v4992_v35 = vadd.f32 %v4991_v10, %v4990_v6  ;;  %v4905_v14 = vpop.f32.mrb[105].mxu0 }
 0x272   : > { %v4906_v0 = vadd.f32 %v4905_v14, %v4904_v62  ;;  %v9311_v5 = vadd.f32 %v4983_v21, %v2427_v61 }
 0x273   : > { %v4993_v33 = vpop.f32.mrb[110].mxu1 }
 0x274   : > { %v2442_v17 = vadd.f32 %v4906_v0, %v9210_v24  ;;  %v4907_v38 = vpop.f32.mrb[106].mxu0  ;;  %v4994_v1 = vpop.f32.mrb[111].mxu1 }
 0x275   : > { %v4995_v34 = vadd.f32 %v4994_v1, %v4993_v33  ;;  %v4908_v13 = vpop.f32.mrb[107].mxu0 }
 0x276   : > { %v4909_v50 = vadd.f32 %v4908_v13, %v4907_v38  ;;  %v9314_v54 = vadd.f32 %v4986_v16, %v2442_v17 }
 0x277   : > { %v4996_v45 = vpop.f32.mrb[112].mxu1 }
 0x278   : > { %v2457_v40 = vadd.f32 %v4909_v50, %v9229_v41  ;;  %v4997_v46 = vpop.f32.mrb[113].mxu1 }
 0x279   : > { %v4910_v47 = vpop.f32.mrb[108].mxu0  ;;  %v4998_v8 = vadd.f32 %v4997_v46, %v4996_v45 }
 0x27a   : > { %v4911_v44 = vpop.f32.mrb[109].mxu0  ;;  %v9317_v56 = vadd.f32 %v4989_v9, %v2457_v40 }
 0x27b   : > { %v4912_v15 = vadd.f32 %v4911_v44, %v4910_v47  ;;  %v4999_v4 = vpop.f32.mrb[114].mxu1 }
 0x27c   : > { %v5000_v55 = vpop.f32.mrb[115].mxu1 }
 0x27d   : > { %v2472_v24 = vadd.f32 %v4912_v15, %v9248_v36  ;;  %v4913_v37 = vpop.f32.mrb[110].mxu0  ;;  %v5001_v22 = vadd.f32 %v5000_v55, %v4999_v4 }
 0x27e   : > { %v4914_v58 = vpop.f32.mrb[111].mxu0 }
 0x27f   : > { %v4915_v59 = vadd.f32 %v4914_v58, %v4913_v37  ;;  %v9320_v52 = vadd.f32 %v4992_v35, %v2472_v24  ;;  %v5002_v57 = vpop.f32.mrb[116].mxu1 }
 0x280   : > { %v5003_v53 = vpop.f32.mrb[117].mxu1 }
 0x281   : > { %v2487_v41 = vadd.f32 %v4915_v59, %v9263_v20  ;;  %v4916_v21 = vpop.f32.mrb[112].mxu0  ;;  %v5004_v31 = vadd.f32 %v5003_v53, %v5002_v57 }
 0x282   : > { %v4917_v3 = vpop.f32.mrb[113].mxu0 }
 0x283   : > { %v4918_v30 = vadd.f32 %v4917_v3, %v4916_v21  ;;  %v9323_v63 = vadd.f32 %v4995_v34, %v2487_v41  ;;  %v5005_v32 = vpop.f32.mrb[118].mxu1 }
 0x284   : > { %v5006_v39 = vpop.f32.mrb[119].mxu1 }
 0x285   : > { %v2502_v36 = vadd.f32 %v4918_v30, %v9274_v7  ;;  %v4919_v16 = vpop.f32.mrb[114].mxu0  ;;  %v5007_v28 = vadd.f32 %v5006_v39, %v5005_v32 }
 0x286   : > { %v4920_v25 = vpop.f32.mrb[115].mxu0 }
 0x287   : > { %v4921_v27 = vadd.f32 %v4920_v25, %v4919_v16  ;;  %v9326_v49 = vadd.f32 %v4998_v8, %v2502_v36  ;;  %v5008_v19 = vpop.f32.mrb[120].mxu1 }
 0x288   : > { %v5009_v23 = vpop.f32.mrb[121].mxu1 }
 0x289   : > { %v2517_v20 = vadd.f32 %v4921_v27, %v9281_v48  ;;  %v4922_v9 = vpop.f32.mrb[116].mxu0  ;;  %v5010_v18 = vadd.f32 %v5009_v23, %v5008_v19 }
 0x28a   : > { %v4923_v6 = vpop.f32.mrb[117].mxu0 }
 0x28b   : > { %v4924_v61 = vadd.f32 %v4923_v6, %v4922_v9  ;;  %v9329_v62 = vadd.f32 %v5001_v22, %v2517_v20  ;;  %v5011_v10 = vpop.f32.mrb[122].mxu1 }
 0x28c   : > { %v5012_v14 = vpop.f32.mrb[123].mxu1 }
 0x28d   : > { %v2532_v7 = vadd.f32 %v4924_v61, %v9284_v51  ;;  %v4925_v35 = vpop.f32.mrb[118].mxu0  ;;  %v5013_v0 = vadd.f32 %v5012_v14, %v5011_v10 }
 0x28e   : > { %v4926_v33 = vpop.f32.mrb[119].mxu0 }
 0x28f   : > { %v4927_v17 = vadd.f32 %v4926_v33, %v4925_v35  ;;  %v9332_v38 = vadd.f32 %v5004_v31, %v2532_v7  ;;  %v5014_v1 = vpop.f32.mrb[124].mxu1 }
 0x290   : > { %v5015_v13 = vpop.f32.mrb[125].mxu1 }
 0x291   : > { %v2547_v48 = vadd.f32 %v4927_v17, %v9287_v43  ;;  %v4928_v34 = vpop.f32.mrb[120].mxu0  ;;  %v5016_v50 = vadd.f32 %v5015_v13, %v5014_v1 }
 0x292   : > { %v4929_v45 = vpop.f32.mrb[121].mxu0 }
 0x293   : > { %v4930_v40 = vadd.f32 %v4929_v45, %v4928_v34  ;;  %v9335_v47 = vadd.f32 %v5007_v28, %v2547_v48  ;;  %v5017_v46 = vpop.f32.mrb[126].mxu1 }
 0x294   : > { %v5018_v44 = vpop.f32.mrb[127].mxu1 }
 0x295   : > { %v2562_v51 = vadd.f32 %v4930_v40, %v9290_v26  ;;  %v4931_v8 = vpop.f32.mrb[122].mxu0  ;;  %v5019_v15 = vadd.f32 %v5018_v44, %v5017_v46 }
 0x296   : > { %v4932_v4 = vpop.f32.mrb[123].mxu0 }
 0x297   : > { %v4933_v24 = vadd.f32 %v4932_v4, %v4931_v8  ;;  %v9338_v37 = vadd.f32 %v5010_v18, %v2562_v51  ;;  %v5132_v55 = vpop.f32.mrb[128].mxu1 }
 0x298   : > { %v5133_v58 = vpop.f32.mrb[129].mxu1 }
 0x299   : > { %v2577_v43 = vadd.f32 %v4933_v24, %v9293_v60  ;;  %v4934_v22 = vpop.f32.mrb[124].mxu0  ;;  %v5134_v59 = vadd.f32 %v5133_v58, %v5132_v55 }
 0x29a   : > { %v4935_v57 = vpop.f32.mrb[125].mxu0 }
 0x29b   : > { %v4936_v41 = vadd.f32 %v4935_v57, %v4934_v22  ;;  %v9341_v21 = vadd.f32 %v5013_v0, %v2577_v43  ;;  %v5135_v53 = vpop.f32.mrb[130].mxu1 }
 0x29c   : > { %v5136_v3 = vpop.f32.mrb[131].mxu1 }
 0x29d   : > { %v2592_v26 = vadd.f32 %v4936_v41, %v9296_v42  ;;  %v4937_v31 = vpop.f32.mrb[126].mxu0  ;;  %v5137_v30 = vadd.f32 %v5136_v3, %v5135_v53 }
 0x29e   : > { %v4938_v32 = vpop.f32.mrb[127].mxu0 }
 0x29f   : > { %v4939_v36 = vadd.f32 %v4938_v32, %v4937_v31  ;;  %v9344_v16 = vadd.f32 %v5016_v50, %v2592_v26  ;;  %v5138_v39 = vpop.f32.mrb[132].mxu1 }
 0x2a0   : > { %v5139_v25 = vpop.f32.mrb[133].mxu1 }
 0x2a1   : > { %v2607_v60 = vadd.f32 %v4939_v36, %v9299_v29  ;;  %v5052_v28 = vpop.f32.mrb[128].mxu0  ;;  %v5140_v27 = vadd.f32 %v5139_v25, %v5138_v39 }
 0x2a2   : > { %v5053_v19 = vpop.f32.mrb[129].mxu0 }
 0x2a3   : > { %v5054_v20 = vadd.f32 %v5053_v19, %v5052_v28  ;;  %v9347_v9 = vadd.f32 %v5019_v15, %v2607_v60 }
 0x2a5   : > { %v5141_v23 = vpop.f32.mrb[134].mxu1  ;;  %v3082_v42 = vadd.f32 %v5054_v20, %v9302_v12  ;;  %v5055_v18 = vpop.f32.mrb[130].mxu0 }
 0x2a6   : > { %v5142_v6 = vpop.f32.mrb[135].mxu1  ;;  %v5056_v10 = vpop.f32.mrb[131].mxu0 }
 0x2a7   : > { %v5143_v61 = vadd.f32 %v5142_v6, %v5141_v23  ;;  %v5057_v7 = vadd.f32 %v5056_v10, %v5055_v18  ;;  %v9350_v35 = vadd.f32 %v5134_v59, %v3082_v42 }
 0x2a9   : > { %v3091_v29 = vadd.f32 %v5057_v7, %v9305_v11  ;;  %v5058_v0 = vpop.f32.mrb[132].mxu0 }
 0x2aa   : > { %v5144_v14 = vpop.f32.mrb[136].mxu1  ;;  %v5059_v1 = vpop.f32.mrb[133].mxu0 }
 0x2ab   : > { %v5145_v33 = vpop.f32.mrb[137].mxu1  ;;  %v5060_v48 = vadd.f32 %v5059_v1, %v5058_v0  ;;  %v9353_v34 = vadd.f32 %v5137_v30, %v3091_v29 }
 0x2ac   : > { %v5146_v17 = vadd.f32 %v5145_v33, %v5144_v14 }
 0x2ad   : > { %v3100_v12 = vadd.f32 %v5060_v48, %v9308_v2  ;;  %v5061_v50 = vpop.f32.mrb[134].mxu0 }
 0x2ae   : > { %v5147_v13 = vpop.f32.mrb[138].mxu1  ;;  %v5062_v46 = vpop.f32.mrb[135].mxu0 }
 0x2af   : > { %v5148_v45 = vpop.f32.mrb[139].mxu1  ;;  %v5063_v51 = vadd.f32 %v5062_v46, %v5061_v50  ;;  %v9356_v8 = vadd.f32 %v5140_v27, %v3100_v12 }
 0x2b0   : > { %v5149_v40 = vadd.f32 %v5148_v45, %v5147_v13 }
 0x2b1   : > { %v3109_v11 = vadd.f32 %v5063_v51, %v9311_v5  ;;  %v5064_v15 = vpop.f32.mrb[136].mxu0 }
 0x2b2   : > { %v5150_v44 = vpop.f32.mrb[140].mxu1  ;;  %v5065_v55 = vpop.f32.mrb[137].mxu0 }
 0x2b3   : > { %v5151_v4 = vpop.f32.mrb[141].mxu1  ;;  %v5066_v43 = vadd.f32 %v5065_v55, %v5064_v15  ;;  %v9359_v22 = vadd.f32 %v5143_v61, %v3109_v11 }
 0x2b4   : > { %v5152_v24 = vadd.f32 %v5151_v4, %v5150_v44 }
 0x2b5   : > { %v3118_v2 = vadd.f32 %v5066_v43, %v9314_v54  ;;  %v5067_v59 = vpop.f32.mrb[138].mxu0 }
 0x2b6   : > { %v5153_v58 = vpop.f32.mrb[142].mxu1  ;;  %v5068_v53 = vpop.f32.mrb[139].mxu0 }
 0x2b7   : > { %v5154_v57 = vpop.f32.mrb[143].mxu1  ;;  %v5069_v26 = vadd.f32 %v5068_v53, %v5067_v59  ;;  %v9362_v31 = vadd.f32 %v5146_v17, %v3118_v2 }
 0x2b8   : > { %v5155_v41 = vadd.f32 %v5154_v57, %v5153_v58 }
 0x2b9   : > { %v3127_v5 = vadd.f32 %v5069_v26, %v9317_v56  ;;  %v5070_v30 = vpop.f32.mrb[140].mxu0 }
 0x2ba   : > { %v5156_v3 = vpop.f32.mrb[144].mxu1  ;;  %v5071_v39 = vpop.f32.mrb[141].mxu0 }
 0x2bb   : > { %v5157_v32 = vpop.f32.mrb[145].mxu1  ;;  %v5072_v60 = vadd.f32 %v5071_v39, %v5070_v30  ;;  %v9365_v28 = vadd.f32 %v5149_v40, %v3127_v5 }
 0x2bc   : > { %v5158_v36 = vadd.f32 %v5157_v32, %v5156_v3 }
 0x2bd   : > { %v3136_v54 = vadd.f32 %v5072_v60, %v9320_v52  ;;  %v5073_v27 = vpop.f32.mrb[142].mxu0 }
 0x2be   : > { %v5159_v25 = vpop.f32.mrb[146].mxu1  ;;  %v5074_v23 = vpop.f32.mrb[143].mxu0 }
 0x2bf   : > { %v5160_v19 = vpop.f32.mrb[147].mxu1  ;;  %v5075_v42 = vadd.f32 %v5074_v23, %v5073_v27  ;;  %v9368_v18 = vadd.f32 %v5152_v24, %v3136_v54 }
 0x2c0   : > { %v5161_v20 = vadd.f32 %v5160_v19, %v5159_v25 }
 0x2c1   : > { %v3145_v56 = vadd.f32 %v5075_v42, %v9323_v63  ;;  %v5076_v61 = vpop.f32.mrb[144].mxu0 }
 0x2c2   : > { %v5162_v6 = vpop.f32.mrb[148].mxu1  ;;  %v5077_v14 = vpop.f32.mrb[145].mxu0 }
 0x2c3   : > { %v5163_v10 = vpop.f32.mrb[149].mxu1  ;;  %v5078_v29 = vadd.f32 %v5077_v14, %v5076_v61  ;;  %v9371_v0 = vadd.f32 %v5155_v41, %v3145_v56 }
 0x2c4   : > { %v5164_v7 = vadd.f32 %v5163_v10, %v5162_v6 }
 0x2c5   : > { %v3154_v52 = vadd.f32 %v5078_v29, %v9326_v49  ;;  %v5079_v17 = vpop.f32.mrb[146].mxu0 }
 0x2c6   : > { %v5165_v33 = vpop.f32.mrb[150].mxu1  ;;  %v5080_v13 = vpop.f32.mrb[147].mxu0 }
 0x2c7   : > { %v5166_v1 = vpop.f32.mrb[151].mxu1  ;;  %v5081_v12 = vadd.f32 %v5080_v13, %v5079_v17  ;;  %v9374_v50 = vadd.f32 %v5158_v36, %v3154_v52 }
 0x2c8   : > { %v5167_v48 = vadd.f32 %v5166_v1, %v5165_v33 }
 0x2c9   : > { %v3163_v63 = vadd.f32 %v5081_v12, %v9329_v62  ;;  %v5082_v40 = vpop.f32.mrb[148].mxu0 }
 0x2ca   : > { %v5168_v45 = vpop.f32.mrb[152].mxu1  ;;  %v5083_v44 = vpop.f32.mrb[149].mxu0 }
 0x2cb   : > { %v5169_v46 = vpop.f32.mrb[153].mxu1  ;;  %v5084_v11 = vadd.f32 %v5083_v44, %v5082_v40  ;;  %v9377_v15 = vadd.f32 %v5161_v20, %v3163_v63 }
 0x2cc   : > { %v5170_v51 = vadd.f32 %v5169_v46, %v5168_v45 }
 0x2cd   : > { %v3172_v49 = vadd.f32 %v5084_v11, %v9332_v38  ;;  %v5085_v24 = vpop.f32.mrb[150].mxu0 }
 0x2ce   : > { %v5171_v4 = vpop.f32.mrb[154].mxu1  ;;  %v5086_v58 = vpop.f32.mrb[151].mxu0 }
 0x2cf   : > { %v5172_v55 = vpop.f32.mrb[155].mxu1  ;;  %v5087_v2 = vadd.f32 %v5086_v58, %v5085_v24  ;;  %v9380_v59 = vadd.f32 %v5164_v7, %v3172_v49 }
 0x2d0   : > { %v5173_v43 = vadd.f32 %v5172_v55, %v5171_v4 }
 0x2d1   : > { %v3181_v62 = vadd.f32 %v5087_v2, %v9335_v47  ;;  %v5088_v41 = vpop.f32.mrb[152].mxu0 }
 0x2d2   : > { %v5174_v57 = vpop.f32.mrb[156].mxu1  ;;  %v5089_v3 = vpop.f32.mrb[153].mxu0 }
 0x2d3   : > { %v5175_v53 = vpop.f32.mrb[157].mxu1  ;;  %v5090_v5 = vadd.f32 %v5089_v3, %v5088_v41  ;;  %v9383_v30 = vadd.f32 %v5167_v48, %v3181_v62 }
 0x2d4   : > { %v5176_v26 = vadd.f32 %v5175_v53, %v5174_v57 }
 0x2d5   : > { %v3190_v38 = vadd.f32 %v5090_v5, %v9338_v37  ;;  %v5091_v36 = vpop.f32.mrb[154].mxu0 }
 0x2d6   : > { %v5177_v32 = vpop.f32.mrb[158].mxu1  ;;  %v5092_v25 = vpop.f32.mrb[155].mxu0 }
 0x2d7   : > { %v5178_v39 = vpop.f32.mrb[159].mxu1  ;;  %v5093_v54 = vadd.f32 %v5092_v25, %v5091_v36  ;;  %v9386_v27 = vadd.f32 %v5170_v51, %v3190_v38 }
 0x2d8   : > { %v5179_v60 = vadd.f32 %v5178_v39, %v5177_v32 }
 0x2d9   : > { %v3199_v47 = vadd.f32 %v5093_v54, %v9341_v21  ;;  %v5094_v20 = vpop.f32.mrb[156].mxu0 }
 0x2da   : > { %v5292_v19 = vpop.f32.mrb[160].mxu1  ;;  %v5095_v6 = vpop.f32.mrb[157].mxu0 }
 0x2db   : > { %v5293_v23 = vpop.f32.mrb[161].mxu1  ;;  %v5096_v56 = vadd.f32 %v5095_v6, %v5094_v20  ;;  %v9389_v61 = vadd.f32 %v5173_v43, %v3199_v47 }
 0x2dc   : > { %v5294_v42 = vadd.f32 %v5293_v23, %v5292_v19 }
 0x2dd   : > { %v3208_v10 = vadd.f32 %v5096_v56, %v9344_v16  ;;  %v5097_v7 = vpop.f32.mrb[158].mxu0 }
 0x2de   : > { %v5295_v37 = vpop.f32.mrb[162].mxu1  ;;  %v5098_v33 = vpop.f32.mrb[159].mxu0 }
 0x2df   : > { %v5296_v14 = vpop.f32.mrb[163].mxu1  ;;  %v5099_v52 = vadd.f32 %v5098_v33, %v5097_v7  ;;  %v9392_v17 = vadd.f32 %v5176_v26, %v3208_v10 }
 0x2e0   : > { %v5297_v29 = vadd.f32 %v5296_v14, %v5295_v37 }
 0x2e1   : > { %v3217_v1 = vadd.f32 %v5099_v52, %v9347_v9  ;;  %v5212_v48 = vpop.f32.mrb[160].mxu0 }
 0x2e2   : > { %v5298_v21 = vpop.f32.mrb[164].mxu1  ;;  %v5213_v45 = vpop.f32.mrb[161].mxu0 }
 0x2e3   : > { %v5299_v13 = vpop.f32.mrb[165].mxu1  ;;  %v5214_v63 = vadd.f32 %v5213_v45, %v5212_v48  ;;  %v9398_v40 = vadd.f32 %v5179_v60, %v3217_v1 }
 0x2e4   : > { %v5300_v12 = vadd.f32 %v5299_v13, %v5298_v21 }
 0x2e5   : > { %v3658_v46 = vadd.f32 %v5214_v63, %v9350_v35  ;;  %v5215_v51 = vpop.f32.mrb[162].mxu0 }
 0x2e6   : > { %v5301_v16 = vpop.f32.mrb[166].mxu1  ;;  %v5216_v4 = vpop.f32.mrb[163].mxu0 }
 0x2e7   : > { %v5302_v44 = vpop.f32.mrb[167].mxu1  ;;  %v3867_v49 = vadd.f32 %v5294_v42, %v3658_v46  ;;  %v5217_v24 = vadd.f32 %v5216_v4, %v5215_v51 }
 0x2e8   : > { %v5303_v11 = vadd.f32 %v5302_v44, %v5301_v16 }
 0x2e9   : > { %3975 = vst [vmem:[%s9401_s26] sm:$0xff] %v3867_v49  ;;  %v3665_v9 = vadd.f32 %v5217_v24, %v9353_v34  ;;  %v5218_v43 = vpop.f32.mrb[164].mxu0 }
 0x2ea   : > { %v5304_v55 = vpop.f32.mrb[168].mxu1  ;;  %v5219_v57 = vpop.f32.mrb[165].mxu0 }
 0x2eb   : > { %v5305_v58 = vpop.f32.mrb[169].mxu1  ;;  %v3874_v35 = vadd.f32 %v5297_v29, %v3665_v9  ;;  %v5220_v62 = vadd.f32 %v5219_v57, %v5218_v43 }
 0x2ec   : > { %v5306_v2 = vadd.f32 %v5305_v58, %v5304_v55 }
 0x2ed   : > { %3976 = vst [vmem:[%s9401_s26 + $0x8] sm:$0xff] %v3874_v35  ;;  %v3672_v53 = vadd.f32 %v5220_v62, %v9356_v8  ;;  %v5221_v26 = vpop.f32.mrb[166].mxu0 }
 0x2ee   : > { %v5307_v41 = vpop.f32.mrb[170].mxu1  ;;  %v5222_v32 = vpop.f32.mrb[167].mxu0 }
 0x2ef   : > { %v5308_v3 = vpop.f32.mrb[171].mxu1  ;;  %v3881_v38 = vadd.f32 %v5300_v12, %v3672_v53  ;;  %v5223_v36 = vadd.f32 %v5222_v32, %v5221_v26 }
 0x2f0   : > { %v5309_v5 = vadd.f32 %v5308_v3, %v5307_v41 }
 0x2f1   : > { %3977 = vst [vmem:[%s9401_s26 + $0x10] sm:$0xff] %v3881_v38  ;;  %v3679_v34 = vadd.f32 %v5223_v36, %v9359_v22  ;;  %v5224_v60 = vpop.f32.mrb[168].mxu0 }
 0x2f2   : > { %v5310_v39 = vpop.f32.mrb[172].mxu1  ;;  %v5225_v19 = vpop.f32.mrb[169].mxu0 }
 0x2f3   : > { %v5311_v25 = vpop.f32.mrb[173].mxu1  ;;  %v3888_v47 = vadd.f32 %v5303_v11, %v3679_v34  ;;  %v5226_v20 = vadd.f32 %v5225_v19, %v5224_v60 }
 0x2f4   : > { %v5312_v54 = vadd.f32 %v5311_v25, %v5310_v39 }
 0x2f5   : > { %3978 = vst [vmem:[%s9401_s26 + $0x18] sm:$0xff] %v3888_v47  ;;  %v3686_v8 = vadd.f32 %v5226_v20, %v9362_v31  ;;  %v5227_v42 = vpop.f32.mrb[170].mxu0 }
 0x2f6   : > { %v5313_v23 = vpop.f32.mrb[174].mxu1  ;;  %v5228_v37 = vpop.f32.mrb[171].mxu0 }
 0x2f7   : > { %v5314_v6 = vpop.f32.mrb[175].mxu1  ;;  %v3895_v10 = vadd.f32 %v5306_v2, %v3686_v8  ;;  %v5229_v7 = vadd.f32 %v5228_v37, %v5227_v42 }
 0x2f8   : > { %v5315_v56 = vadd.f32 %v5314_v6, %v5313_v23 }
 0x2f9   : > { %3979 = vst [vmem:[%s9401_s26 + $0x20] sm:$0xff] %v3895_v10  ;;  %v3693_v22 = vadd.f32 %v5229_v7, %v9365_v28  ;;  %v5230_v29 = vpop.f32.mrb[172].mxu0 }
 0x2fa   : > { %v5316_v14 = vpop.f32.mrb[176].mxu1  ;;  %v5231_v21 = vpop.f32.mrb[173].mxu0 }
 0x2fb   : > { %v5317_v33 = vpop.f32.mrb[177].mxu1  ;;  %v3902_v1 = vadd.f32 %v5309_v5, %v3693_v22  ;;  %v5232_v48 = vadd.f32 %v5231_v21, %v5230_v29 }
 0x2fc   : > { %v5318_v52 = vadd.f32 %v5317_v33, %v5316_v14 }
 0x2fd   : > { %3980 = vst [vmem:[%s9401_s26 + $0x28] sm:$0xff] %v3902_v1  ;;  %v3700_v31 = vadd.f32 %v5232_v48, %v9368_v18  ;;  %v5233_v12 = vpop.f32.mrb[174].mxu0 }
 0x2fe   : > { %v5319_v13 = vpop.f32.mrb[178].mxu1  ;;  %v5234_v16 = vpop.f32.mrb[175].mxu0 }
 0x2ff   : > { %v5320_v45 = vpop.f32.mrb[179].mxu1  ;;  %v3909_v46 = vadd.f32 %v5312_v54, %v3700_v31  ;;  %v5235_v51 = vadd.f32 %v5234_v16, %v5233_v12 }
 0x300   : > { %v5321_v63 = vadd.f32 %v5320_v45, %v5319_v13 }
 0x301   : > { %3981 = vst [vmem:[%s9401_s26 + $0x30] sm:$0xff] %v3909_v46  ;;  %v3707_v28 = vadd.f32 %v5235_v51, %v9371_v0  ;;  %v5236_v11 = vpop.f32.mrb[176].mxu0 }
 0x302   : > { %v5322_v44 = vpop.f32.mrb[180].mxu1  ;;  %v5237_v24 = vpop.f32.mrb[177].mxu0 }
 0x303   : > { %v5323_v4 = vpop.f32.mrb[181].mxu1  ;;  %v3916_v55 = vadd.f32 %v5315_v56, %v3707_v28  ;;  %v5238_v9 = vadd.f32 %v5237_v24, %v5236_v11 }
 0x304   : > { %v5324_v49 = vadd.f32 %v5323_v4, %v5322_v44 }
 0x305   : > { %3982 = vst [vmem:[%s9401_s26 + $0x38] sm:$0xff] %v3916_v55  ;;  %v3714_v18 = vadd.f32 %v5238_v9, %v9374_v50  ;;  %v5239_v58 = vpop.f32.mrb[178].mxu0 }
 0x306   : > { %v5325_v43 = vpop.f32.mrb[182].mxu1  ;;  %v5240_v35 = vpop.f32.mrb[179].mxu0 }
 0x307   : > { %v5326_v2 = vpop.f32.mrb[183].mxu1  ;;  %v3923_v62 = vadd.f32 %v5318_v52, %v3714_v18  ;;  %v5241_v41 = vadd.f32 %v5240_v35, %v5239_v58 }
 0x308   : > { %v5327_v57 = vadd.f32 %v5326_v2, %v5325_v43 }
 0x309   : > { %3983 = vst [vmem:[%s9401_s26 + $0x40] sm:$0xff] %v3923_v62  ;;  %v3721_v0 = vadd.f32 %v5241_v41, %v9377_v15  ;;  %v5242_v26 = vpop.f32.mrb[180].mxu0 }
 0x30a   : > { %v5328_v53 = vpop.f32.mrb[184].mxu1  ;;  %v5243_v32 = vpop.f32.mrb[181].mxu0 }
 0x30b   : > { %v5329_v3 = vpop.f32.mrb[185].mxu1  ;;  %v3930_v38 = vadd.f32 %v5321_v63, %v3721_v0  ;;  %v5244_v36 = vadd.f32 %v5243_v32, %v5242_v26 }
 0x30c   : > { %v5330_v5 = vadd.f32 %v5329_v3, %v5328_v53 }
 0x30d   : > { %3984 = vst [vmem:[%s9401_s26 + $0x48] sm:$0xff] %v3930_v38  ;;  %v3728_v50 = vadd.f32 %v5244_v36, %v9380_v59  ;;  %v5245_v34 = vpop.f32.mrb[182].mxu0 }
 0x30e   : > { %v5331_v39 = vpop.f32.mrb[186].mxu1  ;;  %v5246_v54 = vpop.f32.mrb[183].mxu0 }
 0x30f   : > { %v5332_v60 = vpop.f32.mrb[187].mxu1  ;;  %v3937_v19 = vadd.f32 %v5324_v49, %v3728_v50  ;;  %v5247_v47 = vadd.f32 %v5246_v54, %v5245_v34 }
 0x310   : > { %v5333_v25 = vadd.f32 %v5332_v60, %v5331_v39 }
 0x311   : > { %3985 = vst [vmem:[%s9401_s26 + $0x50] sm:$0xff] %v3937_v19  ;;  %v3735_v15 = vadd.f32 %v5247_v47, %v9383_v30  ;;  %v5248_v23 = vpop.f32.mrb[184].mxu0 }
 0x312   : > { %v5334_v20 = vpop.f32.mrb[188].mxu1  ;;  %v5249_v6 = vpop.f32.mrb[185].mxu0 }
 0x313   : > { %v5335_v8 = vpop.f32.mrb[189].mxu1  ;;  %v3944_v56 = vadd.f32 %v5327_v57, %v3735_v15  ;;  %v5250_v37 = vadd.f32 %v5249_v6, %v5248_v23 }
 0x314   : > { %v5336_v42 = vadd.f32 %v5335_v8, %v5334_v20 }
 0x315   : > { %3986 = vst [vmem:[%s9401_s26 + $0x58] sm:$0xff] %v3944_v56  ;;  %v3742_v10 = vadd.f32 %v5250_v37, %v9386_v27  ;;  %v5251_v7 = vpop.f32.mrb[186].mxu0 }
 0x316   : > { %v5337_v59 = vpop.f32.mrb[190].mxu1  ;;  %v5252_v29 = vpop.f32.mrb[187].mxu0 }
 0x317   : > { %v5338_v14 = vpop.f32.mrb[191].mxu1  ;;  %v3951_v33 = vadd.f32 %v5330_v5, %v3742_v10  ;;  %v5253_v30 = vadd.f32 %v5252_v29, %v5251_v7 }
 0x318   : > { %v5339_v22 = vadd.f32 %v5338_v14, %v5337_v59 }
 0x319   : > { %3987 = vst [vmem:[%s9401_s26 + $0x60] sm:$0xff] %v3951_v33  ;;  %v3749_v52 = vadd.f32 %v5253_v30, %v9389_v61  ;;  %v5254_v21 = vpop.f32.mrb[188].mxu0 }
 0x31a   : > { %v5255_v1 = vpop.f32.mrb[189].mxu0 }
 0x31b   : > { %v3958_v48 = vadd.f32 %v5333_v25, %v3749_v52  ;;  %v5256_v13 = vadd.f32 %v5255_v1, %v5254_v21 }
 0x31d   : > { %3988 = vst [vmem:[%s9401_s26 + $0x68] sm:$0xff] %v3958_v48  ;;  %v3756_v27 = vadd.f32 %v5256_v13, %v9392_v17  ;;  %v5257_v31 = vpop.f32.mrb[190].mxu0 }
 0x31e   : > { %v5258_v12 = vpop.f32.mrb[191].mxu0 }
 0x31f   : > { %v3965_v45 = vadd.f32 %v5336_v42, %v3756_v27  ;;  %v5259_v63 = vadd.f32 %v5258_v12, %v5257_v31 }
 0x321   : > { %3989 = vst [vmem:[%s9401_s26 + $0x70] sm:$0xff] %v3965_v45  ;;  %v3763_v16 = vadd.f32 %v5259_v63, %v9398_v40 }
 0x323   : > { %v3972_v61 = vadd.f32 %v5339_v22, %v3763_v16 }
 0x325   : > { %3990 = vst [vmem:[%s9401_s26 + $0x78] sm:$0xff] %v3972_v61 }
 0x326   : > { %5840 = shalt.err (!%p5837_p6)
}
 0x327   : > { %s5841_s21 = scalar_lea.hbm %s9438_s9, 2048  ;;  %s5845_s30 = scalar_lea.hbm %s9494_s3, 4096 }
 0x328   : > { %p5842_p7 = scmp.ne.s32.totalorder %s9438_s9, %s5841_s21  ;;  %p5846_p0 = scmp.lt.u32.totalorder %s9438_s9, %s9494_s3 }
 0x329   : > { %p5847_p2 = scmp.lt.u32.totalorder %s5845_s30, %s5841_s21  ;;  %p5849_p8 = scmp.lt.u32.totalorder %s5841_s21, %s9438_s9 }
 0x32a   : > { %p5843_p9 = pnand %p5842_p7, %p10364_p10 }
 0x32b   : > { %p5848_p4 = por %p5847_p2, %p5846_p0 }
 0x32c   : > { %p5844_p12 = pneg %p5843_p9 }
 0x32d   : > { %p5850_p11 = por %p5849_p8, %p5848_p4 }
 0x32f   : > { %p5851_p13 = pnand %p5850_p11, %p5844_p12 }
 0x331   : > { %5854 = shalt.err (!%p5851_p13)
}
 0x332   : > { %s5918_s29 = smov 128   ;;  %s5919_s26 = smov 8  }
 0x333   : > { %5728 = dma.vmem_to_hbm [thread:$0]  (%p10364_p10), %s9440_s6, 2048, %s9438_s9, %s9445_s10, %s5918_s29, %s5918_s29, %s5919_s26  }
 0x334 PF: > { %p5740_p1 = scmp.ge.s32.totalorder %s5909_s17, 2  ;;  %s4022_s27 = sand.u32 1, %s5889_s12  }
 0x335   : > { %p10365_p3 = scmp.ne.s32.totalorder %s9819_s24, 0  ;;  %s4023_s7 = scalar_lea.sflag [#allocation4], %s4022_s27 }
 0x337   : > { %p5735_p5 = pnand %p5740_p1, %p10365_p3 }
 0x339   : > { %5884 = dma.done.wait (!%p5735_p5), %s4023_s7, 2048  }
 0x33a   : > { %5886 = vsyncadd (!%p5735_p5), %s4023_s7, 4294965248  ;;  %s17_s17 = sadd.s32 1, %s5909_s17   ;;  %s10366_s12 = smov %s5893_s13 }
 0x33b   : > { %p14_p6 = scmp.ge.s32.totalorder %s17_s17, 4   ;;  %s10367_s13 = smov %s5897_s14 }
 0x33c   : > { %s10368_s14 = smov %s5993_s25  ;;  %s10369_s15 = smov %s5905_s16 }
 0x33d   : > { %s10370_s16 = smov %s10372_s20  ;;  %16 = sbr.rel (!%p14_p6) target bundleno = 5 (0x5), region = 75 }
 0x344   :  { %4028 = vsyncpa [#allocation3], 1 }
 0x345   :  { %4030 = vsyncpa [#allocation3 + $0x1], 1 }
 0x346   :  { %4031 = vsyncpa [#allocation4], 1 }
 0x347   :  { %4033 = vsyncpa [#allocation4 + $0x1], 1 }

</bundles_post_ra>
